<compile_context>
chip_gen: v5e
topology: v5e:2x2
jax: 0.10.0
libtpu: 0.0.40
codegen_flags: <defaults>
</compile_context>

<pallas_src>
import functools

import jax
import jax.numpy as jnp
from jax.experimental import pallas as pl
from jax.experimental.pallas import tpu as pltpu

_MATMUL_DTYPE = jnp.bfloat16   # MXU-native on v5e/v6e/v7x; gate math stays f32.


def _round_up(x, m):
    return (x + m - 1) // m * m


def _lstm_seq_kernel(E, R, B, T, T_BLK, Rp, needs_mask,
                     x_ref, h0_ref, c0_ref, w_ref,
                     hs_ref, cT_ref, xh_ref):
    """Runs T_BLK LSTM recurrence steps per grid invocation.

    x_ref : (T_BLK, B, E)  bf16   current block of tokens (unpadded trailing dims)
    h0/c0 : (B, R)         f32    initial state (read only at grid step 0)
    w_ref : (Kp, 5*Rp)     bf16   packed [Wi; Wh; b] (bias folded via 1-lane)
    hs_ref: (T_BLK, Bp, Rp) f32   per-step h_t (lane-dense stores)
    cT_ref: (Bp, Rp)       f32    resident cell state (carried across grid steps)
    xh_ref: (Bp, Kp)       bf16   VMEM scratch holding [x_t | h_{t-1} | 1 | 0...]
    """
    gi = pl.program_id(0)
    G = Rp                          # lane-aligned gate width (one 128-lane block per gate)
    Bp = xh_ref.shape[0]

    @pl.when(gi == 0)
    def _init():
        # Zero the fused-input scratch so padded K lanes/rows stay exactly 0,
        # plant the constant-1 bias lane, and load the initial state.
        xh_ref[...] = jnp.zeros_like(xh_ref)
        xh_ref[:, E + R:E + R + 1] = jnp.ones((Bp, 1), xh_ref.dtype)
        xh_ref[0:B, E:E + R] = h0_ref[...].astype(xh_ref.dtype)
        cT_ref[...] = jnp.zeros_like(cT_ref)
        cT_ref[0:B, 0:R] = c0_ref[...]

    def step(t, c):
        # Stream x_t into the left lanes of the fused input.
        xh_ref[0:B, 0:E] = x_ref[t]

        # all_input_sums = [x | h | 1] @ [Wi; Wh; b]  -- one bf16 MXU push,
        # f32 accumulation. No per-step bias broadcast (folded into W).
        s = jnp.dot(xh_ref[...], w_ref[...],
                    preferred_element_type=jnp.float32)

        # Sigmoid once over the whole 3-gate slab; lane-aligned gate slices.
        sig = jax.nn.sigmoid(s[:, 0:3 * G])
        in_gate = sig[:, 0:G]
        forget_gate = sig[:, G:2 * G]
        out_gate = sig[:, 2 * G:3 * G]
        in_transform = jnp.maximum(s[:, 3 * G:4 * G], s[:, 4 * G:5 * G])

        next_c = forget_gate * c + in_gate * in_transform
        next_h = out_gate * jnp.tanh(next_c)

        if needs_mask:  # static flag: only compiled in when T % T_BLK != 0
            keep = (gi * T_BLK + t) < T
            next_c = jnp.where(keep, next_c, c)

        hs_ref[t] = next_h                                          # lane-dense store
        xh_ref[:, E:E + R] = next_h[:, 0:R].astype(xh_ref.dtype)    # h feedback (bf16)
        return next_c

    c_in = cT_ref[...]
    c_out = jax.lax.fori_loop(0, T_BLK, step, c_in,
                              unroll=True if T_BLK <= 16 else False)
    cT_ref[...] = c_out


def pack_lstm_params(w_i2h, b_i2h, w_h2h, b_h2h, matmul_dtype=_MATMUL_DTYPE):
    """One-time (model-init) packing of the LSTMCore parameters.

    w_i2h: (5R, E), w_h2h: (5R, R), biases (5R,)  -- PyTorch nn.Linear layout.
    Returns (w_packed (Kp, 5*Rp) bf16, E, R, Rp, Kp).
    Rows: [0,E) = Wi^T, [E,E+R) = Wh^T, row E+R = (b_i2h + b_h2h); rest zero.
    Columns: gate g occupies [g*Rp, g*Rp + R); rest zero padding.
    """
    R5, E = w_i2h.shape
    R = R5 // 5
    Rp = _round_up(R, 128)
    Kp = _round_up(E + R + 1, 128)   # [x | h | 1] fits one lane block when E+R+1 <= 128

    w = jnp.zeros((Kp, 5 * Rp), jnp.float32)
    for g in range(5):
        wi_g = jnp.asarray(w_i2h[g * R:(g + 1) * R, :], jnp.float32).T   # (E, R)
        wh_g = jnp.asarray(w_h2h[g * R:(g + 1) * R, :], jnp.float32).T   # (R, R)
        b_g = (jnp.asarray(b_i2h[g * R:(g + 1) * R], jnp.float32)
               + jnp.asarray(b_h2h[g * R:(g + 1) * R], jnp.float32))
        w = w.at[0:E, g * Rp:g * Rp + R].set(wi_g)
        w = w.at[E:E + R, g * Rp:g * Rp + R].set(wh_g)
        w = w.at[E + R, g * Rp:g * Rp + R].set(b_g)
    return w.astype(matmul_dtype), E, R, Rp, Kp


def lstm_core_sequence(xs, h0, c0, packed, t_blk=64):
    """Run T fused LSTMCore steps.

    xs: (T, B, E), h0/c0: (B, R).
    Returns hs (T, B, R) and final state ((1, B, R), (1, B, R)).
    """
    w_packed, E, R, Rp, Kp = packed
    T, B, E_in = xs.shape
    assert E_in == E and h0.shape == (B, R) and c0.shape == (B, R)
    Bp = _round_up(B, 8)
    T_BLK = min(T, t_blk)
    T_pad = _round_up(T, T_BLK)
    needs_mask = T_pad != T

    # Only the time axis is (cheaply) padded; B/E stay unpadded (full-extent
    # trailing block dims) and the in-kernel store does the padding.
    xs_in = xs.astype(_MATMUL_DTYPE)
    if needs_mask:
        xs_in = jnp.concatenate(
            [xs_in, jnp.zeros((T_pad - T, B, E), _MATMUL_DTYPE)], axis=0)
    h0_in = h0.astype(jnp.float32)
    c0_in = c0.astype(jnp.float32)

    kernel = functools.partial(_lstm_seq_kernel, E, R, B, T, T_BLK, Rp,
                               needs_mask)

    hs_p, cT_p = pl.pallas_call(
        kernel,
        out_shape=(
            jax.ShapeDtypeStruct((T_pad, Bp, Rp), jnp.float32),   # h_t for every t
            jax.ShapeDtypeStruct((Bp, Rp), jnp.float32),          # final c
        ),
        grid=(T_pad // T_BLK,),
        in_specs=[
            pl.BlockSpec((T_BLK, B, E), lambda i: (i, 0, 0)),     # xs, streamed per block
            pl.BlockSpec((B, R), lambda i: (0, 0)),               # h0 (resident)
            pl.BlockSpec((B, R), lambda i: (0, 0)),               # c0 (resident)
            pl.BlockSpec((Kp, 5 * Rp), lambda i: (0, 0)),         # packed W+bias (resident)
        ],
        out_specs=(
            pl.BlockSpec((T_BLK, Bp, Rp), lambda i: (i, 0, 0)),   # h_t per step
            pl.BlockSpec((Bp, Rp), lambda i: (0, 0)),             # c carried/resident
        ),
        scratch_shapes=[pltpu.VMEM((Bp, Kp), _MATMUL_DTYPE)],     # [x | h | 1] scratch
        compiler_params=pltpu.CompilerParams(
            dimension_semantics=("arbitrary",)),                   # true recurrence
    )(xs_in, h0_in, c0_in, w_packed)

    hs = hs_p[:T, :B, :R]
    hT = hs[-1]
    cT = cT_p[:B, :R]
    return hs, (hT[None, ...], cT[None, ...])


def lstm_core_step(xt, state, packed):
    """Single LSTMCore step matching the PyTorch module API (eval mode)."""
    h_prev = state[0][-1]
    c_prev = state[1][-1]
    hs, new_state = lstm_core_sequence(xt[None, ...], h_prev, c_prev, packed)
    output = hs[0]          # dropout is identity in eval mode
    return output, new_state


# -------------------- references (pure JAX) ----------------------------------

def _kernel_numerics_reference(xs, h0, c0, packed):
    """Pure-JAX model of the kernel's numerics: bf16 matmul operands
    (x, h, W+bias), f32 accumulation and f32 gate math. Tight parity check."""
    w_packed, E, R, Rp, Kp = packed
    w = jnp.concatenate(
        [w_packed[:E + R + 1, g * Rp:g * Rp + R] for g in range(5)], axis=1)
    B = xs.shape[1]
    ones = jnp.ones((B, 1), _MATMUL_DTYPE)

    def step(carry, x_t):
        h, c = carry
        xh = jnp.concatenate(
            [x_t.astype(_MATMUL_DTYPE), h.astype(_MATMUL_DTYPE), ones], axis=1)
        s = jnp.dot(xh, w, preferred_element_type=jnp.float32)
        sig = jax.nn.sigmoid(s[:, :3 * R])
        i_g, f_g, o_g = sig[:, :R], sig[:, R:2 * R], sig[:, 2 * R:3 * R]
        g_t = jnp.maximum(s[:, 3 * R:4 * R], s[:, 4 * R:5 * R])
        nc = f_g * c + i_g * g_t
        nh = o_g * jnp.tanh(nc)
        return (nh, nc), nh

    (hT, cT), hs = jax.lax.scan(
        step, (h0.astype(jnp.float32), c0.astype(jnp.float32)),
        xs.astype(jnp.float32))
    return hs, hT, cT


def _reference_step_f32(xt, h, c, w_i2h, b_i2h, w_h2h, b_h2h, R):
    """Exact-f32 semantics of LSTMCore.forward."""
    hi = jax.lax.Precision.HIGHEST
    s = (jnp.dot(xt, w_i2h.T, precision=hi) + b_i2h
         + jnp.dot(h, w_h2h.T, precision=hi) + b_h2h)
    sig = jax.nn.sigmoid(s[:, :3 * R])
    i_g, f_g, o_g = sig[:, :R], sig[:, R:2 * R], sig[:, 2 * R:3 * R]
    g_t = jnp.maximum(s[:, 3 * R:4 * R], s[:, 4 * R:5 * R])
    nc = f_g * c + i_g * g_t
    nh = o_g * jnp.tanh(nc)
    return nh, nc


def _reference_sequence_f32(xs, h0, c0, w_i2h, b_i2h, w_h2h, b_h2h, R):
    def step(carry, xt):
        h, c = carry
        nh, nc = _reference_step_f32(xt, h, c, w_i2h, b_i2h, w_h2h, b_h2h, R)
        return (nh, nc), nh
    (hT, cT), hs = jax.lax.scan(step, (h0, c0), xs)
    return hs, hT, cT


if __name__ == "__main__":
    T = 8      # sequence length (fused into one pallas_call grid step)
    B = 4      # batch
    E = 16     # input_encoding_size
    R = 32     # rnn_size

    key = jax.random.PRNGKey(0)
    k = jax.random.split(key, 7)
    xs = jax.random.normal(k[0], (T, B, E), jnp.float32)
    h0 = jax.random.normal(k[1], (B, R), jnp.float32)
    c0 = jax.random.normal(k[2], (B, R), jnp.float32)

    # nn.Linear parameter layout: weight (out_features, in_features)
    bound_i = 1.0 / (E ** 0.5)
    bound_h = 1.0 / (R ** 0.5)
    w_i2h = jax.random.uniform(k[3], (5 * R, E), jnp.float32, -bound_i, bound_i)
    b_i2h = jax.random.uniform(k[4], (5 * R,), jnp.float32, -bound_i, bound_i)
    w_h2h = jax.random.uniform(k[5], (5 * R, R), jnp.float32, -bound_h, bound_h)
    b_h2h = jax.random.uniform(k[6], (5 * R,), jnp.float32, -bound_h, bound_h)

    # One-time packing (hoisted out of the hot path).
    packed = pack_lstm_params(w_i2h, b_i2h, w_h2h, b_h2h)

    # --- fused sequence kernel ---
    hs, (next_h, next_c) = lstm_core_sequence(xs, h0, c0, packed)
    jax.block_until_ready((hs, next_h, next_c))

    assert hs.shape == (T, B, R)
    assert next_h.shape == (1, B, R) and next_c.shape == (1, B, R)

    # Tight parity vs. a JAX reference that mimics the kernel numerics exactly.
    sim_hs, sim_hT, sim_cT = _kernel_numerics_reference(xs, h0, c0, packed)
    assert jnp.allclose(hs, sim_hs, atol=1e-2, rtol=1e-2)
    assert jnp.allclose(next_h[0], sim_hT, atol=1e-2, rtol=1e-2)
    assert jnp.allclose(next_c[0], sim_cT, atol=1e-2, rtol=1e-2)

    # Loose semantic parity vs. the exact-f32 reference (bf16 matmul operands).
    ref_hs, ref_hT, ref_cT = _reference_sequence_f32(
        xs, h0, c0, w_i2h, b_i2h, w_h2h, b_h2h, R)
    assert jnp.allclose(hs, ref_hs, atol=2e-1, rtol=2e-1)
    assert jnp.allclose(next_h[0], ref_hT, atol=2e-1, rtol=2e-1)
    assert jnp.allclose(next_c[0], ref_cT, atol=2e-1, rtol=2e-1)

    # --- single-step API (matches the PyTorch module forward) ---
    out1, (h1, c1) = lstm_core_step(xs[0], (h0[None], c0[None]), packed)
    jax.block_until_ready((out1, h1, c1))
    sim1_hs, sim1_hT, sim1_cT = _kernel_numerics_reference(
        xs[:1], h0, c0, packed)
    assert jnp.allclose(out1, sim1_hs[0], atol=1e-2, rtol=1e-2)
    assert jnp.allclose(h1[0], sim1_hT, atol=1e-2, rtol=1e-2)
    assert jnp.allclose(c1[0], sim1_cT, atol=1e-2, rtol=1e-2)

    print("KERNEL_OK")
</pallas_src>

<mosaic_0001>
module attributes {stable_mosaic.version = 11 : i64} {
  func.func @_lstm_seq_kernel(%arg0: i32, %arg1: memref<8x4x16xbf16, #tpu.memory_space<vmem>>, %arg2: memref<4x32xf32, #tpu.memory_space<vmem>>, %arg3: memref<4x32xf32, #tpu.memory_space<vmem>>, %arg4: memref<128x640xbf16, #tpu.memory_space<vmem>>, %arg5: memref<8x8x128xf32, #tpu.memory_space<vmem>>, %arg6: memref<8x128xf32, #tpu.memory_space<vmem>>, %arg7: memref<8x128xbf16, #tpu.memory_space<vmem>>) attributes {dimension_semantics = [#tpu.dimension_semantics<arbitrary>], iteration_bounds = array<i64: 1>, scalar_prefetch = 0 : i64, scratch_operands = 1 : i64, tpu.core_type = #tpu.core_type<tc>, window_params = [{transform_indices = @transform_0, window_bounds = array<i64: 8, 4, 16>}, {pipeline_mode = #tpu.pipeline_mode<synchronous>, transform_indices = @transform_1, window_bounds = array<i64: 4, 32>}, {pipeline_mode = #tpu.pipeline_mode<synchronous>, transform_indices = @transform_2, window_bounds = array<i64: 4, 32>}, {pipeline_mode = #tpu.pipeline_mode<synchronous>, transform_indices = @transform_3, window_bounds = array<i64: 128, 640>}, {transform_indices = @transform_4, window_bounds = array<i64: 8, 8, 128>}, {pipeline_mode = #tpu.pipeline_mode<synchronous>, transform_indices = @transform_5, window_bounds = array<i64: 8, 128>}]} {
    %c0_i32 = arith.constant 0 : i32
    %0 = arith.cmpi eq, %arg0, %c0_i32 : i32
    %1 = arith.extui %0 : i1 to i32
    %c0_i32_0 = arith.constant 0 : i32
    %2 = arith.cmpi ne, %1, %c0_i32_0 : i32
    scf.if %2 {
      %cst_115 = arith.constant 0.000000e+00 : bf16
      %253 = vector.broadcast %cst_115 : bf16 to vector<8x128xbf16>
      %c0_116 = arith.constant 0 : index
      %c0_117 = arith.constant 0 : index
      %254 = vector.load %arg7[%c0_116, %c0_117] : memref<8x128xbf16, #tpu.memory_space<vmem>>, vector<8x128xbf16>
      tpu.vector_store %arg7[%c0_116, %c0_117], %253 {strides = array<i32>} : memref<8x128xbf16, #tpu.memory_space<vmem>>, vector<8x128xbf16>,
      %cst_118 = arith.constant 1.000000e+00 : bf16
      %255 = vector.broadcast %cst_118 : bf16 to vector<8x1xbf16>
      %c0_119 = arith.constant 0 : index
      %c48 = arith.constant 48 : index
      %256 = vector.load %arg7[%c0_119, %c48] : memref<8x128xbf16, #tpu.memory_space<vmem>>, vector<8x1xbf16>
      tpu.vector_store %arg7[%c0_119, %c48], %255 {strides = array<i32>} : memref<8x128xbf16, #tpu.memory_space<vmem>>, vector<8x1xbf16>,
      %c0_120 = arith.constant 0 : index
      %c0_121 = arith.constant 0 : index
      %257 = vector.load %arg2[%c0_120, %c0_121] : memref<4x32xf32, #tpu.memory_space<vmem>>, vector<4x32xf32>
      %258 = arith.truncf %257 : vector<4x32xf32> to vector<4x32xbf16>
      %c0_122 = arith.constant 0 : index
      %c16_123 = arith.constant 16 : index
      %259 = vector.load %arg7[%c0_122, %c16_123] : memref<8x128xbf16, #tpu.memory_space<vmem>>, vector<4x32xbf16>
      tpu.vector_store %arg7[%c0_122, %c16_123], %258 {strides = array<i32>} : memref<8x128xbf16, #tpu.memory_space<vmem>>, vector<4x32xbf16>,
      %cst_124 = arith.constant 0.000000e+00 : f32
      %260 = vector.broadcast %cst_124 : f32 to vector<8x128xf32>
      %c0_125 = arith.constant 0 : index
      %c0_126 = arith.constant 0 : index
      %261 = vector.load %arg6[%c0_125, %c0_126] : memref<8x128xf32, #tpu.memory_space<vmem>>, vector<8x128xf32>
      tpu.vector_store %arg6[%c0_125, %c0_126], %260 {strides = array<i32>} : memref<8x128xf32, #tpu.memory_space<vmem>>, vector<8x128xf32>,
      %c0_127 = arith.constant 0 : index
      %c0_128 = arith.constant 0 : index
      %262 = vector.load %arg3[%c0_127, %c0_128] : memref<4x32xf32, #tpu.memory_space<vmem>>, vector<4x32xf32>
      %c0_129 = arith.constant 0 : index
      %c0_130 = arith.constant 0 : index
      %263 = vector.load %arg6[%c0_129, %c0_130] : memref<8x128xf32, #tpu.memory_space<vmem>>, vector<4x32xf32>
      tpu.vector_store %arg6[%c0_129, %c0_130], %262 {strides = array<i32>} : memref<8x128xf32, #tpu.memory_space<vmem>>, vector<4x32xf32>,
    } else {
    }
    %c0 = arith.constant 0 : index
    %c0_1 = arith.constant 0 : index
    %3 = vector.load %arg6[%c0, %c0_1] : memref<8x128xf32, #tpu.memory_space<vmem>>, vector<8x128xf32>
    %c0_i32_2 = arith.constant 0 : i32
    %4 = arith.index_cast %c0_i32_2 : i32 to index
    %c0_3 = arith.constant 0 : index
    %c0_4 = arith.constant 0 : index
    %5 = vector.load %arg1[%4, %c0_3, %c0_4] : memref<8x4x16xbf16, #tpu.memory_space<vmem>>, vector<1x4x16xbf16>
    %6 = vector.shape_cast %5 : vector<1x4x16xbf16> to vector<4x16xbf16>
    %c0_5 = arith.constant 0 : index
    %c0_6 = arith.constant 0 : index
    %7 = vector.load %arg7[%c0_5, %c0_6] : memref<8x128xbf16, #tpu.memory_space<vmem>>, vector<4x16xbf16>
    tpu.vector_store %arg7[%c0_5, %c0_6], %6 {strides = array<i32>} : memref<8x128xbf16, #tpu.memory_space<vmem>>, vector<4x16xbf16>,
    %c0_7 = arith.constant 0 : index
    %c0_8 = arith.constant 0 : index
    %8 = vector.load %arg7[%c0_7, %c0_8] : memref<8x128xbf16, #tpu.memory_space<vmem>>, vector<8x128xbf16>
    %c0_9 = arith.constant 0 : index
    %c0_10 = arith.constant 0 : index
    %9 = vector.load %arg4[%c0_9, %c0_10] : memref<128x640xbf16, #tpu.memory_space<vmem>>, vector<128x640xbf16>
    %cst = arith.constant dense<0.000000e+00> : vector<8x640xf32>
    %10 = tpu.matmul %8, %9, %cst {dimension_numbers = #tpu.dot_dimension_numbers<[1], [0], [0], [1], [0, 0, 1, 1], [], []>} : vector<8x128xbf16>, vector<128x640xbf16>, vector<8x640xf32> -> vector<8x640xf32>
    %11 = vector.extract_strided_slice %10 {offsets = [0, 0], sizes = [8, 384], strides = [1, 1]} : vector<8x640xf32> to vector<8x384xf32>
    %12 = arith.negf %11 : vector<8x384xf32>
    %13 = math.exp %12 : vector<8x384xf32>
    %cst_11 = arith.constant 1.000000e+00 : f32
    %14 = vector.broadcast %cst_11 : f32 to vector<8x384xf32>
    %15 = arith.addf %14, %13 : vector<8x384xf32>
    %16 = arith.divf %14, %15 : vector<8x384xf32>
    %17 = vector.extract_strided_slice %16 {offsets = [0, 0], sizes = [8, 128], strides = [1, 1]} : vector<8x384xf32> to vector<8x128xf32>
    %18 = vector.extract_strided_slice %16 {offsets = [0, 128], sizes = [8, 128], strides = [1, 1]} : vector<8x384xf32> to vector<8x128xf32>
    %19 = vector.extract_strided_slice %16 {offsets = [0, 256], sizes = [8, 128], strides = [1, 1]} : vector<8x384xf32> to vector<8x128xf32>
    %20 = vector.extract_strided_slice %10 {offsets = [0, 384], sizes = [8, 128], strides = [1, 1]} : vector<8x640xf32> to vector<8x128xf32>
    %21 = vector.extract_strided_slice %10 {offsets = [0, 512], sizes = [8, 128], strides = [1, 1]} : vector<8x640xf32> to vector<8x128xf32>
    %22 = arith.maximumf %20, %21 : vector<8x128xf32>
    %23 = arith.mulf %18, %3 : vector<8x128xf32>
    %24 = arith.mulf %17, %22 : vector<8x128xf32>
    %25 = arith.addf %23, %24 : vector<8x128xf32>
    %26 = math.tanh %25 : vector<8x128xf32>
    %27 = arith.mulf %19, %26 : vector<8x128xf32>
    %28 = arith.index_cast %c0_i32_2 : i32 to index
    %c0_12 = arith.constant 0 : index
    %c0_13 = arith.constant 0 : index
    %29 = vector.load %arg5[%28, %c0_12, %c0_13] : memref<8x8x128xf32, #tpu.memory_space<vmem>>, vector<1x8x128xf32>
    %30 = vector.shape_cast %29 : vector<1x8x128xf32> to vector<8x128xf32>
    %31 = vector.shape_cast %27 : vector<8x128xf32> to vector<1x8x128xf32>
    tpu.vector_store %arg5[%28, %c0_12, %c0_13], %31 {strides = array<i32>} : memref<8x8x128xf32, #tpu.memory_space<vmem>>, vector<1x8x128xf32>,
    %32 = vector.extract_strided_slice %27 {offsets = [0, 0], sizes = [8, 32], strides = [1, 1]} : vector<8x128xf32> to vector<8x32xf32>
    %33 = arith.truncf %32 : vector<8x32xf32> to vector<8x32xbf16>
    %c0_14 = arith.constant 0 : index
    %c16 = arith.constant 16 : index
    %34 = vector.load %arg7[%c0_14, %c16] : memref<8x128xbf16, #tpu.memory_space<vmem>>, vector<8x32xbf16>
    tpu.vector_store %arg7[%c0_14, %c16], %33 {strides = array<i32>} : memref<8x128xbf16, #tpu.memory_space<vmem>>, vector<8x32xbf16>,
    %c1_i32 = arith.constant 1 : i32
    %35 = arith.index_cast %c1_i32 : i32 to index
    %c0_15 = arith.constant 0 : index
    %c0_16 = arith.constant 0 : index
    %36 = vector.load %arg1[%35, %c0_15, %c0_16] : memref<8x4x16xbf16, #tpu.memory_space<vmem>>, vector<1x4x16xbf16>
    %37 = vector.shape_cast %36 : vector<1x4x16xbf16> to vector<4x16xbf16>
    %c0_17 = arith.constant 0 : index
    %c0_18 = arith.constant 0 : index
    %38 = vector.load %arg7[%c0_17, %c0_18] : memref<8x128xbf16, #tpu.memory_space<vmem>>, vector<4x16xbf16>
    tpu.vector_store %arg7[%c0_17, %c0_18], %37 {strides = array<i32>} : memref<8x128xbf16, #tpu.memory_space<vmem>>, vector<4x16xbf16>,
    %c0_19 = arith.constant 0 : index
    %c0_20 = arith.constant 0 : index
    %39 = vector.load %arg7[%c0_19, %c0_20] : memref<8x128xbf16, #tpu.memory_space<vmem>>, vector<8x128xbf16>
    %c0_21 = arith.constant 0 : index
    %c0_22 = arith.constant 0 : index
    %40 = vector.load %arg4[%c0_21, %c0_22] : memref<128x640xbf16, #tpu.memory_space<vmem>>, vector<128x640xbf16>
    %cst_23 = arith.constant dense<0.000000e+00> : vector<8x640xf32>
    %41 = tpu.matmul %39, %40, %cst_23 {dimension_numbers = #tpu.dot_dimension_numbers<[1], [0], [0], [1], [0, 0, 1, 1], [], []>} : vector<8x128xbf16>, vector<128x640xbf16>, vector<8x640xf32> -> vector<8x640xf32>
    %42 = vector.extract_strided_slice %41 {offsets = [0, 0], sizes = [8, 384], strides = [1, 1]} : vector<8x640xf32> to vector<8x384xf32>
    %43 = arith.negf %42 : vector<8x384xf32>
    %44 = math.exp %43 : vector<8x384xf32>
    %cst_24 = arith.constant 1.000000e+00 : f32
    %45 = vector.broadcast %cst_24 : f32 to vector<8x384xf32>
    %46 = arith.addf %45, %44 : vector<8x384xf32>
    %47 = arith.divf %45, %46 : vector<8x384xf32>
    %48 = vector.extract_strided_slice %47 {offsets = [0, 0], sizes = [8, 128], strides = [1, 1]} : vector<8x384xf32> to vector<8x128xf32>
    %49 = vector.extract_strided_slice %47 {offsets = [0, 128], sizes = [8, 128], strides = [1, 1]} : vector<8x384xf32> to vector<8x128xf32>
    %50 = vector.extract_strided_slice %47 {offsets = [0, 256], sizes = [8, 128], strides = [1, 1]} : vector<8x384xf32> to vector<8x128xf32>
    %51 = vector.extract_strided_slice %41 {offsets = [0, 384], sizes = [8, 128], strides = [1, 1]} : vector<8x640xf32> to vector<8x128xf32>
    %52 = vector.extract_strided_slice %41 {offsets = [0, 512], sizes = [8, 128], strides = [1, 1]} : vector<8x640xf32> to vector<8x128xf32>
    %53 = arith.maximumf %51, %52 : vector<8x128xf32>
    %54 = arith.mulf %49, %25 : vector<8x128xf32>
    %55 = arith.mulf %48, %53 : vector<8x128xf32>
    %56 = arith.addf %54, %55 : vector<8x128xf32>
    %57 = math.tanh %56 : vector<8x128xf32>
    %58 = arith.mulf %50, %57 : vector<8x128xf32>
    %59 = arith.index_cast %c1_i32 : i32 to index
    %c0_25 = arith.constant 0 : index
    %c0_26 = arith.constant 0 : index
    %60 = vector.load %arg5[%59, %c0_25, %c0_26] : memref<8x8x128xf32, #tpu.memory_space<vmem>>, vector<1x8x128xf32>
    %61 = vector.shape_cast %60 : vector<1x8x128xf32> to vector<8x128xf32>
    %62 = vector.shape_cast %58 : vector<8x128xf32> to vector<1x8x128xf32>
    tpu.vector_store %arg5[%59, %c0_25, %c0_26], %62 {strides = array<i32>} : memref<8x8x128xf32, #tpu.memory_space<vmem>>, vector<1x8x128xf32>,
    %63 = vector.extract_strided_slice %58 {offsets = [0, 0], sizes = [8, 32], strides = [1, 1]} : vector<8x128xf32> to vector<8x32xf32>
    %64 = arith.truncf %63 : vector<8x32xf32> to vector<8x32xbf16>
    %c0_27 = arith.constant 0 : index
    %c16_28 = arith.constant 16 : index
    %65 = vector.load %arg7[%c0_27, %c16_28] : memref<8x128xbf16, #tpu.memory_space<vmem>>, vector<8x32xbf16>
    tpu.vector_store %arg7[%c0_27, %c16_28], %64 {strides = array<i32>} : memref<8x128xbf16, #tpu.memory_space<vmem>>, vector<8x32xbf16>,
    %c2_i32 = arith.constant 2 : i32
    %66 = arith.index_cast %c2_i32 : i32 to index
    %c0_29 = arith.constant 0 : index
    %c0_30 = arith.constant 0 : index
    %67 = vector.load %arg1[%66, %c0_29, %c0_30] : memref<8x4x16xbf16, #tpu.memory_space<vmem>>, vector<1x4x16xbf16>
    %68 = vector.shape_cast %67 : vector<1x4x16xbf16> to vector<4x16xbf16>
    %c0_31 = arith.constant 0 : index
    %c0_32 = arith.constant 0 : index
    %69 = vector.load %arg7[%c0_31, %c0_32] : memref<8x128xbf16, #tpu.memory_space<vmem>>, vector<4x16xbf16>
    tpu.vector_store %arg7[%c0_31, %c0_32], %68 {strides = array<i32>} : memref<8x128xbf16, #tpu.memory_space<vmem>>, vector<4x16xbf16>,
    %c0_33 = arith.constant 0 : index
    %c0_34 = arith.constant 0 : index
    %70 = vector.load %arg7[%c0_33, %c0_34] : memref<8x128xbf16, #tpu.memory_space<vmem>>, vector<8x128xbf16>
    %c0_35 = arith.constant 0 : index
    %c0_36 = arith.constant 0 : index
    %71 = vector.load %arg4[%c0_35, %c0_36] : memref<128x640xbf16, #tpu.memory_space<vmem>>, vector<128x640xbf16>
    %cst_37 = arith.constant dense<0.000000e+00> : vector<8x640xf32>
    %72 = tpu.matmul %70, %71, %cst_37 {dimension_numbers = #tpu.dot_dimension_numbers<[1], [0], [0], [1], [0, 0, 1, 1], [], []>} : vector<8x128xbf16>, vector<128x640xbf16>, vector<8x640xf32> -> vector<8x640xf32>
    %73 = vector.extract_strided_slice %72 {offsets = [0, 0], sizes = [8, 384], strides = [1, 1]} : vector<8x640xf32> to vector<8x384xf32>
    %74 = arith.negf %73 : vector<8x384xf32>
    %75 = math.exp %74 : vector<8x384xf32>
    %cst_38 = arith.constant 1.000000e+00 : f32
    %76 = vector.broadcast %cst_38 : f32 to vector<8x384xf32>
    %77 = arith.addf %76, %75 : vector<8x384xf32>
    %78 = arith.divf %76, %77 : vector<8x384xf32>
    %79 = vector.extract_strided_slice %78 {offsets = [0, 0], sizes = [8, 128], strides = [1, 1]} : vector<8x384xf32> to vector<8x128xf32>
    %80 = vector.extract_strided_slice %78 {offsets = [0, 128], sizes = [8, 128], strides = [1, 1]} : vector<8x384xf32> to vector<8x128xf32>
    %81 = vector.extract_strided_slice %78 {offsets = [0, 256], sizes = [8, 128], strides = [1, 1]} : vector<8x384xf32> to vector<8x128xf32>
    %82 = vector.extract_strided_slice %72 {offsets = [0, 384], sizes = [8, 128], strides = [1, 1]} : vector<8x640xf32> to vector<8x128xf32>
    %83 = vector.extract_strided_slice %72 {offsets = [0, 512], sizes = [8, 128], strides = [1, 1]} : vector<8x640xf32> to vector<8x128xf32>
    %84 = arith.maximumf %82, %83 : vector<8x128xf32>
    %85 = arith.mulf %80, %56 : vector<8x128xf32>
    %86 = arith.mulf %79, %84 : vector<8x128xf32>
    %87 = arith.addf %85, %86 : vector<8x128xf32>
    %88 = math.tanh %87 : vector<8x128xf32>
    %89 = arith.mulf %81, %88 : vector<8x128xf32>
    %90 = arith.index_cast %c2_i32 : i32 to index
    %c0_39 = arith.constant 0 : index
    %c0_40 = arith.constant 0 : index
    %91 = vector.load %arg5[%90, %c0_39, %c0_40] : memref<8x8x128xf32, #tpu.memory_space<vmem>>, vector<1x8x128xf32>
    %92 = vector.shape_cast %91 : vector<1x8x128xf32> to vector<8x128xf32>
    %93 = vector.shape_cast %89 : vector<8x128xf32> to vector<1x8x128xf32>
    tpu.vector_store %arg5[%90, %c0_39, %c0_40], %93 {strides = array<i32>} : memref<8x8x128xf32, #tpu.memory_space<vmem>>, vector<1x8x128xf32>,
    %94 = vector.extract_strided_slice %89 {offsets = [0, 0], sizes = [8, 32], strides = [1, 1]} : vector<8x128xf32> to vector<8x32xf32>
    %95 = arith.truncf %94 : vector<8x32xf32> to vector<8x32xbf16>
    %c0_41 = arith.constant 0 : index
    %c16_42 = arith.constant 16 : index
    %96 = vector.load %arg7[%c0_41, %c16_42] : memref<8x128xbf16, #tpu.memory_space<vmem>>, vector<8x32xbf16>
    tpu.vector_store %arg7[%c0_41, %c16_42], %95 {strides = array<i32>} : memref<8x128xbf16, #tpu.memory_space<vmem>>, vector<8x32xbf16>,
    %c3_i32 = arith.constant 3 : i32
    %97 = arith.index_cast %c3_i32 : i32 to index
    %c0_43 = arith.constant 0 : index
    %c0_44 = arith.constant 0 : index
    %98 = vector.load %arg1[%97, %c0_43, %c0_44] : memref<8x4x16xbf16, #tpu.memory_space<vmem>>, vector<1x4x16xbf16>
    %99 = vector.shape_cast %98 : vector<1x4x16xbf16> to vector<4x16xbf16>
    %c0_45 = arith.constant 0 : index
    %c0_46 = arith.constant 0 : index
    %100 = vector.load %arg7[%c0_45, %c0_46] : memref<8x128xbf16, #tpu.memory_space<vmem>>, vector<4x16xbf16>
    tpu.vector_store %arg7[%c0_45, %c0_46], %99 {strides = array<i32>} : memref<8x128xbf16, #tpu.memory_space<vmem>>, vector<4x16xbf16>,
    %c0_47 = arith.constant 0 : index
    %c0_48 = arith.constant 0 : index
    %101 = vector.load %arg7[%c0_47, %c0_48] : memref<8x128xbf16, #tpu.memory_space<vmem>>, vector<8x128xbf16>
    %c0_49 = arith.constant 0 : index
    %c0_50 = arith.constant 0 : index
    %102 = vector.load %arg4[%c0_49, %c0_50] : memref<128x640xbf16, #tpu.memory_space<vmem>>, vector<128x640xbf16>
    %cst_51 = arith.constant dense<0.000000e+00> : vector<8x640xf32>
    %103 = tpu.matmul %101, %102, %cst_51 {dimension_numbers = #tpu.dot_dimension_numbers<[1], [0], [0], [1], [0, 0, 1, 1], [], []>} : vector<8x128xbf16>, vector<128x640xbf16>, vector<8x640xf32> -> vector<8x640xf32>
    %104 = vector.extract_strided_slice %103 {offsets = [0, 0], sizes = [8, 384], strides = [1, 1]} : vector<8x640xf32> to vector<8x384xf32>
    %105 = arith.negf %104 : vector<8x384xf32>
    %106 = math.exp %105 : vector<8x384xf32>
    %cst_52 = arith.constant 1.000000e+00 : f32
    %107 = vector.broadcast %cst_52 : f32 to vector<8x384xf32>
    %108 = arith.addf %107, %106 : vector<8x384xf32>
    %109 = arith.divf %107, %108 : vector<8x384xf32>
    %110 = vector.extract_strided_slice %109 {offsets = [0, 0], sizes = [8, 128], strides = [1, 1]} : vector<8x384xf32> to vector<8x128xf32>
    %111 = vector.extract_strided_slice %109 {offsets = [0, 128], sizes = [8, 128], strides = [1, 1]} : vector<8x384xf32> to vector<8x128xf32>
    %112 = vector.extract_strided_slice %109 {offsets = [0, 256], sizes = [8, 128], strides = [1, 1]} : vector<8x384xf32> to vector<8x128xf32>
    %113 = vector.extract_strided_slice %103 {offsets = [0, 384], sizes = [8, 128], strides = [1, 1]} : vector<8x640xf32> to vector<8x128xf32>
    %114 = vector.extract_strided_slice %103 {offsets = [0, 512], sizes = [8, 128], strides = [1, 1]} : vector<8x640xf32> to vector<8x128xf32>
    %115 = arith.maximumf %113, %114 : vector<8x128xf32>
    %116 = arith.mulf %111, %87 : vector<8x128xf32>
    %117 = arith.mulf %110, %115 : vector<8x128xf32>
    %118 = arith.addf %116, %117 : vector<8x128xf32>
    %119 = math.tanh %118 : vector<8x128xf32>
    %120 = arith.mulf %112, %119 : vector<8x128xf32>
    %121 = arith.index_cast %c3_i32 : i32 to index
    %c0_53 = arith.constant 0 : index
    %c0_54 = arith.constant 0 : index
    %122 = vector.load %arg5[%121, %c0_53, %c0_54] : memref<8x8x128xf32, #tpu.memory_space<vmem>>, vector<1x8x128xf32>
    %123 = vector.shape_cast %122 : vector<1x8x128xf32> to vector<8x128xf32>
    %124 = vector.shape_cast %120 : vector<8x128xf32> to vector<1x8x128xf32>
    tpu.vector_store %arg5[%121, %c0_53, %c0_54], %124 {strides = array<i32>} : memref<8x8x128xf32, #tpu.memory_space<vmem>>, vector<1x8x128xf32>,
    %125 = vector.extract_strided_slice %120 {offsets = [0, 0], sizes = [8, 32], strides = [1, 1]} : vector<8x128xf32> to vector<8x32xf32>
    %126 = arith.truncf %125 : vector<8x32xf32> to vector<8x32xbf16>
    %c0_55 = arith.constant 0 : index
    %c16_56 = arith.constant 16 : index
    %127 = vector.load %arg7[%c0_55, %c16_56] : memref<8x128xbf16, #tpu.memory_space<vmem>>, vector<8x32xbf16>
    tpu.vector_store %arg7[%c0_55, %c16_56], %126 {strides = array<i32>} : memref<8x128xbf16, #tpu.memory_space<vmem>>, vector<8x32xbf16>,
    %c4_i32 = arith.constant 4 : i32
    %128 = arith.index_cast %c4_i32 : i32 to index
    %c0_57 = arith.constant 0 : index
    %c0_58 = arith.constant 0 : index
    %129 = vector.load %arg1[%128, %c0_57, %c0_58] : memref<8x4x16xbf16, #tpu.memory_space<vmem>>, vector<1x4x16xbf16>
    %130 = vector.shape_cast %129 : vector<1x4x16xbf16> to vector<4x16xbf16>
    %c0_59 = arith.constant 0 : index
    %c0_60 = arith.constant 0 : index
    %131 = vector.load %arg7[%c0_59, %c0_60] : memref<8x128xbf16, #tpu.memory_space<vmem>>, vector<4x16xbf16>
    tpu.vector_store %arg7[%c0_59, %c0_60], %130 {strides = array<i32>} : memref<8x128xbf16, #tpu.memory_space<vmem>>, vector<4x16xbf16>,
    %c0_61 = arith.constant 0 : index
    %c0_62 = arith.constant 0 : index
    %132 = vector.load %arg7[%c0_61, %c0_62] : memref<8x128xbf16, #tpu.memory_space<vmem>>, vector<8x128xbf16>
    %c0_63 = arith.constant 0 : index
    %c0_64 = arith.constant 0 : index
    %133 = vector.load %arg4[%c0_63, %c0_64] : memref<128x640xbf16, #tpu.memory_space<vmem>>, vector<128x640xbf16>
    %cst_65 = arith.constant dense<0.000000e+00> : vector<8x640xf32>
    %134 = tpu.matmul %132, %133, %cst_65 {dimension_numbers = #tpu.dot_dimension_numbers<[1], [0], [0], [1], [0, 0, 1, 1], [], []>} : vector<8x128xbf16>, vector<128x640xbf16>, vector<8x640xf32> -> vector<8x640xf32>
    %135 = vector.extract_strided_slice %134 {offsets = [0, 0], sizes = [8, 384], strides = [1, 1]} : vector<8x640xf32> to vector<8x384xf32>
    %136 = arith.negf %135 : vector<8x384xf32>
    %137 = math.exp %136 : vector<8x384xf32>
    %cst_66 = arith.constant 1.000000e+00 : f32
    %138 = vector.broadcast %cst_66 : f32 to vector<8x384xf32>
    %139 = arith.addf %138, %137 : vector<8x384xf32>
    %140 = arith.divf %138, %139 : vector<8x384xf32>
    %141 = vector.extract_strided_slice %140 {offsets = [0, 0], sizes = [8, 128], strides = [1, 1]} : vector<8x384xf32> to vector<8x128xf32>
    %142 = vector.extract_strided_slice %140 {offsets = [0, 128], sizes = [8, 128], strides = [1, 1]} : vector<8x384xf32> to vector<8x128xf32>
    %143 = vector.extract_strided_slice %140 {offsets = [0, 256], sizes = [8, 128], strides = [1, 1]} : vector<8x384xf32> to vector<8x128xf32>
    %144 = vector.extract_strided_slice %134 {offsets = [0, 384], sizes = [8, 128], strides = [1, 1]} : vector<8x640xf32> to vector<8x128xf32>
    %145 = vector.extract_strided_slice %134 {offsets = [0, 512], sizes = [8, 128], strides = [1, 1]} : vector<8x640xf32> to vector<8x128xf32>
    %146 = arith.maximumf %144, %145 : vector<8x128xf32>
    %147 = arith.mulf %142, %118 : vector<8x128xf32>
    %148 = arith.mulf %141, %146 : vector<8x128xf32>
    %149 = arith.addf %147, %148 : vector<8x128xf32>
    %150 = math.tanh %149 : vector<8x128xf32>
    %151 = arith.mulf %143, %150 : vector<8x128xf32>
    %152 = arith.index_cast %c4_i32 : i32 to index
    %c0_67 = arith.constant 0 : index
    %c0_68 = arith.constant 0 : index
    %153 = vector.load %arg5[%152, %c0_67, %c0_68] : memref<8x8x128xf32, #tpu.memory_space<vmem>>, vector<1x8x128xf32>
    %154 = vector.shape_cast %153 : vector<1x8x128xf32> to vector<8x128xf32>
    %155 = vector.shape_cast %151 : vector<8x128xf32> to vector<1x8x128xf32>
    tpu.vector_store %arg5[%152, %c0_67, %c0_68], %155 {strides = array<i32>} : memref<8x8x128xf32, #tpu.memory_space<vmem>>, vector<1x8x128xf32>,
    %156 = vector.extract_strided_slice %151 {offsets = [0, 0], sizes = [8, 32], strides = [1, 1]} : vector<8x128xf32> to vector<8x32xf32>
    %157 = arith.truncf %156 : vector<8x32xf32> to vector<8x32xbf16>
    %c0_69 = arith.constant 0 : index
    %c16_70 = arith.constant 16 : index
    %158 = vector.load %arg7[%c0_69, %c16_70] : memref<8x128xbf16, #tpu.memory_space<vmem>>, vector<8x32xbf16>
    tpu.vector_store %arg7[%c0_69, %c16_70], %157 {strides = array<i32>} : memref<8x128xbf16, #tpu.memory_space<vmem>>, vector<8x32xbf16>,
    %c5_i32 = arith.constant 5 : i32
    %159 = arith.index_cast %c5_i32 : i32 to index
    %c0_71 = arith.constant 0 : index
    %c0_72 = arith.constant 0 : index
    %160 = vector.load %arg1[%159, %c0_71, %c0_72] : memref<8x4x16xbf16, #tpu.memory_space<vmem>>, vector<1x4x16xbf16>
    %161 = vector.shape_cast %160 : vector<1x4x16xbf16> to vector<4x16xbf16>
    %c0_73 = arith.constant 0 : index
    %c0_74 = arith.constant 0 : index
    %162 = vector.load %arg7[%c0_73, %c0_74] : memref<8x128xbf16, #tpu.memory_space<vmem>>, vector<4x16xbf16>
    tpu.vector_store %arg7[%c0_73, %c0_74], %161 {strides = array<i32>} : memref<8x128xbf16, #tpu.memory_space<vmem>>, vector<4x16xbf16>,
    %c0_75 = arith.constant 0 : index
    %c0_76 = arith.constant 0 : index
    %163 = vector.load %arg7[%c0_75, %c0_76] : memref<8x128xbf16, #tpu.memory_space<vmem>>, vector<8x128xbf16>
    %c0_77 = arith.constant 0 : index
    %c0_78 = arith.constant 0 : index
    %164 = vector.load %arg4[%c0_77, %c0_78] : memref<128x640xbf16, #tpu.memory_space<vmem>>, vector<128x640xbf16>
    %cst_79 = arith.constant dense<0.000000e+00> : vector<8x640xf32>
    %165 = tpu.matmul %163, %164, %cst_79 {dimension_numbers = #tpu.dot_dimension_numbers<[1], [0], [0], [1], [0, 0, 1, 1], [], []>} : vector<8x128xbf16>, vector<128x640xbf16>, vector<8x640xf32> -> vector<8x640xf32>
    %166 = vector.extract_strided_slice %165 {offsets = [0, 0], sizes = [8, 384], strides = [1, 1]} : vector<8x640xf32> to vector<8x384xf32>
    %167 = arith.negf %166 : vector<8x384xf32>
    %168 = math.exp %167 : vector<8x384xf32>
    %cst_80 = arith.constant 1.000000e+00 : f32
    %169 = vector.broadcast %cst_80 : f32 to vector<8x384xf32>
    %170 = arith.addf %169, %168 : vector<8x384xf32>
    %171 = arith.divf %169, %170 : vector<8x384xf32>
    %172 = vector.extract_strided_slice %171 {offsets = [0, 0], sizes = [8, 128], strides = [1, 1]} : vector<8x384xf32> to vector<8x128xf32>
    %173 = vector.extract_strided_slice %171 {offsets = [0, 128], sizes = [8, 128], strides = [1, 1]} : vector<8x384xf32> to vector<8x128xf32>
    %174 = vector.extract_strided_slice %171 {offsets = [0, 256], sizes = [8, 128], strides = [1, 1]} : vector<8x384xf32> to vector<8x128xf32>
    %175 = vector.extract_strided_slice %165 {offsets = [0, 384], sizes = [8, 128], strides = [1, 1]} : vector<8x640xf32> to vector<8x128xf32>
    %176 = vector.extract_strided_slice %165 {offsets = [0, 512], sizes = [8, 128], strides = [1, 1]} : vector<8x640xf32> to vector<8x128xf32>
    %177 = arith.maximumf %175, %176 : vector<8x128xf32>
    %178 = arith.mulf %173, %149 : vector<8x128xf32>
    %179 = arith.mulf %172, %177 : vector<8x128xf32>
    %180 = arith.addf %178, %179 : vector<8x128xf32>
    %181 = math.tanh %180 : vector<8x128xf32>
    %182 = arith.mulf %174, %181 : vector<8x128xf32>
    %183 = arith.index_cast %c5_i32 : i32 to index
    %c0_81 = arith.constant 0 : index
    %c0_82 = arith.constant 0 : index
    %184 = vector.load %arg5[%183, %c0_81, %c0_82] : memref<8x8x128xf32, #tpu.memory_space<vmem>>, vector<1x8x128xf32>
    %185 = vector.shape_cast %184 : vector<1x8x128xf32> to vector<8x128xf32>
    %186 = vector.shape_cast %182 : vector<8x128xf32> to vector<1x8x128xf32>
    tpu.vector_store %arg5[%183, %c0_81, %c0_82], %186 {strides = array<i32>} : memref<8x8x128xf32, #tpu.memory_space<vmem>>, vector<1x8x128xf32>,
    %187 = vector.extract_strided_slice %182 {offsets = [0, 0], sizes = [8, 32], strides = [1, 1]} : vector<8x128xf32> to vector<8x32xf32>
    %188 = arith.truncf %187 : vector<8x32xf32> to vector<8x32xbf16>
    %c0_83 = arith.constant 0 : index
    %c16_84 = arith.constant 16 : index
    %189 = vector.load %arg7[%c0_83, %c16_84] : memref<8x128xbf16, #tpu.memory_space<vmem>>, vector<8x32xbf16>
    tpu.vector_store %arg7[%c0_83, %c16_84], %188 {strides = array<i32>} : memref<8x128xbf16, #tpu.memory_space<vmem>>, vector<8x32xbf16>,
    %c6_i32 = arith.constant 6 : i32
    %190 = arith.index_cast %c6_i32 : i32 to index
    %c0_85 = arith.constant 0 : index
    %c0_86 = arith.constant 0 : index
    %191 = vector.load %arg1[%190, %c0_85, %c0_86] : memref<8x4x16xbf16, #tpu.memory_space<vmem>>, vector<1x4x16xbf16>
    %192 = vector.shape_cast %191 : vector<1x4x16xbf16> to vector<4x16xbf16>
    %c0_87 = arith.constant 0 : index
    %c0_88 = arith.constant 0 : index
    %193 = vector.load %arg7[%c0_87, %c0_88] : memref<8x128xbf16, #tpu.memory_space<vmem>>, vector<4x16xbf16>
    tpu.vector_store %arg7[%c0_87, %c0_88], %192 {strides = array<i32>} : memref<8x128xbf16, #tpu.memory_space<vmem>>, vector<4x16xbf16>,
    %c0_89 = arith.constant 0 : index
    %c0_90 = arith.constant 0 : index
    %194 = vector.load %arg7[%c0_89, %c0_90] : memref<8x128xbf16, #tpu.memory_space<vmem>>, vector<8x128xbf16>
    %c0_91 = arith.constant 0 : index
    %c0_92 = arith.constant 0 : index
    %195 = vector.load %arg4[%c0_91, %c0_92] : memref<128x640xbf16, #tpu.memory_space<vmem>>, vector<128x640xbf16>
    %cst_93 = arith.constant dense<0.000000e+00> : vector<8x640xf32>
    %196 = tpu.matmul %194, %195, %cst_93 {dimension_numbers = #tpu.dot_dimension_numbers<[1], [0], [0], [1], [0, 0, 1, 1], [], []>} : vector<8x128xbf16>, vector<128x640xbf16>, vector<8x640xf32> -> vector<8x640xf32>
    %197 = vector.extract_strided_slice %196 {offsets = [0, 0], sizes = [8, 384], strides = [1, 1]} : vector<8x640xf32> to vector<8x384xf32>
    %198 = arith.negf %197 : vector<8x384xf32>
    %199 = math.exp %198 : vector<8x384xf32>
    %cst_94 = arith.constant 1.000000e+00 : f32
    %200 = vector.broadcast %cst_94 : f32 to vector<8x384xf32>
    %201 = arith.addf %200, %199 : vector<8x384xf32>
    %202 = arith.divf %200, %201 : vector<8x384xf32>
    %203 = vector.extract_strided_slice %202 {offsets = [0, 0], sizes = [8, 128], strides = [1, 1]} : vector<8x384xf32> to vector<8x128xf32>
    %204 = vector.extract_strided_slice %202 {offsets = [0, 128], sizes = [8, 128], strides = [1, 1]} : vector<8x384xf32> to vector<8x128xf32>
    %205 = vector.extract_strided_slice %202 {offsets = [0, 256], sizes = [8, 128], strides = [1, 1]} : vector<8x384xf32> to vector<8x128xf32>
    %206 = vector.extract_strided_slice %196 {offsets = [0, 384], sizes = [8, 128], strides = [1, 1]} : vector<8x640xf32> to vector<8x128xf32>
    %207 = vector.extract_strided_slice %196 {offsets = [0, 512], sizes = [8, 128], strides = [1, 1]} : vector<8x640xf32> to vector<8x128xf32>
    %208 = arith.maximumf %206, %207 : vector<8x128xf32>
    %209 = arith.mulf %204, %180 : vector<8x128xf32>
    %210 = arith.mulf %203, %208 : vector<8x128xf32>
    %211 = arith.addf %209, %210 : vector<8x128xf32>
    %212 = math.tanh %211 : vector<8x128xf32>
    %213 = arith.mulf %205, %212 : vector<8x128xf32>
    %214 = arith.index_cast %c6_i32 : i32 to index
    %c0_95 = arith.constant 0 : index
    %c0_96 = arith.constant 0 : index
    %215 = vector.load %arg5[%214, %c0_95, %c0_96] : memref<8x8x128xf32, #tpu.memory_space<vmem>>, vector<1x8x128xf32>
    %216 = vector.shape_cast %215 : vector<1x8x128xf32> to vector<8x128xf32>
    %217 = vector.shape_cast %213 : vector<8x128xf32> to vector<1x8x128xf32>
    tpu.vector_store %arg5[%214, %c0_95, %c0_96], %217 {strides = array<i32>} : memref<8x8x128xf32, #tpu.memory_space<vmem>>, vector<1x8x128xf32>,
    %218 = vector.extract_strided_slice %213 {offsets = [0, 0], sizes = [8, 32], strides = [1, 1]} : vector<8x128xf32> to vector<8x32xf32>
    %219 = arith.truncf %218 : vector<8x32xf32> to vector<8x32xbf16>
    %c0_97 = arith.constant 0 : index
    %c16_98 = arith.constant 16 : index
    %220 = vector.load %arg7[%c0_97, %c16_98] : memref<8x128xbf16, #tpu.memory_space<vmem>>, vector<8x32xbf16>
    tpu.vector_store %arg7[%c0_97, %c16_98], %219 {strides = array<i32>} : memref<8x128xbf16, #tpu.memory_space<vmem>>, vector<8x32xbf16>,
    %c7_i32 = arith.constant 7 : i32
    %221 = arith.index_cast %c7_i32 : i32 to index
    %c0_99 = arith.constant 0 : index
    %c0_100 = arith.constant 0 : index
    %222 = vector.load %arg1[%221, %c0_99, %c0_100] : memref<8x4x16xbf16, #tpu.memory_space<vmem>>, vector<1x4x16xbf16>
    %223 = vector.shape_cast %222 : vector<1x4x16xbf16> to vector<4x16xbf16>
    %c0_101 = arith.constant 0 : index
    %c0_102 = arith.constant 0 : index
    %224 = vector.load %arg7[%c0_101, %c0_102] : memref<8x128xbf16, #tpu.memory_space<vmem>>, vector<4x16xbf16>
    tpu.vector_store %arg7[%c0_101, %c0_102], %223 {strides = array<i32>} : memref<8x128xbf16, #tpu.memory_space<vmem>>, vector<4x16xbf16>,
    %c0_103 = arith.constant 0 : index
    %c0_104 = arith.constant 0 : index
    %225 = vector.load %arg7[%c0_103, %c0_104] : memref<8x128xbf16, #tpu.memory_space<vmem>>, vector<8x128xbf16>
    %c0_105 = arith.constant 0 : index
    %c0_106 = arith.constant 0 : index
    %226 = vector.load %arg4[%c0_105, %c0_106] : memref<128x640xbf16, #tpu.memory_space<vmem>>, vector<128x640xbf16>
    %cst_107 = arith.constant dense<0.000000e+00> : vector<8x640xf32>
    %227 = tpu.matmul %225, %226, %cst_107 {dimension_numbers = #tpu.dot_dimension_numbers<[1], [0], [0], [1], [0, 0, 1, 1], [], []>} : vector<8x128xbf16>, vector<128x640xbf16>, vector<8x640xf32> -> vector<8x640xf32>
    %228 = vector.extract_strided_slice %227 {offsets = [0, 0], sizes = [8, 384], strides = [1, 1]} : vector<8x640xf32> to vector<8x384xf32>
    %229 = arith.negf %228 : vector<8x384xf32>
    %230 = math.exp %229 : vector<8x384xf32>
    %cst_108 = arith.constant 1.000000e+00 : f32
    %231 = vector.broadcast %cst_108 : f32 to vector<8x384xf32>
    %232 = arith.addf %231, %230 : vector<8x384xf32>
    %233 = arith.divf %231, %232 : vector<8x384xf32>
    %234 = vector.extract_strided_slice %233 {offsets = [0, 0], sizes = [8, 128], strides = [1, 1]} : vector<8x384xf32> to vector<8x128xf32>
    %235 = vector.extract_strided_slice %233 {offsets = [0, 128], sizes = [8, 128], strides = [1, 1]} : vector<8x384xf32> to vector<8x128xf32>
    %236 = vector.extract_strided_slice %233 {offsets = [0, 256], sizes = [8, 128], strides = [1, 1]} : vector<8x384xf32> to vector<8x128xf32>
    %237 = vector.extract_strided_slice %227 {offsets = [0, 384], sizes = [8, 128], strides = [1, 1]} : vector<8x640xf32> to vector<8x128xf32>
    %238 = vector.extract_strided_slice %227 {offsets = [0, 512], sizes = [8, 128], strides = [1, 1]} : vector<8x640xf32> to vector<8x128xf32>
    %239 = arith.maximumf %237, %238 : vector<8x128xf32>
    %240 = arith.mulf %235, %211 : vector<8x128xf32>
    %241 = arith.mulf %234, %239 : vector<8x128xf32>
    %242 = arith.addf %240, %241 : vector<8x128xf32>
    %243 = math.tanh %242 : vector<8x128xf32>
    %244 = arith.mulf %236, %243 : vector<8x128xf32>
    %245 = arith.index_cast %c7_i32 : i32 to index
    %c0_109 = arith.constant 0 : index
    %c0_110 = arith.constant 0 : index
    %246 = vector.load %arg5[%245, %c0_109, %c0_110] : memref<8x8x128xf32, #tpu.memory_space<vmem>>, vector<1x8x128xf32>
    %247 = vector.shape_cast %246 : vector<1x8x128xf32> to vector<8x128xf32>
    %248 = vector.shape_cast %244 : vector<8x128xf32> to vector<1x8x128xf32>
    tpu.vector_store %arg5[%245, %c0_109, %c0_110], %248 {strides = array<i32>} : memref<8x8x128xf32, #tpu.memory_space<vmem>>, vector<1x8x128xf32>,
    %249 = vector.extract_strided_slice %244 {offsets = [0, 0], sizes = [8, 32], strides = [1, 1]} : vector<8x128xf32> to vector<8x32xf32>
    %250 = arith.truncf %249 : vector<8x32xf32> to vector<8x32xbf16>
    %c0_111 = arith.constant 0 : index
    %c16_112 = arith.constant 16 : index
    %251 = vector.load %arg7[%c0_111, %c16_112] : memref<8x128xbf16, #tpu.memory_space<vmem>>, vector<8x32xbf16>
    tpu.vector_store %arg7[%c0_111, %c16_112], %250 {strides = array<i32>} : memref<8x128xbf16, #tpu.memory_space<vmem>>, vector<8x32xbf16>,
    %c8_i32 = arith.constant 8 : i32
    %c0_113 = arith.constant 0 : index
    %c0_114 = arith.constant 0 : index
    %252 = vector.load %arg6[%c0_113, %c0_114] : memref<8x128xf32, #tpu.memory_space<vmem>>, vector<8x128xf32>
    tpu.vector_store %arg6[%c0_113, %c0_114], %242 {strides = array<i32>} : memref<8x128xf32, #tpu.memory_space<vmem>>, vector<8x128xf32>,
    return
  }
  func.func @transform_0(%arg0: i32) -> (i32, i32, i32) {
    %c0_i32 = arith.constant 0 : i32
    %c0_i32_0 = arith.constant 0 : i32
    %c0_i32_1 = arith.constant 0 : i32
    return %arg0, %c0_i32, %c0_i32_0 : i32, i32, i32
  }
  func.func @transform_1(%arg0: i32) -> (i32, i32) {
    %c0_i32 = arith.constant 0 : i32
    %c0_i32_0 = arith.constant 0 : i32
    %c0_i32_1 = arith.constant 0 : i32
    return %c0_i32, %c0_i32_0 : i32, i32
  }
  func.func @transform_2(%arg0: i32) -> (i32, i32) {
    %c0_i32 = arith.constant 0 : i32
    %c0_i32_0 = arith.constant 0 : i32
    %c0_i32_1 = arith.constant 0 : i32
    return %c0_i32, %c0_i32_0 : i32, i32
  }
  func.func @transform_3(%arg0: i32) -> (i32, i32) {
    %c0_i32 = arith.constant 0 : i32
    %c0_i32_0 = arith.constant 0 : i32
    %c0_i32_1 = arith.constant 0 : i32
    return %c0_i32, %c0_i32_0 : i32, i32
  }
  func.func @transform_4(%arg0: i32) -> (i32, i32, i32) {
    %c0_i32 = arith.constant 0 : i32
    %c0_i32_0 = arith.constant 0 : i32
    %c0_i32_1 = arith.constant 0 : i32
    return %arg0, %c0_i32, %c0_i32_0 : i32, i32, i32
  }
  func.func @transform_5(%arg0: i32) -> (i32, i32) {
    %c0_i32 = arith.constant 0 : i32
    %c0_i32_0 = arith.constant 0 : i32
    %c0_i32_1 = arith.constant 0 : i32
    return %c0_i32, %c0_i32_0 : i32, i32
  }
}

</mosaic_0001>

<bundles_post_ra>
// kernel: tpu_custom_call.1
= control target key start
LH: loop header
LB: loop body
LE: loop exit
PB: predicated region body
PF: predicated region fallthrough
CT: control target
= control target key end

     0   :  { %11 = vsyncpa [#allocation4], 0  ;;  %s5959_s0 = inlined_call_operand.hbm [shape: bf16[8,4,16], index: 0, kind: input, shape index: {}]   ;;  %s5960_s1 = inlined_call_operand.hbm [shape: f32[4,32], index: 1, kind: input, shape index: {}]   ;;  %s5961_s2 = inlined_call_operand.hbm [shape: f32[4,32], index: 2, kind: input, shape index: {}]   ;;  %s5962_s3 = inlined_call_operand.hbm [shape: bf16[128,640], index: 3, kind: input, shape index: {}]   ;;  %s5963_s4 = inlined_call_operand.hbm [shape: f32[8,8,128], index: 4, kind: output, shape index: {0}]   ;;  %s5964_s5 = inlined_call_operand.hbm [shape: f32[8,128], index: 5, kind: output, shape index: {1}]  }
   0x1   :  { %12 = vsyncpa [#allocation7], 0 }
   0x2   :  { %13 = vsyncpa [#allocation10], 0 }
   0x3   :  { %14 = vsyncpa [#allocation5], 0  ;;  %s34_s20 = sshll.u32 %s5960_s1, 4  ;;  %s35_s20 = int_to_ptr.hbm [resolvable:$true] %s34_s20 }
   0x4   :  { %15 = vsyncpa [#allocation13], 0  ;;  %s5214_s21 = smov [#allocation6]   ;;  %s20_s25 = sshll.u32 %s5959_s0, 4  ;;  %s21_s25 = int_to_ptr.hbm [resolvable:$true] %s20_s25 }
   0x5   :  { %s36_s22 = sshll.u32 %s5214_s21, 4  ;;  %s5215_s26 = smov [#allocation3]   ;;  %s37_s22 = int_to_ptr.vmem [resolvable:$true] %s36_s22 }
   0x6   :  { %39 = dma.hbm_to_vmem [thread:$0]  %s35_s20, 64, %s37_s22, [#allocation7]  }
   0x7   :  { %s22_s27 = sshll.u32 %s5215_s26, 4  ;;  %s5216_s28 = smov 32   ;;  %s23_s27 = int_to_ptr.vmem [resolvable:$true] %s22_s27 }
   0x8   :  { %s5217_s29 = smov 2   ;;  %s45_s1 = sshll.u32 %s5961_s2, 4  ;;  %s46_s1 = int_to_ptr.hbm [resolvable:$true] %s45_s1 }
   0x9   :  { %28 = dma.hbm_to_vmem [thread:$0]  %s21_s25, 256, %s23_s27, [#allocation4], %s5216_s28, %s5216_s28, %s5217_s29  }
   0xa   :  { %s5218_s7 = smov [#allocation8]   ;;  %s55_s0 = sshll.u32 %s5962_s3, 4  ;;  %s56_s0 = int_to_ptr.hbm [resolvable:$true] %s55_s0 }
   0xb   :  { %s47_s8 = sshll.u32 %s5218_s7, 4  ;;  %s5219_s11 = smov [#allocation9]   ;;  %s48_s8 = int_to_ptr.vmem [resolvable:$true] %s47_s8 }
   0xc   :  { %50 = dma.hbm_to_vmem [thread:$0]  %s46_s1, 64, %s48_s8, [#allocation7]  }
   0xd   :  { %s57_s12 = sshll.u32 %s5219_s11, 4  ;;  %s5220_s13 = smov 320   ;;  %s58_s12 = int_to_ptr.vmem [resolvable:$true] %s57_s12 }
   0xe   :  { %s5221_s14 = smov 20  }
   0xf   :  { %63 = dma.hbm_to_vmem [thread:$0]  %s56_s0, 5120, %s58_s12, [#allocation10], %s5220_s13, %s5220_s13, %s5221_s14  }
  0x10   :  { %5204 = dma.done.wait [#allocation4], 256  }
  0x11   :  { %5205 = vsyncadd [#allocation4], 4294967040 }
  0x12   :  { %5206 = dma.done.wait [#allocation7], 128  }
  0x13   :  { %5207 = vsyncadd [#allocation7], 4294967168 }
  0x14   :  { %5208 = dma.done.wait [#allocation10], 5120  }
  0x15   :  { %5209 = vsyncadd [#allocation10], 4294962176  ;;  %v89_v0 = vld [vmem:[#allocation6] sm:$0xf]  ;;  %v4649_v2 = vld [vmem:[#allocation9 + $0x128] sm:$0xf0] }
  0x16   :  { %v3450_v1 = vld [vmem:[#allocation9 + $0x118] sm:$0xf]  ;;  %v90_v3 = vpack.c.bf16 %v89_v0, %v89_v0  ;;  %v3430_v5 = vld [vmem:[#allocation9 + $0xf0] sm:$0xf]  ;;  %v4644_v6 = vld [vmem:[#allocation9 + $0x100] sm:$0xf0] }
  0x17   :  { %v3451_v4 = vor.u32 %v4649_v2, %v3450_v1  ;;  %v4647_v7 = vld [vmem:[#allocation9 + $0x11c] sm:$0xf]  ;;  %v3452_v8 = vld [vmem:[#allocation9 + $0x12c] sm:$0xf0]  ;;  %s5222_s2 = smov 16   ;;  %v3431_v9 = vor.u32 %v4644_v6, %v3430_v5  ;;  %vm87_vm0 = vcmask 396672  }
  0x18   :  { %92 = vrot.lane.b32.xlu0 %v90_v3, %s5222_s2  ;;  %v3410_v10 = vld [vmem:[#allocation9 + $0xc8] sm:$0xf]  ;;  %v3455_v11 = vor.u32 %v4647_v7, %v3452_v8  ;;  %v3458_v12 = vld [vmem:[#allocation9 + $0x120] sm:$0xf]  ;;  %v4650_v13 = vld [vmem:[#allocation9 + $0x130] sm:$0xf0] }
  0x19   :  { %362 = vmatpush.bf16.msra.mxu0 %v3451_v4  ;;  %v4639_v14 = vld [vmem:[#allocation9 + $0xd8] sm:$0xf0]  ;;  %v3459_v15 = vor.u32 %v4650_v13, %v3458_v12  ;;  %v4642_v16 = vld [vmem:[#allocation9 + $0xf4] sm:$0xf]  ;;  %v3432_v17 = vld [vmem:[#allocation9 + $0x104] sm:$0xf0] }
  0x1a   :  { %375 = vmatpush.bf16.msra.mxu1 %v3455_v11  ;;  %v3435_v18 = vor.u32 %v4642_v16, %v3432_v17  ;;  %v3438_v19 = vld [vmem:[#allocation9 + $0xf8] sm:$0xf]  ;;  %v4645_v20 = vld [vmem:[#allocation9 + $0x108] sm:$0xf0]  ;;  %v3412_v23 = vld [vmem:[#allocation9 + $0xdc] sm:$0xf0]  ;;  %v3411_v24 = vor.u32 %v4639_v14, %v3410_v10 }
  0x1b   :  { %388 = vmatpush.bf16.msra.mxu2 %v3459_v15  ;;  %v3439_v21 = vor.u32 %v4645_v20, %v3438_v19  ;;  %v4637_v22 = vld [vmem:[#allocation9 + $0xcc] sm:$0xf]  ;;  %v3418_v25 = vld [vmem:[#allocation9 + $0xd0] sm:$0xf]  ;;  %v4640_v26 = vld [vmem:[#allocation9 + $0xe0] sm:$0xf0] }
  0x1c   :  { %v3390_v27 = vld [vmem:[#allocation9 + $0xa0] sm:$0xf]  ;;  %v4634_v28 = vld [vmem:[#allocation9 + $0xb0] sm:$0xf0]  ;;  %v3415_v29 = vor.u32 %v4637_v22, %v3412_v23  ;;  %v4648_v30 = vld [vmem:[#allocation9 + $0x124] sm:$0xf]  ;;  %v3419_v31 = vor.u32 %v4640_v26, %v3418_v25 }
  0x1d   :  { %363 = vmatpush.bf16.msra.mxu0 %v3431_v9  ;;  %v4632_v32 = vld [vmem:[#allocation9 + $0xa4] sm:$0xf]  ;;  %v3392_v33 = vld [vmem:[#allocation9 + $0xb4] sm:$0xf0]  ;;  %v3391_v35 = vor.u32 %v4634_v28, %v3390_v27  ;;  %v3398_v37 = vld [vmem:[#allocation9 + $0xa8] sm:$0xf] }
  0x1e   :  { %376 = vmatpush.bf16.msra.mxu1 %v3435_v18  ;;  %v3460_v34 = vld [vmem:[#allocation9 + $0x134] sm:$0xf0]  ;;  %v4635_v38 = vld [vmem:[#allocation9 + $0xb8] sm:$0xf0]  ;;  %v4629_v40 = vld [vmem:[#allocation9 + $0x88] sm:$0xf0]  ;;  %v3395_v43 = vor.u32 %v4632_v32, %v3392_v33 }
  0x1f   :  { %389 = vmatpush.bf16.msra.mxu2 %v3439_v21  ;;  %v3370_v36 = vld [vmem:[#allocation9 + $0x78] sm:$0xf]  ;;  %v3463_v39 = vor.u32 %v4648_v30, %v3460_v34  ;;  %v4643_v41 = vld [vmem:[#allocation9 + $0xfc] sm:$0xf]  ;;  %v3440_v42 = vld [vmem:[#allocation9 + $0x10c] sm:$0xf0]  ;;  %v3399_v47 = vor.u32 %v4635_v38, %v3398_v37 }
  0x20   :  { %v3443_v44 = vor.u32 %v4643_v41, %v3440_v42  ;;  %v3350_v45 = vld [vmem:[#allocation9 + $0x50] sm:$0xf]  ;;  %v4624_v46 = vld [vmem:[#allocation9 + $0x60] sm:$0xf0]  ;;  %v4627_v48 = vld [vmem:[#allocation9 + $0x7c] sm:$0xf]  ;;  %v3371_v50 = vor.u32 %v4629_v40, %v3370_v36 }
  0x21   :  { %364 = vmatpush.bf16.msra.mxu0 %v3411_v24  ;;  %401 = vmatpush.bf16.msra.mxu3 %v3463_v39  ;;  %v3372_v49 = vld [vmem:[#allocation9 + $0x8c] sm:$0xf0]  ;;  %v3378_v51 = vld [vmem:[#allocation9 + $0x80] sm:$0xf]  ;;  %v4630_v52 = vld [vmem:[#allocation9 + $0x90] sm:$0xf0]  ;;  %v3351_v62 = vor.u32 %v4624_v46, %v3350_v45 }
  0x22   :  { %377 = vmatpush.bf16.msra.mxu1 %v3415_v29  ;;  %v4638_v53 = vld [vmem:[#allocation9 + $0xd4] sm:$0xf]  ;;  %v3420_v54 = vld [vmem:[#allocation9 + $0xe4] sm:$0xf0]  ;;  %v3375_v55 = vor.u32 %v4627_v48, %v3372_v49  ;;  %v5223_v57 = vmov 0   ;;  %v3379_v58 = vor.u32 %v4630_v52, %v3378_v51  ;;  %vm95_vm1 = vcmask 386176  }
  0x23   :  { %390 = vmatpush.bf16.msra.mxu2 %v3419_v31  ;;  %v3423_v56 = vor.u32 %v4638_v53, %v3420_v54  ;;  %86 = vst [vmem:[#allocation2] sm:$0xf] %v5223_v57  ;;  %v4622_v59 = vld [vmem:[#allocation9 + $0x54] sm:$0xf]  ;;  %v3352_v60 = vld [vmem:[#allocation9 + $0x64] sm:$0xf0] }
  0x24   :  { %v5224_v61 = vmov 1065369472   ;;  %v3358_v63 = vld [vmem:[#allocation9 + $0x58] sm:$0xf]  ;;  %v4625_v0 = vld [vmem:[#allocation9 + $0x68] sm:$0xf0]  ;;  %v3355_v3 = vor.u32 %v4622_v59, %v3352_v60 }
  0x25   :  { %365 = vmatpush.bf16.msra.mxu0 %v3391_v35  ;;  %402 = vmatpush.bf16.msra.mxu3 %v3443_v44  ;;  %88 = vst.msk [vmem:[#allocation2] sm:$0xf] %vm87_vm0, %v5224_v61  ;;  %v3330_v1 = vld [vmem:[#allocation9 + $0x28] sm:$0xf]  ;;  %v4619_v2 = vld [vmem:[#allocation9 + $0x38] sm:$0xf0]  ;;  %v3359_v4 = vor.u32 %v4625_v0, %v3358_v63 }
  0x26   :  { %378 = vmatpush.bf16.msra.mxu1 %v3395_v43  ;;  %v3331_v5 = vor.u32 %v4619_v2, %v3330_v1  ;;  %v3310_v6 = vld [vmem:[#allocation9] sm:$0xf]  ;;  %v4614_v7 = vld [vmem:[#allocation9 + $0x10] sm:$0xf0]  ;;  %v3466_v8 = vld [vmem:[#allocation9 + $0x128] sm:$0xf] }
  0x27   :  { %391 = vmatpush.bf16.msra.mxu2 %v3399_v47  ;;  %v4651_v9 = vld [vmem:[#allocation9 + $0x138] sm:$0xf0]  ;;  %v3311_v10 = vor.u32 %v4614_v7, %v3310_v6  ;;  %v3446_v12 = vld [vmem:[#allocation9 + $0x100] sm:$0xf]  ;;  %v4646_v13 = vld [vmem:[#allocation9 + $0x110] sm:$0xf0] }
  0x28   :  { %v3467_v11 = vor.u32 %v4651_v9, %v3466_v8  ;;  %v3447_v14 = vor.u32 %v4646_v13, %v3446_v12  ;;  %v4617_v15 = vld [vmem:[#allocation9 + $0x2c] sm:$0xf]  ;;  %v3332_v16 = vld [vmem:[#allocation9 + $0x3c] sm:$0xf0]  ;;  %v3338_v17 = vld [vmem:[#allocation9 + $0x30] sm:$0xf] }
  0x29   :  { %366 = vmatpush.bf16.msra.mxu0 %v3371_v50  ;;  %403 = vmatpush.bf16.msra.mxu3 %v3423_v56  ;;  %v3335_v18 = vor.u32 %v4617_v15, %v3332_v16  ;;  %v4620_v19 = vld [vmem:[#allocation9 + $0x40] sm:$0xf0]  ;;  %v4633_v20 = vld [vmem:[#allocation9 + $0xac] sm:$0xf]  ;;  %v3400_v21 = vld [vmem:[#allocation9 + $0xbc] sm:$0xf0] }
  0x2a   :  { %379 = vmatpush.bf16.msra.mxu1 %v3375_v55  ;;  %v3339_v22 = vor.u32 %v4620_v19, %v3338_v17  ;;  %v3403_v23 = vor.u32 %v4633_v20, %v3400_v21  ;;  %v3426_v24 = vld [vmem:[#allocation9 + $0xd8] sm:$0xf]  ;;  %v4641_v25 = vld [vmem:[#allocation9 + $0xe8] sm:$0xf0]  ;;  %v4612_v27 = vld [vmem:[#allocation9 + $0x4] sm:$0xf] }
  0x2b   :  { %392 = vmatpush.bf16.msra.mxu2 %v3379_v58  ;;  %v3427_v26 = vor.u32 %v4641_v25, %v3426_v24  ;;  %v3312_v28 = vld [vmem:[#allocation9 + $0x14] sm:$0xf0]  ;;  %v3318_v29 = vld [vmem:[#allocation9 + $0x8] sm:$0xf]  ;;  %v4615_v31 = vld [vmem:[#allocation9 + $0x18] sm:$0xf0] }
  0x2c   :  { %v3315_v30 = vor.u32 %v4612_v27, %v3312_v28  ;;  %v4628_v32 = vld [vmem:[#allocation9 + $0x84] sm:$0xf]  ;;  %v3380_v33 = vld [vmem:[#allocation9 + $0x94] sm:$0xf0]  ;;  %v3319_v34 = vor.u32 %v4615_v31, %v3318_v29  ;;  %v3406_v36 = vld [vmem:[#allocation9 + $0xb0] sm:$0xf] }
  0x2d   :  { %367 = vmatpush.bf16.msra.mxu0 %v3351_v62  ;;  %404 = vmatpush.bf16.msra.mxu3 %v3403_v23  ;;  %v3383_v35 = vor.u32 %v4628_v32, %v3380_v33  ;;  %v4636_v37 = vld [vmem:[#allocation9 + $0xc0] sm:$0xf0]  ;;  %v4623_v39 = vld [vmem:[#allocation9 + $0x5c] sm:$0xf]  ;;  %v3360_v40 = vld [vmem:[#allocation9 + $0x6c] sm:$0xf0] }
  0x2e   :  { %380 = vmatpush.bf16.msra.mxu1 %v3355_v3  ;;  %v3407_v38 = vor.u32 %v4636_v37, %v3406_v36  ;;  %v3363_v41 = vor.u32 %v4623_v39, %v3360_v40  ;;  %v3386_v42 = vld [vmem:[#allocation9 + $0x88] sm:$0xf]  ;;  %v4631_v43 = vld [vmem:[#allocation9 + $0x98] sm:$0xf0]  ;;  %v4618_v44 = vld [vmem:[#allocation9 + $0x34] sm:$0xf] }
  0x2f   :  { %393 = vmatpush.bf16.msra.mxu2 %v3359_v4  ;;  %v3387_v45 = vor.u32 %v4631_v43, %v3386_v42  ;;  %v3340_v46 = vld [vmem:[#allocation9 + $0x44] sm:$0xf0]  ;;  %v3366_v47 = vld [vmem:[#allocation9 + $0x60] sm:$0xf]  ;;  %v4626_v48 = vld [vmem:[#allocation9 + $0x70] sm:$0xf0] }
  0x30   :  { %v3343_v49 = vor.u32 %v4618_v44, %v3340_v46  ;;  %v4613_v50 = vld [vmem:[#allocation9 + $0xc] sm:$0xf]  ;;  %v3320_v51 = vld [vmem:[#allocation9 + $0x1c] sm:$0xf0]  ;;  %v3367_v52 = vor.u32 %v4626_v48, %v3366_v47  ;;  %v3346_v53 = vld [vmem:[#allocation9 + $0x38] sm:$0xf] }
  0x31   :  { %368 = vmatpush.bf16.msra.mxu0 %v3331_v5  ;;  %405 = vmatpush.bf16.msra.mxu3 %v3383_v35  ;;  %v4621_v54 = vld [vmem:[#allocation9 + $0x48] sm:$0xf0]  ;;  %v3323_v55 = vor.u32 %v4613_v50, %v3320_v51  ;;  %v3326_v57 = vld [vmem:[#allocation9 + $0x10] sm:$0xf]  ;;  %v4616_v58 = vld [vmem:[#allocation9 + $0x20] sm:$0xf0] }
  0x32   :  { %381 = vmatpush.bf16.msra.mxu1 %v3335_v18  ;;  %v3347_v56 = vor.u32 %v4621_v54, %v3346_v53  ;;  %v3327_v59 = vor.u32 %v4616_v58, %v3326_v57  ;;  %v102_v60 = vld [vmem:[#allocation3] sm:$0x3]  ;;  %vm103_vm2 = vcmask 123904   ;;  %v5225_v63 = vmov 0.0   ;;  %v98_v0 = vld [vmem:[#allocation8] sm:$0xf] }
  0x33   :  { %394 = vmatpush.bf16.msra.mxu2 %v3339_v22  ;;  %97 = vst [vmem:[#allocation12] sm:$0xff] %v5225_v63  ;;  %vm99_vm3 = vcmask 257024   ;;  %v4689_v15 = vld [vmem:[#allocation9 + $0x128] sm:$0xf0]  ;;  %v3593_v16 = vld [vmem:[#allocation9 + $0xf0] sm:$0xf] }
  0x34   :  { %100 = vst.msk [vmem:[#allocation12] sm:$0xf] %vm99_vm3, %v98_v0  ;;  %v4684_v20 = vld [vmem:[#allocation9 + $0x100] sm:$0xf0]  ;;  %v3573_v23 = vld [vmem:[#allocation9 + $0xc8] sm:$0xf] }
  0x35   :  { %369 = vmatpush.bf16.msra.mxu0 %v3311_v10  ;;  %406 = vmatpush.bf16.msra.mxu3 %v3363_v41  ;;  %v4679_v24 = vld [vmem:[#allocation9 + $0xd8] sm:$0xf0]  ;;  %v3615_v28 = vld [vmem:[#allocation9 + $0x12c] sm:$0xf0]  ;;  %v3621_v31 = vld [vmem:[#allocation9 + $0x120] sm:$0xf] }
  0x36   :  { %382 = vmatpush.bf16.msra.mxu1 %v3315_v30  ;;  %v4687_v27 = vld [vmem:[#allocation9 + $0x11c] sm:$0xf]  ;;  %v4690_v32 = vld [vmem:[#allocation9 + $0x130] sm:$0xf0]  ;;  %v4688_v33 = vld [vmem:[#allocation9 + $0x124] sm:$0xf]  ;;  %v3574_v44 = vor.u32 %v4679_v24, %v3573_v23 }
  0x37   :  { %395 = vmatpush.bf16.msra.mxu2 %v3319_v34  ;;  %v3618_v30 = vor.u32 %v4687_v27, %v3615_v28  ;;  %v5298_v41 = vld [vmem:[#allocation9 + $0xa0] sm:$0xf]  ;;  %v4682_v42 = vld [vmem:[#allocation9 + $0xf4] sm:$0xf]  ;;  %v3595_v47 = vld [vmem:[#allocation9 + $0x104] sm:$0xf0] }
  0x38   :  { %v3601_v48 = vld [vmem:[#allocation9 + $0xf8] sm:$0xf]  ;;  %v4674_v51 = vld [vmem:[#allocation9 + $0xb0] sm:$0xf0]  ;;  %v4685_v53 = vld [vmem:[#allocation9 + $0x108] sm:$0xf0] }
  0x39   :  { %414 = vmatpush.bf16.msrb.mxu0 %v3467_v11  ;;  %407 = vmatpush.bf16.msra.mxu3 %v3343_v49  ;;  %v4683_v57 = vld [vmem:[#allocation9 + $0xfc] sm:$0xf]  ;;  %v3603_v58 = vld [vmem:[#allocation9 + $0x10c] sm:$0xf0]  ;;  %v4677_v63 = vld [vmem:[#allocation9 + $0xcc] sm:$0xf] }
  0x3a   :  { %v3575_v0 = vld [vmem:[#allocation9 + $0xdc] sm:$0xf0]  ;;  %v4672_v23 = vld [vmem:[#allocation9 + $0xa4] sm:$0xf]  ;;  %v3555_v24 = vld [vmem:[#allocation9 + $0xb4] sm:$0xf0] }
  0x3b   :  { %771 = vmatpush.bf16.msrb.mxu2 %v3618_v30  ;;  %v4675_v30 = vld [vmem:[#allocation9 + $0xb8] sm:$0xf0]  ;;  %vm496_vm0 = vcmask 388224   ;;  %s5226_s3 = smov [#allocation12]   ;;  %s3291_s18 = sshll.u32 %s5964_s5, 4  ;;  %s3292_s18 = int_to_ptr.hbm [resolvable:$true] %s3291_s18 }
  0x3c   :  { %s3289_s15 = sshll.u32 %s5226_s3, 4  ;;  %s5227_s5 = smov [#allocation11]   ;;  %s3290_s15 = int_to_ptr.vmem [resolvable:$true] %s3289_s15 }
  0x3d   :  { %415 = vmatpush.bf16.msrb.mxu0 %v3447_v14  ;;  %408 = vmatpush.bf16.msra.mxu3 %v3323_v55  ;;  %v3613_v14 = vld [vmem:[#allocation9 + $0x118] sm:$0xf]  ;;  %v3493_v55 = vld [vmem:[#allocation9 + $0x28] sm:$0xf]  ;;  %s3275_s19 = sshll.u32 %s5227_s5, 4  ;;  %s3277_s22 = sshll.u32 %s5963_s4, 4  ;;  %s3276_s19 = int_to_ptr.vmem [resolvable:$true] %s3275_s19  ;;  %s3278_s22 = int_to_ptr.hbm [resolvable:$true] %s3277_s22 }
  0x3e   :  { %v3614_v19 = vor.u32 %v4689_v15, %v3613_v14  ;;  %s5228_s23 = smov 128   ;;  %s5229_s24 = smov 8  }
  0x40   :  { %758 = vmatpush.bf16.msrb.mxu1 %v3614_v19 }
  0x41   :  { %416 = vmatpush.bf16.msrb.mxu0 %v3427_v26  ;;  %v3594_v26 = vor.u32 %v4684_v20, %v3593_v16 }
  0x44   :  { %759 = vmatpush.bf16.msrb.mxu1 %v3594_v26 }
  0x45   :  { %417 = vmatpush.bf16.msrb.mxu0 %v3407_v38  ;;  %v3623_v38 = vld [vmem:[#allocation9 + $0x134] sm:$0xf0] }
  0x46   :  { %v3626_v46 = vor.u32 %v4688_v33, %v3623_v38 }
  0x48   :  { %760 = vmatpush.bf16.msrb.mxu1 %v3574_v44  ;;  %v3541_v44 = vld [vmem:[#allocation9 + $0x80] sm:$0xf] }
  0x49   :  { %418 = vmatpush.bf16.msrb.mxu0 %v3387_v45  ;;  %v3622_v45 = vor.u32 %v4690_v32, %v3621_v31 }
  0x4b   :  { %784 = vmatpush.bf16.msrb.mxu3 %v3622_v45 }
  0x4d   :  { %419 = vmatpush.bf16.msrb.mxu0 %v3367_v52  ;;  %v3598_v52 = vor.u32 %v4682_v42, %v3595_v47  ;;  %v4670_v47 = vld [vmem:[#allocation9 + $0x90] sm:$0xf0] }
  0x4f   :  { %772 = vmatpush.bf16.msrb.mxu2 %v3598_v52  ;;  %v4662_v52 = vld [vmem:[#allocation9 + $0x54] sm:$0xf] }
  0x51   :  { %420 = vmatpush.bf16.msrb.mxu0 %v3347_v56  ;;  %v3602_v56 = vor.u32 %v4685_v53, %v3601_v48  ;;  %v4668_v48 = vld [vmem:[#allocation9 + $0x84] sm:$0xf]  ;;  %v3515_v53 = vld [vmem:[#allocation9 + $0x64] sm:$0xf0] }
  0x53   :  { %785 = vmatpush.bf16.msrb.mxu3 %v3602_v56  ;;  %v4659_v56 = vld [vmem:[#allocation9 + $0x38] sm:$0xf0] }
  0x55   :  { %421 = vmatpush.bf16.msrb.mxu0 %v3327_v59 }
  0x8a   :  { %v93_v61 = vpop.permute.xlu0 %92 }
  0x8b   :  { %96 = vst.msk [vmem:[#allocation2] sm:$0x3] %vm95_vm1, %v93_v61  ;;  %v5311_v61 = vld [vmem:[#allocation9 + $0x78] sm:$0xf] }
  0x8c   :  { %104 = vst.msk [vmem:[#allocation2] sm:$0x3] %vm103_vm2, %v102_v60 }
  0x93   :  { %v105_v62 = vld [vmem:[#allocation2] sm:$0xf] }
  0x94   :  { %370 = vmatmul.bf16.vlgmr.msra.gmra.mxu0 %v105_v62  ;;  %383 = vmatmul.bf16.vlgmr.msra.gmra.mxu1 %v105_v62 }
  0x95   :  { %396 = vmatmul.bf16.vlgmr.msra.gmra.mxu2 %v105_v62  ;;  %409 = vmatmul.bf16.vlgmr.msra.gmra.mxu3 %v105_v62 }
  0x96   :  { %797 = vmatpush.bf16.msra.mxu0 %v3626_v46 }
  0xa4   :  { %422 = vmatmul.bf16.vlgmr.msrb.gmra.mxu0 %v105_v62  ;;  %v3606_v62 = vor.u32 %v4683_v57, %v3603_v58  ;;  %v499_v57 = vld [vmem:[#allocation3 + $0x2] sm:$0x3] }
  0xa6   :  { %798 = vmatpush.bf16.msra.mxu0 %v3606_v62  ;;  %v3518_v62 = vor.u32 %v4662_v52, %v3515_v53  ;;  %v4661_v52 = vld [vmem:[#allocation9 + $0x48] sm:$0xf0] }
 0x111   :  { %v371_v1 = vpop.f32.mrf.mxu0  ;;  %v384_v2 = vpop.f32.mrf.mxu1 }
 0x112   :  { %v3468_v3 = vmul.f32 -1.442695, %v371_v1  ;;  %v3469_v4 = vmul.f32 -1.442695, %v384_v2  ;;  %v101_v2 = vld [vmem:[#allocation12] sm:$0xff] }
 0x114   :  { %4948 = vpow2.f32 %v3468_v3 }
 0x115   :  { %4950 = vpow2.f32 %v3469_v4 }
 0x118   :  { %v397_v5 = vpop.f32.mrf.mxu2  ;;  %v5274_v6 = vpop.f32.mrf.mxu3 }
 0x119   :  { %v3470_v7 = vmul.f32 -1.442695, %v397_v5  ;;  %v373_v8 = vpop.f32.mrf.mxu0  ;;  %v386_v9 = vpop.f32.mrf.mxu1  ;;  %v3554_v5 = vor.u32 %v4674_v51, %v5298_v41  ;;  %v4667_v41 = vld [vmem:[#allocation9 + $0x7c] sm:$0xf] }
 0x11a   :  { %v4949_v10 = vpop.eup %4948  ;;  %v3581_v8 = vld [vmem:[#allocation9 + $0xd0] sm:$0xf]  ;;  %v4680_v9 = vld [vmem:[#allocation9 + $0xe0] sm:$0xf0] }
 0x11b   :  { %v4951_v11 = vpop.eup %4950  ;;  %v5276_v12 = vadd.f32 1.0, %v4949_v10  ;;  %4952 = vpow2.f32 %v3470_v7  ;;  %v3578_v7 = vor.u32 %v4677_v63, %v3575_v0  ;;  %v4678_v10 = vld [vmem:[#allocation9 + $0xd4] sm:$0xf]  ;;  %761 = vmatpush.bf16.msrb.mxu1 %v3554_v5  ;;  %v4665_v63 = vld [vmem:[#allocation9 + $0x68] sm:$0xf0] }
 0x11c   :  { %v5278_v13 = vadd.f32 1.0, %v4951_v11  ;;  %v4663_v0 = vld [vmem:[#allocation9 + $0x5c] sm:$0xf] }
 0x11d   :  { %4954 = vrcp.f32 %v5276_v12  ;;  %v448_v36 = vand.u32 2147483647, %v5276_v12  ;;  %v450_v37 = vand.u32 2147483648, %v5276_v12  ;;  %vm444_vm4 = vweird.f32 %v5276_v12  ;;  %773 = vmatpush.bf16.msrb.mxu2 %v3578_v7  ;;  %v3473_v7 = vld [vmem:[#allocation9] sm:$0xf] }
 0x11e   :  { %4956 = vrcp.f32 %v5278_v13  ;;  %v463_v40 = vand.u32 2147483647, %v5278_v13  ;;  %v465_v50 = vand.u32 2147483648, %v5278_v13  ;;  %vm459_vm7 = vweird.f32 %v5278_v13 }
 0x11f   :  { %vm5304_vm6 = vcmp.eq.f32.partialorder %v448_v36, 8.507059e+37  ;;  %v451_v15 = vor.u32 1.1754944e-38, %v450_v37  ;;  %v4673_v36 = vld [vmem:[#allocation9 + $0xac] sm:$0xf]  ;;  %v3563_v37 = vld [vmem:[#allocation9 + $0xbc] sm:$0xf0] }
 0x120   :  { %v399_v17 = vpop.f32.mrf.mxu2  ;;  %v412_v18 = vpop.f32.mrf.mxu3  ;;  %vm5330_vm10 = vcmp.eq.f32.partialorder %v463_v40, 8.507059e+37  ;;  %v466_v20 = vor.u32 1.1754944e-38, %v465_v50  ;;  %v4664_v40 = vld [vmem:[#allocation9 + $0x60] sm:$0xf0] }
 0x121   :  { %v4953_v21 = vpop.eup %4952  ;;  %v5282_v22 = vpop.f32.mrf.mxu0  ;;  %v4669_v17 = vld [vmem:[#allocation9 + $0x88] sm:$0xf0]  ;;  %v3583_v18 = vld [vmem:[#allocation9 + $0xe4] sm:$0xf0] }
 0x122   :  { %v5284_v25 = vadd.f32 1.0, %v4953_v21  ;;  %v484_v4 = vmax.f32 %v5274_v6, %v5282_v22  ;;  %v3582_v21 = vor.u32 %v4680_v9, %v3581_v8  ;;  %v3586_v22 = vor.u32 %v4678_v10, %v3583_v18  ;;  %v4654_v8 = vld [vmem:[#allocation9 + $0x10] sm:$0xf0]  ;;  %v4691_v9 = vld [vmem:[#allocation9 + $0x138] sm:$0xf0] }
 0x123   :  { %v5286_v29 = vpop.eup %4954  ;;  %v3534_v33 = vor.u32 %v4669_v17, %v5311_v61  ;;  %v3521_v61 = vld [vmem:[#allocation9 + $0x58] sm:$0xf]  ;;  %v3474_v16 = vor.u32 %v4654_v8, %v3473_v7  ;;  %v3609_v18 = vld [vmem:[#allocation9 + $0x100] sm:$0xf] }
 0x124   :  { %v5288_v34 = vpop.eup %4956  ;;  %4958 = vrcp.f32 %v5284_v25  ;;  %v440_v35 = vmul.f32 %v5286_v29, %v5276_v12  ;;  %vm445_vm5 = vweird.f32 %v5286_v29  ;;  %786 = vmatpush.bf16.msrb.mxu3 %v3582_v21  ;;  %799 = vmatpush.bf16.msra.mxu0 %v3586_v22  ;;  %vm474_vm13 = vweird.f32 %v5284_v25  ;;  %v3495_v21 = vld [vmem:[#allocation9 + $0x3c] sm:$0xf0]  ;;  %v3501_v22 = vld [vmem:[#allocation9 + $0x30] sm:$0xf] }
 0x125   :  { %v455_v39 = vmul.f32 %v5288_v34, %v5278_v13  ;;  %vm460_vm8 = vweird.f32 %v5288_v34  ;;  %vm5325_vm9 = vmor %vm444_vm4, %vm445_vm5  ;;  %v3558_v13 = vor.u32 %v4672_v23, %v3555_v24  ;;  %762 = vmatpush.bf16.msrb.mxu1 %v3534_v33  ;;  %v478_v58 = vand.u32 2147483647, %v5284_v25  ;;  %v4660_v24 = vld [vmem:[#allocation9 + $0x40] sm:$0xf0]  ;;  %v3475_v33 = vld [vmem:[#allocation9 + $0x14] sm:$0xf0] }
 0x126   :  { %v441_v43 = vsub.f32 1.0, %v440_v35  ;;  %vm5341_vm11 = vmor %vm459_vm7, %vm460_vm8  ;;  %v3513_v35 = vld [vmem:[#allocation9 + $0x50] sm:$0xf]  ;;  %v3522_v10 = vor.u32 %v4665_v63, %v3521_v61 }
 0x127   :  { %v456_v49 = vsub.f32 1.0, %v455_v39  ;;  %774 = vmatpush.bf16.msrb.mxu2 %v3558_v13  ;;  %v3514_v51 = vor.u32 %v4664_v40, %v3513_v35  ;;  %vm479_vm15 = vcmp.eq.f32.partialorder %v478_v58, 8.507059e+37  ;;  %v3481_v35 = vld [vmem:[#allocation9 + $0x8] sm:$0xf] }
 0x128   :  { %v442_v54 = vmul.f32 %v5286_v29, %v441_v43  ;;  %v3566_v43 = vor.u32 %v4673_v36, %v3563_v37  ;;  %v4655_v37 = vld [vmem:[#allocation9 + $0x18] sm:$0xf0] }
 0x129   :  { %v457_v59 = vmul.f32 %v5288_v34, %v456_v49  ;;  %v425_v60 = vpop.f32.mrf.mxu0  ;;  %v3543_v49 = vld [vmem:[#allocation9 + $0x94] sm:$0xf0]  ;;  %763 = vmatpush.bf16.msrb.mxu1 %v3514_v51  ;;  %v3482_v40 = vor.u32 %v4655_v37, %v3481_v35  ;;  %v4728_v37 = vld [vmem:[#allocation9 + $0x124] sm:$0xf] }
 0x12a   :  { %v5313_v1 = vpop.eup %4958  ;;  %v443_v3 = vadd.f32 %v5286_v29, %v442_v54  ;;  %v480_v54 = vand.u32 2147483648, %v5284_v25  ;;  %800 = vmatpush.bf16.msra.mxu0 %v3566_v43  ;;  %v3546_v60 = vor.u32 %v4668_v48, %v3543_v49  ;;  %v3529_v48 = vld [vmem:[#allocation9 + $0x60] sm:$0xf]  ;;  %v4666_v49 = vld [vmem:[#allocation9 + $0x70] sm:$0xf0] }
 0x12b   :  { %v470_v11 = vmul.f32 %v5313_v1, %v5284_v25  ;;  %v458_v6 = vadd.f32 %v5288_v34, %v457_v59  ;;  %vm475_vm12 = vweird.f32 %v5313_v1  ;;  %v3542_v59 = vor.u32 %v4670_v47, %v3541_v44  ;;  %v3629_v25 = vld [vmem:[#allocation9 + $0x128] sm:$0xf]  ;;  %v3509_v51 = vld [vmem:[#allocation9 + $0x38] sm:$0xf] }
 0x12c   :  { %v447_v19 = vsel %vm5325_vm9, %v5286_v29, %v443_v3  ;;  %v3561_v29 = vld [vmem:[#allocation9 + $0xa8] sm:$0xf]  ;;  %vm5363_vm14 = vmor %vm474_vm13, %vm475_vm12  ;;  %v481_v5 = vor.u32 1.1754944e-38, %v480_v54  ;;  %v3630_v17 = vor.u32 %v4691_v9, %v3629_v25  ;;  %v3510_v53 = vor.u32 %v4661_v52, %v3509_v51  ;;  %v3489_v54 = vld [vmem:[#allocation9 + $0x10] sm:$0xf] }
 0x12d   :  { %v471_v26 = vsub.f32 1.0, %v470_v11  ;;  %v452_v27 = vsel %vm5304_vm6, %v451_v15, %v447_v19  ;;  %v462_v28 = vsel %vm5341_vm11, %v5288_v34, %v458_v6  ;;  %v3535_v34 = vld [vmem:[#allocation9 + $0x8c] sm:$0xf0]  ;;  %v3562_v42 = vor.u32 %v4675_v30, %v3561_v29  ;;  %v4686_v19 = vld [vmem:[#allocation9 + $0x110] sm:$0xf0] }
 0x12e   :  { %v467_v31 = vsel %vm5330_vm10, %v466_v20, %v462_v28  ;;  %v486_v32 = vmul.f32 %v484_v4, %v452_v27  ;;  %v3538_v46 = vor.u32 %v4667_v41, %v3535_v34  ;;  %v3494_v4 = vor.u32 %v4659_v56, %v3493_v55  ;;  %801 = vmatpush.bf16.msra.mxu0 %v3546_v60  ;;  %v4657_v20 = vld [vmem:[#allocation9 + $0x2c] sm:$0xf]  ;;  %v3503_v27 = vld [vmem:[#allocation9 + $0x44] sm:$0xf0]  ;;  %v3589_v29 = vld [vmem:[#allocation9 + $0xd8] sm:$0xf] }
 0x12f   :  { %v485_v38 = vmul.f32 %v467_v31, %v101_v2  ;;  %v472_v39 = vmul.f32 %v5313_v1, %v471_v26  ;;  %787 = vmatpush.bf16.msrb.mxu3 %v3562_v42  ;;  %v3523_v2 = vld [vmem:[#allocation9 + $0x6c] sm:$0xf0]  ;;  %v3610_v12 = vor.u32 %v4686_v19, %v3609_v18  ;;  %v3498_v23 = vor.u32 %v4657_v20, %v3495_v21  ;;  %v4658_v26 = vld [vmem:[#allocation9 + $0x34] sm:$0xf]  ;;  %v4681_v30 = vld [vmem:[#allocation9 + $0xe8] sm:$0xf0] }
 0x130   :  { %775 = vmatpush.bf16.msrb.mxu2 %v3538_v46  ;;  %v3526_v11 = vor.u32 %v4663_v0, %v3523_v2  ;;  %764 = vmatpush.bf16.msrb.mxu1 %v3494_v4  ;;  %v3502_v28 = vor.u32 %v4660_v24, %v3501_v22  ;;  %v3506_v13 = vor.u32 %v4658_v26, %v3503_v27  ;;  %v3569_v34 = vld [vmem:[#allocation9 + $0xb0] sm:$0xf]  ;;  %v4676_v42 = vld [vmem:[#allocation9 + $0xc0] sm:$0xf0]  ;;  %v3549_v44 = vld [vmem:[#allocation9 + $0x88] sm:$0xf] }
 0x131   :  { %v5354_v45 = vadd.f32 %v486_v32, %v485_v38  ;;  %v473_v50 = vadd.f32 %v5313_v1, %v472_v39  ;;  %v3590_v31 = vor.u32 %v4681_v30, %v3589_v29  ;;  %v4652_v32 = vld [vmem:[#allocation9 + $0x4] sm:$0xf]  ;;  %v4653_v38 = vld [vmem:[#allocation9 + $0xc] sm:$0xf]  ;;  %v3483_v39 = vld [vmem:[#allocation9 + $0x1c] sm:$0xf0]  ;;  %v3570_v43 = vor.u32 %v4676_v42, %v3569_v34 }
 0x132   :  { %802 = vmatpush.bf16.msra.mxu0 %v3526_v11  ;;  %v3478_v36 = vor.u32 %v4652_v32, %v3475_v33  ;;  %v3486_v41 = vor.u32 %v4653_v38, %v3483_v39  ;;  %v4671_v46 = vld [vmem:[#allocation9 + $0x98] sm:$0xf0]  ;;  %v4656_v55 = vld [vmem:[#allocation9 + $0x20] sm:$0xf0]  ;;  %v4729_v18 = vld [vmem:[#allocation9 + $0x128] sm:$0xf0] }
 0x133   :  { %4960 = vtanh.f32 %v5354_v45  ;;  %v477_v3 = vsel %vm5363_vm14, %v5313_v1, %v473_v50  ;;  %788 = vmatpush.bf16.msrb.mxu3 %v3542_v59  ;;  %v3550_v47 = vor.u32 %v4671_v46, %v3549_v44  ;;  %v3530_v50 = vor.u32 %v4666_v49, %v3529_v48  ;;  %v3756_v19 = vld [vmem:[#allocation9 + $0xf0] sm:$0xf]  ;;  %v3736_v26 = vld [vmem:[#allocation9 + $0xc8] sm:$0xf]  ;;  %v4719_v27 = vld [vmem:[#allocation9 + $0xd8] sm:$0xf0] }
 0x134   :  { %v482_v15 = vsel %vm479_vm15, %v481_v5, %v477_v3  ;;  %776 = vmatpush.bf16.msrb.mxu2 %v3518_v62  ;;  %765 = vmatpush.bf16.msrb.mxu1 %v3474_v16  ;;  %v3490_v56 = vor.u32 %v4656_v55, %v3489_v54  ;;  %v4727_v29 = vld [vmem:[#allocation9 + $0x11c] sm:$0xf]  ;;  %v3778_v30 = vld [vmem:[#allocation9 + $0x12c] sm:$0xf0]  ;;  %v3786_v38 = vld [vmem:[#allocation9 + $0x134] sm:$0xf0]  ;;  %v3737_v54 = vor.u32 %v4719_v27, %v3736_v26 }
 0x135   :  { %v3781_v35 = vor.u32 %v4727_v29, %v3778_v30  ;;  %v3789_v48 = vor.u32 %v4728_v37, %v3786_v38  ;;  %v3758_v49 = vld [vmem:[#allocation9 + $0x104] sm:$0xf0]  ;;  %v4715_v27 = vld [vmem:[#allocation9 + $0xb8] sm:$0xf0]  ;;  %v3676_v37 = vld [vmem:[#allocation9 + $0x50] sm:$0xf] }
 0x136   :  { %803 = vmatpush.bf16.msra.mxu0 %v3506_v13  ;;  %v4707_v38 = vld [vmem:[#allocation9 + $0x7c] sm:$0xf]  ;;  %v4710_v34 = vld [vmem:[#allocation9 + $0x90] sm:$0xf0] }
 0x137   :  { %789 = vmatpush.bf16.msrb.mxu3 %v3522_v10  ;;  %v4702_v52 = vld [vmem:[#allocation9 + $0x54] sm:$0xf] }
 0x138   :  { %810 = vmatpush.bf16.msra.mxu1 %v3630_v17  ;;  %777 = vmatpush.bf16.msrb.mxu2 %v3498_v23  ;;  %v3776_v17 = vld [vmem:[#allocation9 + $0x118] sm:$0xf] }
 0x139   :  { %v4961_v14 = vpop.eup %4960  ;;  %v3777_v23 = vor.u32 %v4729_v18, %v3776_v17  ;;  %v4709_v18 = vld [vmem:[#allocation9 + $0x88] sm:$0xf0] }
 0x13a   :  { %v489_v6 = vmul.f32 %v4961_v14, %v482_v15  ;;  %804 = vmatpush.bf16.msra.mxu0 %v3486_v41 }
 0x13b   :  { %790 = vmatpush.bf16.msrb.mxu3 %v3502_v28 }
 0x13c   :  { %v491_v1 = vpack.c.bf16 %v489_v6, %v489_v6  ;;  %490 = vst [vmem:[#allocation11] sm:$0xff] %v489_v6  ;;  %811 = vmatpush.bf16.msra.mxu1 %v3610_v12  ;;  %778 = vmatpush.bf16.msrb.mxu2 %v3478_v36  ;;  %v4724_v12 = vld [vmem:[#allocation9 + $0x100] sm:$0xf0]  ;;  %v4730_v36 = vld [vmem:[#allocation9 + $0x130] sm:$0xf0] }
 0x13d   :  { %v3757_v13 = vor.u32 %v4724_v12, %v3756_v19 }
 0x13e   :  { %493 = vrot.lane.b32.xlu0 %v491_v1, %s5222_s2 }
 0x13f   :  { %791 = vmatpush.bf16.msrb.mxu3 %v3482_v40 }
 0x140   :  { %812 = vmatpush.bf16.msra.mxu1 %v3590_v31  ;;  %1154 = vmatpush.bf16.msra.mxu2 %v3777_v23  ;;  %v3784_v31 = vld [vmem:[#allocation9 + $0x120] sm:$0xf]  ;;  %v3724_v23 = vld [vmem:[#allocation9 + $0xa8] sm:$0xf] }
 0x141   :  { %v3785_v42 = vor.u32 %v4730_v36, %v3784_v31 }
 0x143   :  { %1167 = vmatpush.bf16.msra.mxu3 %v3781_v35  ;;  %1180 = vmatpush.bf16.msrb.mxu0 %v3785_v42 }
 0x144   :  { %813 = vmatpush.bf16.msra.mxu1 %v3570_v43  ;;  %v4722_v43 = vld [vmem:[#allocation9 + $0xf4] sm:$0xf]  ;;  %1155 = vmatpush.bf16.msra.mxu2 %v3757_v13  ;;  %v3726_v13 = vld [vmem:[#allocation9 + $0xbc] sm:$0xf0] }
 0x145   :  { %v3761_v55 = vor.u32 %v4722_v43, %v3758_v49 }
 0x147   :  { %1168 = vmatpush.bf16.msra.mxu3 %v3761_v55 }
 0x148   :  { %814 = vmatpush.bf16.msra.mxu1 %v3550_v47  ;;  %1156 = vmatpush.bf16.msra.mxu2 %v3737_v54  ;;  %v4699_v54 = vld [vmem:[#allocation9 + $0x38] sm:$0xf0] }
 0x14c   :  { %815 = vmatpush.bf16.msra.mxu1 %v3530_v50  ;;  %v3764_v50 = vld [vmem:[#allocation9 + $0xf8] sm:$0xf] }
 0x150   :  { %816 = vmatpush.bf16.msra.mxu1 %v3510_v53  ;;  %v3678_v53 = vld [vmem:[#allocation9 + $0x64] sm:$0xf0] }
 0x154   :  { %817 = vmatpush.bf16.msra.mxu1 %v3490_v56  ;;  %v4725_v56 = vld [vmem:[#allocation9 + $0x108] sm:$0xf0] }
 0x1b0   :  { %v494_v58 = vpop.permute.xlu0 %493 }
 0x1b1   :  { %497 = vst.msk [vmem:[#allocation2] sm:$0xf] %vm496_vm0, %v494_v58  ;;  %v3716_v58 = vld [vmem:[#allocation9 + $0xa0] sm:$0xf] }
 0x1b2   :  { %500 = vst.msk [vmem:[#allocation2] sm:$0x3] %vm103_vm2, %v499_v57  ;;  %v4723_v57 = vld [vmem:[#allocation9 + $0xfc] sm:$0xf] }
 0x1b9   :  { %v501_v59 = vld [vmem:[#allocation2] sm:$0xf] }
 0x1ba   :  { %766 = vmatmul.bf16.vlgmr.msrb.gmra.mxu1 %v501_v59  ;;  %779 = vmatmul.bf16.vlgmr.msrb.gmra.mxu2 %v501_v59 }
 0x1bb   :  { %792 = vmatmul.bf16.vlgmr.msrb.gmra.mxu3 %v501_v59  ;;  %805 = vmatmul.bf16.vlgmr.msra.gmra.mxu0 %v501_v59 }
 0x1bc   :  { %1193 = vmatpush.bf16.msrb.mxu1 %v3789_v48 }
 0x1ca   :  { %818 = vmatmul.bf16.vlgmr.msra.gmra.mxu1 %v501_v59  ;;  %v4714_v59 = vld [vmem:[#allocation9 + $0xb0] sm:$0xf0] }
 0x237   :  { %v767_v60 = vpop.f32.mrf.mxu1 }
 0x238   :  { %v3631_v61 = vmul.f32 -1.442695, %v767_v60  ;;  %v5374_v62 = vpop.f32.mrf.mxu0  ;;  %v3765_v60 = vor.u32 %v4725_v56, %v3764_v50  ;;  %v3656_v50 = vld [vmem:[#allocation9 + $0x28] sm:$0xf]  ;;  %v3684_v56 = vld [vmem:[#allocation9 + $0x58] sm:$0xf] }
 0x23a   :  { %4962 = vpow2.f32 %v3631_v61  ;;  %v3766_v61 = vld [vmem:[#allocation9 + $0x10c] sm:$0xf0]  ;;  %1181 = vmatpush.bf16.msrb.mxu0 %v3765_v60 }
 0x23b   :  { %v3686_v60 = vld [vmem:[#allocation9 + $0x6c] sm:$0xf0] }
 0x23d   :  { %v780_v63 = vpop.f32.mrf.mxu2 }
 0x23e   :  { %v3632_v0 = vmul.f32 -1.442695, %v780_v63  ;;  %v793_v2 = vpop.f32.mrf.mxu3 }
 0x23f   :  { %v3633_v3 = vmul.f32 -1.442695, %v793_v2  ;;  %v769_v4 = vpop.f32.mrf.mxu1 }
 0x240   :  { %v4963_v5 = vpop.eup %4962  ;;  %4964 = vpow2.f32 %v3632_v0  ;;  %v808_v7 = vpop.f32.mrf.mxu0  ;;  %v3769_v4 = vor.u32 %v4723_v57, %v3766_v61  ;;  %v4705_v57 = vld [vmem:[#allocation9 + $0x68] sm:$0xf0] }
 0x241   :  { %v832_v8 = vadd.f32 1.0, %v4963_v5  ;;  %4966 = vpow2.f32 %v3633_v3  ;;  %v3696_v3 = vld [vmem:[#allocation9 + $0x78] sm:$0xf]  ;;  %v4717_v5 = vld [vmem:[#allocation9 + $0xcc] sm:$0xf] }
 0x242   :  { %v3738_v7 = vld [vmem:[#allocation9 + $0xdc] sm:$0xf0]  ;;  %1194 = vmatpush.bf16.msrb.mxu1 %v3769_v4  ;;  %v3697_v31 = vor.u32 %v4709_v18, %v3696_v3  ;;  %v4694_v4 = vld [vmem:[#allocation9 + $0x10] sm:$0xf0] }
 0x243   :  { %4968 = vrcp.f32 %v832_v8  ;;  %v844_v21 = vand.u32 2147483647, %v832_v8  ;;  %v846_v22 = vand.u32 2147483648, %v832_v8  ;;  %vm840_vm1 = vweird.f32 %v832_v8  ;;  %v3636_v3 = vld [vmem:[#allocation9] sm:$0xf] }
 0x245   :  { %v782_v25 = vpop.f32.mrf.mxu2  ;;  %vm5397_vm4 = vcmp.eq.f32.partialorder %v844_v21, 8.507059e+37  ;;  %v847_v46 = vor.u32 1.1754944e-38, %v846_v22  ;;  %v4712_v21 = vld [vmem:[#allocation9 + $0xa4] sm:$0xf]  ;;  %v3718_v22 = vld [vmem:[#allocation9 + $0xb4] sm:$0xf0] }
 0x246   :  { %v4965_v9 = vpop.eup %4964  ;;  %v795_v10 = vpop.f32.mrf.mxu3  ;;  %v3744_v25 = vld [vmem:[#allocation9 + $0xd0] sm:$0xf] }
 0x247   :  { %v4967_v11 = vpop.eup %4966  ;;  %v5376_v14 = vadd.f32 1.0, %v4965_v9  ;;  %v5378_v15 = vpop.f32.mrf.mxu1  ;;  %v4720_v9 = vld [vmem:[#allocation9 + $0xe0] sm:$0xf0]  ;;  %v4718_v10 = vld [vmem:[#allocation9 + $0xd4] sm:$0xf] }
 0x248   :  { %v5380_v6 = vadd.f32 1.0, %v4967_v11  ;;  %v3745_v19 = vor.u32 %v4720_v9, %v3744_v25  ;;  %v880_v26 = vmax.f32 %v5374_v62, %v5378_v15  ;;  %v3698_v62 = vld [vmem:[#allocation9 + $0x8c] sm:$0xf0]  ;;  %v4704_v15 = vld [vmem:[#allocation9 + $0x60] sm:$0xf0] }
 0x249   :  { %v5382_v16 = vpop.eup %4968  ;;  %4970 = vrcp.f32 %v5376_v14  ;;  %v859_v24 = vand.u32 2147483647, %v5376_v14  ;;  %v861_v47 = vand.u32 2147483648, %v5376_v14  ;;  %vm855_vm8 = vweird.f32 %v5376_v14  ;;  %v3792_v25 = vld [vmem:[#allocation9 + $0x128] sm:$0xf] }
 0x24a   :  { %4972 = vrcp.f32 %v5380_v6  ;;  %v836_v1 = vmul.f32 %v5382_v16, %v832_v8  ;;  %vm841_vm3 = vweird.f32 %v5382_v16  ;;  %v3741_v8 = vor.u32 %v4717_v5, %v3738_v7  ;;  %1182 = vmatpush.bf16.msrb.mxu0 %v3745_v19  ;;  %v4731_v9 = vld [vmem:[#allocation9 + $0x138] sm:$0xf0]  ;;  %v4697_v19 = vld [vmem:[#allocation9 + $0x2c] sm:$0xf] }
 0x24b   :  { %vm5407_vm5 = vmor %vm840_vm1, %vm841_vm3  ;;  %vm5411_vm6 = vcmp.eq.f32.partialorder %v859_v24, 8.507059e+37  ;;  %v862_v17 = vor.u32 1.1754944e-38, %v861_v47  ;;  %v874_v43 = vand.u32 2147483647, %v5380_v6  ;;  %v876_v47 = vand.u32 2147483648, %v5380_v6 }
 0x24c   :  { %v837_v20 = vsub.f32 1.0, %v836_v1  ;;  %v3717_v1 = vor.u32 %v4714_v59, %v3716_v58  ;;  %1169 = vmatpush.bf16.msra.mxu3 %v3741_v8  ;;  %v3701_v48 = vor.u32 %v4707_v38, %v3698_v62  ;;  %v3677_v49 = vor.u32 %v4704_v15, %v3676_v37  ;;  %v4703_v59 = vld [vmem:[#allocation9 + $0x5c] sm:$0xf]  ;;  %v3646_v37 = vld [vmem:[#allocation9 + $0x1c] sm:$0xf0] }
 0x24d   :  { %vm870_vm11 = vweird.f32 %v5380_v6  ;;  %vm875_vm13 = vcmp.eq.f32.partialorder %v874_v43, 8.507059e+37  ;;  %v3689_v5 = vor.u32 %v4703_v59, %v3686_v60  ;;  %v3732_v62 = vld [vmem:[#allocation9 + $0xb0] sm:$0xf]  ;;  %v4716_v15 = vld [vmem:[#allocation9 + $0xc0] sm:$0xf0] }
 0x24e   :  { %v838_v28 = vmul.f32 %v5382_v16, %v837_v20  ;;  %1157 = vmatpush.bf16.msra.mxu2 %v3717_v1  ;;  %v4726_v1 = vld [vmem:[#allocation9 + $0x110] sm:$0xf0] }
 0x24f   :  { %v5389_v32 = vpop.eup %4970  ;;  %v821_v33 = vpop.f32.mrf.mxu1 }
 0x250   :  { %v5392_v39 = vpop.eup %4972  ;;  %v851_v40 = vmul.f32 %v5389_v32, %v5376_v14  ;;  %v839_v41 = vadd.f32 %v5382_v16, %v838_v28  ;;  %vm856_vm7 = vweird.f32 %v5389_v32  ;;  %v3746_v14 = vld [vmem:[#allocation9 + $0xe4] sm:$0xf0]  ;;  %v4713_v28 = vld [vmem:[#allocation9 + $0xac] sm:$0xf]  ;;  %v3721_v33 = vor.u32 %v4712_v21, %v3718_v22  ;;  %v4700_v21 = vld [vmem:[#allocation9 + $0x40] sm:$0xf0] }
 0x251   :  { %v866_v44 = vmul.f32 %v5392_v39, %v5380_v6  ;;  %vm5424_vm9 = vmor %vm855_vm8, %vm856_vm7  ;;  %v3749_v20 = vor.u32 %v4718_v10, %v3746_v14  ;;  %vm871_vm10 = vweird.f32 %v5392_v39  ;;  %v877_v6 = vor.u32 1.1754944e-38, %v876_v47  ;;  %v3658_v14 = vld [vmem:[#allocation9 + $0x3c] sm:$0xf0]  ;;  %v4698_v22 = vld [vmem:[#allocation9 + $0x34] sm:$0xf] }
 0x252   :  { %v852_v51 = vsub.f32 1.0, %v851_v40  ;;  %v843_v63 = vsel %vm5407_vm5, %v5382_v16, %v839_v41  ;;  %v3729_v40 = vor.u32 %v4713_v28, %v3726_v13  ;;  %v3704_v41 = vld [vmem:[#allocation9 + $0x80] sm:$0xf]  ;;  %1170 = vmatpush.bf16.msra.mxu3 %v3721_v33  ;;  %1158 = vmatpush.bf16.msra.mxu2 %v3697_v31  ;;  %vm5449_vm12 = vmor %vm870_vm11, %vm871_vm10  ;;  %v3793_v16 = vor.u32 %v4731_v9, %v3792_v25  ;;  %v4721_v28 = vld [vmem:[#allocation9 + $0xe8] sm:$0xf0] }
 0x253   :  { %v867_v2 = vsub.f32 1.0, %v866_v44  ;;  %v848_v12 = vsel %vm5397_vm4, %v847_v46, %v843_v63  ;;  %1195 = vmatpush.bf16.msrb.mxu1 %v3749_v20  ;;  %v4708_v44 = vld [vmem:[#allocation9 + $0x84] sm:$0xf]  ;;  %v3706_v46 = vld [vmem:[#allocation9 + $0x94] sm:$0xf0]  ;;  %v3681_v63 = vor.u32 %v4702_v52, %v3678_v53  ;;  %v3661_v20 = vor.u32 %v4697_v19, %v3658_v14 }
 0x254   :  { %v853_v0 = vmul.f32 %v5389_v32, %v852_v51  ;;  %v882_v36 = vmul.f32 %v880_v26, %v848_v12  ;;  %v3705_v51 = vor.u32 %v4710_v34, %v3704_v41  ;;  %v3709_v55 = vor.u32 %v4708_v44, %v3706_v46  ;;  %v3664_v12 = vld [vmem:[#allocation9 + $0x30] sm:$0xf]  ;;  %v3644_v31 = vld [vmem:[#allocation9 + $0x8] sm:$0xf]  ;;  %v4711_v34 = vld [vmem:[#allocation9 + $0x98] sm:$0xf0] }
 0x255   :  { %v868_v30 = vmul.f32 %v5392_v39, %v867_v2  ;;  %v3685_v2 = vor.u32 %v4705_v57, %v3684_v56  ;;  %v3712_v41 = vld [vmem:[#allocation9 + $0x88] sm:$0xf]  ;;  %v3692_v44 = vld [vmem:[#allocation9 + $0x60] sm:$0xf]  ;;  %v4706_v46 = vld [vmem:[#allocation9 + $0x70] sm:$0xf0] }
 0x256   :  { %v854_v11 = vadd.f32 %v5389_v32, %v853_v0  ;;  %1171 = vmatpush.bf16.msra.mxu3 %v3701_v48  ;;  %1159 = vmatpush.bf16.msra.mxu2 %v3677_v49  ;;  %v3657_v0 = vor.u32 %v4699_v54, %v3656_v50  ;;  %v3713_v43 = vor.u32 %v4711_v34, %v3712_v41  ;;  %v3672_v47 = vld [vmem:[#allocation9 + $0x38] sm:$0xf]  ;;  %v4701_v48 = vld [vmem:[#allocation9 + $0x48] sm:$0xf0]  ;;  %v3652_v50 = vld [vmem:[#allocation9 + $0x10] sm:$0xf] }
 0x257   :  { %1196 = vmatpush.bf16.msrb.mxu1 %v3729_v40  ;;  %v3733_v40 = vor.u32 %v4716_v15, %v3732_v62  ;;  %v3673_v49 = vor.u32 %v4701_v48, %v3672_v47  ;;  %v895_v53 = vld [vmem:[#allocation3 + $0x4] sm:$0x3]  ;;  %v5492_v62 = vld [vmem:[#allocation9 + $0xb0] sm:$0xf0]  ;;  %v3921_v41 = vld [vmem:[#allocation9 + $0x104] sm:$0xf0] }
 0x258   :  { %v858_v24 = vsel %vm5424_vm9, %v5389_v32, %v854_v11  ;;  %v3725_v32 = vor.u32 %v4715_v27, %v3724_v23  ;;  %v3666_v23 = vld [vmem:[#allocation9 + $0x44] sm:$0xf0]  ;;  %v3752_v27 = vld [vmem:[#allocation9 + $0xd8] sm:$0xf]  ;;  %v4765_v47 = vld [vmem:[#allocation9 + $0x108] sm:$0xf0] }
 0x259   :  { %v863_v29 = vsel %vm5411_vm6, %v862_v17, %v858_v24  ;;  %v3772_v17 = vld [vmem:[#allocation9 + $0x100] sm:$0xf]  ;;  %v3665_v24 = vor.u32 %v4700_v21, %v3664_v12  ;;  %v3669_v26 = vor.u32 %v4698_v22, %v3666_v23  ;;  %v3753_v13 = vor.u32 %v4721_v28, %v3752_v27  ;;  %v3899_v12 = vld [vmem:[#allocation9 + $0xc8] sm:$0xf]  ;;  %v4759_v21 = vld [vmem:[#allocation9 + $0xd8] sm:$0xf0] }
 0x25a   :  { %v881_v35 = vmul.f32 %v863_v29, %v5354_v45  ;;  %v869_v45 = vadd.f32 %v5392_v39, %v868_v30  ;;  %1183 = vmatpush.bf16.msrb.mxu0 %v3725_v32  ;;  %1172 = vmatpush.bf16.msra.mxu3 %v3681_v63  ;;  %v3773_v18 = vor.u32 %v4726_v1, %v3772_v17  ;;  %v4692_v29 = vld [vmem:[#allocation9 + $0x4] sm:$0xf]  ;;  %v3638_v30 = vld [vmem:[#allocation9 + $0x14] sm:$0xf0]  ;;  %v4767_v22 = vld [vmem:[#allocation9 + $0x11c] sm:$0xf] }
 0x25b   :  { %1197 = vmatpush.bf16.msrb.mxu1 %v3709_v55  ;;  %1160 = vmatpush.bf16.msra.mxu2 %v3657_v0  ;;  %v3641_v33 = vor.u32 %v4692_v29, %v3638_v30  ;;  %v4764_v1 = vld [vmem:[#allocation9 + $0x100] sm:$0xf0]  ;;  %v3941_v23 = vld [vmem:[#allocation9 + $0x12c] sm:$0xf0]  ;;  %v3947_v28 = vld [vmem:[#allocation9 + $0x120] sm:$0xf] }
 0x25c   :  { %v5439_v42 = vadd.f32 %v882_v36, %v881_v35  ;;  %v873_v61 = vsel %vm5449_vm12, %v5392_v39, %v869_v45  ;;  %v3637_v39 = vor.u32 %v4694_v4, %v3636_v3  ;;  %v4695_v35 = vld [vmem:[#allocation9 + $0x18] sm:$0xf0]  ;;  %v4693_v36 = vld [vmem:[#allocation9 + $0xc] sm:$0xf]  ;;  %v3693_v45 = vor.u32 %v4706_v46, %v3692_v44  ;;  %v4768_v29 = vld [vmem:[#allocation9 + $0x124] sm:$0xf] }
 0x25d   :  { %v878_v8 = vsel %vm875_vm13, %v877_v6, %v873_v61  ;;  %v3645_v32 = vor.u32 %v4695_v35, %v3644_v31  ;;  %v3649_v38 = vor.u32 %v4693_v36, %v3646_v37  ;;  %v3944_v27 = vor.u32 %v4767_v22, %v3941_v23  ;;  %v5488_v36 = vld [vmem:[#allocation9 + $0xa0] sm:$0xf] }
 0x25e   :  { %4974 = vtanh.f32 %v5439_v42  ;;  %1184 = vmatpush.bf16.msrb.mxu0 %v3705_v51  ;;  %1173 = vmatpush.bf16.msra.mxu3 %v3661_v20  ;;  %v4696_v51 = vld [vmem:[#allocation9 + $0x20] sm:$0xf0]  ;;  %v3900_v44 = vor.u32 %v4759_v21, %v3899_v12 }
 0x25f   :  { %1198 = vmatpush.bf16.msrb.mxu1 %v3689_v5  ;;  %1161 = vmatpush.bf16.msra.mxu2 %v3637_v39  ;;  %v3653_v52 = vor.u32 %v4696_v51, %v3652_v50  ;;  %v4769_v39 = vld [vmem:[#allocation9 + $0x128] sm:$0xf0]  ;;  %v4763_v51 = vld [vmem:[#allocation9 + $0xfc] sm:$0xf]  ;;  %v4752_v12 = vld [vmem:[#allocation9 + $0xa4] sm:$0xf] }
 0x262   :  { %1185 = vmatpush.bf16.msrb.mxu0 %v3685_v2  ;;  %1174 = vmatpush.bf16.msra.mxu3 %v3641_v33 }
 0x263   :  { %1206 = vmatpush.bf16.msrb.mxu2 %v3793_v16  ;;  %1199 = vmatpush.bf16.msrb.mxu1 %v3669_v26 }
 0x264   :  { %v4975_v7 = vpop.eup %4974 }
 0x265   :  { %v885_v10 = vmul.f32 %v4975_v7, %v878_v8 }
 0x266   :  { %1186 = vmatpush.bf16.msrb.mxu0 %v3665_v24 }
 0x267   :  { %v888_v11 = vpack.c.bf16 %v885_v10, %v885_v10  ;;  %887 = vst [vmem:[#allocation11 + $0x8] sm:$0xff] %v885_v10  ;;  %1207 = vmatpush.bf16.msrb.mxu2 %v3773_v18  ;;  %1200 = vmatpush.bf16.msrb.mxu1 %v3649_v38  ;;  %v3939_v10 = vld [vmem:[#allocation9 + $0x118] sm:$0xf] }
 0x268   :  { %v3940_v17 = vor.u32 %v4769_v39, %v3939_v10  ;;  %v3909_v10 = vld [vmem:[#allocation9 + $0xe4] sm:$0xf0] }
 0x269   :  { %890 = vrot.lane.b32.xlu1 %v888_v11, %s5222_s2  ;;  %v3919_v11 = vld [vmem:[#allocation9 + $0xf0] sm:$0xf] }
 0x26a   :  { %1187 = vmatpush.bf16.msrb.mxu0 %v3645_v32  ;;  %1550 = vmatpush.bf16.msrb.mxu3 %v3940_v17  ;;  %v3920_v20 = vor.u32 %v4764_v1, %v3919_v11  ;;  %v3949_v32 = vld [vmem:[#allocation9 + $0x134] sm:$0xf0]  ;;  %v4766_v11 = vld [vmem:[#allocation9 + $0x110] sm:$0xf0] }
 0x26b   :  { %1208 = vmatpush.bf16.msrb.mxu2 %v3753_v13  ;;  %v4770_v13 = vld [vmem:[#allocation9 + $0x130] sm:$0xf0]  ;;  %v3952_v15 = vor.u32 %v4768_v29, %v3949_v32  ;;  %v3889_v29 = vld [vmem:[#allocation9 + $0xbc] sm:$0xf0]  ;;  %v4744_v32 = vld [vmem:[#allocation9 + $0x60] sm:$0xf0] }
 0x26c   :  { %v3948_v37 = vor.u32 %v4770_v13, %v3947_v28 }
 0x26e   :  { %1563 = vmatpush.bf16.msra.mxu0 %v3944_v27  ;;  %1551 = vmatpush.bf16.msrb.mxu3 %v3920_v20  ;;  %v3881_v20 = vld [vmem:[#allocation9 + $0xb4] sm:$0xf0] }
 0x26f   :  { %1209 = vmatpush.bf16.msrb.mxu2 %v3733_v40  ;;  %v4762_v40 = vld [vmem:[#allocation9 + $0xf4] sm:$0xf]  ;;  %1576 = vmatpush.bf16.msra.mxu1 %v3948_v37 }
 0x270   :  { %v3924_v46 = vor.u32 %v4762_v40, %v3921_v41  ;;  %v3869_v40 = vld [vmem:[#allocation9 + $0x94] sm:$0xf0] }
 0x272   :  { %1564 = vmatpush.bf16.msra.mxu0 %v3924_v46  ;;  %1552 = vmatpush.bf16.msrb.mxu3 %v3900_v44 }
 0x273   :  { %1210 = vmatpush.bf16.msrb.mxu2 %v3713_v43 }
 0x277   :  { %1211 = vmatpush.bf16.msrb.mxu2 %v3693_v45  ;;  %v3927_v45 = vld [vmem:[#allocation9 + $0xf8] sm:$0xf] }
 0x278   :  { %v3928_v50 = vor.u32 %v4765_v47, %v3927_v45  ;;  %v4742_v47 = vld [vmem:[#allocation9 + $0x54] sm:$0xf] }
 0x27a   :  { %1577 = vmatpush.bf16.msra.mxu1 %v3928_v50 }
 0x27b   :  { %1212 = vmatpush.bf16.msrb.mxu2 %v3673_v49 }
 0x27f   :  { %1213 = vmatpush.bf16.msrb.mxu2 %v3653_v52  ;;  %v3929_v52 = vld [vmem:[#allocation9 + $0x10c] sm:$0xf0] }
 0x2db   :  { %v891_v54 = vpop.permute.xlu1 %890 }
 0x2dc   :  { %893 = vst.msk [vmem:[#allocation2] sm:$0xf] %vm496_vm0, %v891_v54  ;;  %v5502_v54 = vld [vmem:[#allocation9 + $0x78] sm:$0xf] }
 0x2dd   :  { %896 = vst.msk [vmem:[#allocation2] sm:$0x3] %vm103_vm2, %v895_v53 }
 0x2e4   :  { %v897_v55 = vld [vmem:[#allocation2] sm:$0xf] }
 0x2e5   :  { %1162 = vmatmul.bf16.vlgmr.msra.gmra.mxu2 %v897_v55  ;;  %1175 = vmatmul.bf16.vlgmr.msra.gmra.mxu3 %v897_v55 }
 0x2e6   :  { %1188 = vmatmul.bf16.vlgmr.msrb.gmra.mxu0 %v897_v55  ;;  %1201 = vmatmul.bf16.vlgmr.msrb.gmra.mxu1 %v897_v55 }
 0x2e7   :  { %1589 = vmatpush.bf16.msra.mxu2 %v3952_v15  ;;  %v4748_v15 = vld [vmem:[#allocation9 + $0x84] sm:$0xf] }
 0x2e8   :  { %v3872_v50 = vor.u32 %v4748_v15, %v3869_v40  ;;  %v3855_v40 = vld [vmem:[#allocation9 + $0x60] sm:$0xf] }
 0x2f5   :  { %1214 = vmatmul.bf16.vlgmr.msrb.gmra.mxu2 %v897_v55  ;;  %v5504_v55 = vld [vmem:[#allocation9 + $0x88] sm:$0xf0] }
 0x2f6   :  { %v3860_v13 = vor.u32 %v5504_v55, %v5502_v54  ;;  %v4743_v54 = vld [vmem:[#allocation9 + $0x5c] sm:$0xf]  ;;  %v3849_v55 = vld [vmem:[#allocation9 + $0x6c] sm:$0xf0] }
 0x363   :  { %v1189_v56 = vpop.f32.mrf.mxu0  ;;  %v5459_v57 = vpop.f32.mrf.mxu1 }
 0x364   :  { %v3796_v58 = vmul.f32 -1.442695, %v1189_v56  ;;  %v3932_v56 = vor.u32 %v4763_v51, %v3929_v52  ;;  %v3847_v51 = vld [vmem:[#allocation9 + $0x58] sm:$0xf]  ;;  %v4745_v52 = vld [vmem:[#allocation9 + $0x68] sm:$0xf0] }
 0x366   :  { %4976 = vpow2.f32 %v3796_v58  ;;  %v4757_v58 = vld [vmem:[#allocation9 + $0xcc] sm:$0xf]  ;;  %1590 = vmatpush.bf16.msra.mxu2 %v3932_v56 }
 0x368   :  { %v1163_v59 = vpop.f32.mrf.mxu2  ;;  %v1176_v60 = vpop.f32.mrf.mxu3 }
 0x369   :  { %v3794_v61 = vmul.f32 -1.442695, %v1163_v59  ;;  %v3795_v63 = vmul.f32 -1.442695, %v1176_v60 }
 0x36b   :  { %4978 = vpow2.f32 %v3794_v61  ;;  %v1191_v6 = vpop.f32.mrf.mxu0  ;;  %v1204_v0 = vpop.f32.mrf.mxu1  ;;  %v3880_v61 = vor.u32 %v5492_v62, %v5488_v36  ;;  %v3861_v36 = vld [vmem:[#allocation9 + $0x8c] sm:$0xf0]  ;;  %v4750_v62 = vld [vmem:[#allocation9 + $0x90] sm:$0xf0] }
 0x36c   :  { %v4977_v2 = vpop.eup %4976  ;;  %4980 = vpow2.f32 %v3795_v63  ;;  %v3901_v63 = vld [vmem:[#allocation9 + $0xdc] sm:$0xf0]  ;;  %v3907_v6 = vld [vmem:[#allocation9 + $0xd0] sm:$0xf]  ;;  %v4760_v0 = vld [vmem:[#allocation9 + $0xe0] sm:$0xf0] }
 0x36d   :  { %v5461_v3 = vadd.f32 1.0, %v4977_v2  ;;  %1553 = vmatpush.bf16.msrb.mxu3 %v3880_v61  ;;  %v3848_v61 = vor.u32 %v4745_v52, %v3847_v51 }
 0x36f   :  { %4982 = vrcp.f32 %v5461_v3  ;;  %vm1266_vm9 = vweird.f32 %v5461_v3 }
 0x370   :  { %v1165_v4 = vpop.f32.mrf.mxu2  ;;  %v1178_v5 = vpop.f32.mrf.mxu3 }
 0x371   :  { %v4979_v7 = vpop.eup %4978  ;;  %1554 = vmatpush.bf16.msrb.mxu3 %v3860_v13  ;;  %v4771_v4 = vld [vmem:[#allocation9 + $0x138] sm:$0xf0]  ;;  %v4732_v13 = vld [vmem:[#allocation9 + $0x4] sm:$0xf] }
 0x372   :  { %v4981_v8 = vpop.eup %4980  ;;  %v5464_v25 = vadd.f32 1.0, %v4979_v7  ;;  %v3904_v7 = vor.u32 %v4757_v58, %v3901_v63 }
 0x373   :  { %v5466_v9 = vadd.f32 1.0, %v4981_v8  ;;  %v3908_v8 = vor.u32 %v4760_v0, %v3907_v6  ;;  %v4734_v6 = vld [vmem:[#allocation9 + $0x10] sm:$0xf0]  ;;  %v3852_v0 = vor.u32 %v4743_v54, %v3849_v55 }
 0x374   :  { %4984 = vrcp.f32 %v5464_v25  ;;  %v1240_v19 = vand.u32 2147483647, %v5464_v25  ;;  %v1242_v33 = vand.u32 2147483648, %v5464_v25  ;;  %vm1236_vm3 = vweird.f32 %v5464_v25  ;;  %1565 = vmatpush.bf16.msra.mxu0 %v3904_v7 }
 0x375   :  { %4986 = vrcp.f32 %v5466_v9  ;;  %v5470_v16 = vpop.eup %4982  ;;  %v1255_v14 = vand.u32 2147483647, %v5466_v9  ;;  %v1257_v35 = vand.u32 2147483648, %v5466_v9  ;;  %vm1251_vm4 = vweird.f32 %v5466_v9  ;;  %1578 = vmatpush.bf16.msra.mxu1 %v3908_v8 }
 0x376   :  { %v5480_v26 = vmul.f32 %v5470_v16, %v5461_v3  ;;  %vm5494_vm14 = vcmp.eq.f32.partialorder %v1240_v19, 8.507059e+37  ;;  %v1243_v5 = vor.u32 1.1754944e-38, %v1242_v33  ;;  %vm1267_vm8 = vweird.f32 %v5470_v16 }
 0x377   :  { %vm5529_vm7 = vcmp.eq.f32.partialorder %v1255_v14, 8.507059e+37  ;;  %v1258_v1 = vor.u32 1.1754944e-38, %v1257_v35  ;;  %v4753_v14 = vld [vmem:[#allocation9 + $0xac] sm:$0xf]  ;;  %v4747_v35 = vld [vmem:[#allocation9 + $0x7c] sm:$0xf]  ;;  %vm5559_vm10 = vmor %vm1266_vm9, %vm1267_vm8 }
 0x378   :  { %v5472_v18 = vpop.f32.mrf.mxu2  ;;  %v1263_v48 = vsub.f32 1.0, %v5480_v26  ;;  %v3887_v26 = vld [vmem:[#allocation9 + $0xa8] sm:$0xf]  ;;  %v3864_v43 = vor.u32 %v4747_v35, %v3861_v36 }
 0x379   :  { %v1276_v22 = vmax.f32 %v5459_v57, %v5472_v18 }
 0x37a   :  { %v5476_v24 = vpop.eup %4984  ;;  %v1264_v23 = vmul.f32 %v5470_v16, %v1263_v48  ;;  %v3841_v48 = vld [vmem:[#allocation9 + $0x64] sm:$0xf0] }
 0x37b   :  { %v5482_v30 = vpop.eup %4986  ;;  %v1232_v31 = vmul.f32 %v5476_v24, %v5464_v25  ;;  %vm1237_vm15 = vweird.f32 %v5476_v24  ;;  %v4758_v25 = vld [vmem:[#allocation9 + $0xd4] sm:$0xf]  ;;  %v3844_v58 = vor.u32 %v4742_v47, %v3841_v48  ;;  %v4736_v47 = vld [vmem:[#allocation9 + $0x20] sm:$0xf0] }
 0x37c   :  { %v1247_v38 = vmul.f32 %v5482_v30, %v5466_v9  ;;  %vm1252_vm1 = vweird.f32 %v5482_v30  ;;  %vm5514_vm5 = vmor %vm1236_vm3, %vm1237_vm15  ;;  %v3912_v19 = vor.u32 %v4758_v25, %v3909_v10  ;;  %v4755_v9 = vld [vmem:[#allocation9 + $0xb8] sm:$0xf0]  ;;  %v1265_v44 = vadd.f32 %v5470_v16, %v1264_v23  ;;  %v3829_v23 = vld [vmem:[#allocation9 + $0x44] sm:$0xf0] }
 0x37d   :  { %v1233_v34 = vsub.f32 1.0, %v1232_v31  ;;  %vm5523_vm6 = vmor %vm1251_vm4, %vm1252_vm1  ;;  %v3839_v31 = vld [vmem:[#allocation9 + $0x50] sm:$0xf]  ;;  %v3888_v33 = vor.u32 %v4755_v9, %v3887_v26 }
 0x37e   :  { %v1248_v49 = vsub.f32 1.0, %v1247_v38  ;;  %1591 = vmatpush.bf16.msra.mxu2 %v3912_v19  ;;  %v3867_v38 = vld [vmem:[#allocation9 + $0x80] sm:$0xf]  ;;  %v3840_v46 = vor.u32 %v4744_v32, %v3839_v31  ;;  %v4733_v31 = vld [vmem:[#allocation9 + $0xc] sm:$0xf] }
 0x37f   :  { %v1234_v53 = vmul.f32 %v5476_v24, %v1233_v34  ;;  %v1272_v34 = vand.u32 2147483648, %v5461_v3  ;;  %1579 = vmatpush.bf16.msra.mxu1 %v3888_v33  ;;  %v3868_v45 = vor.u32 %v4750_v62, %v3867_v38  ;;  %v3821_v19 = vld [vmem:[#allocation9 + $0x3c] sm:$0xf0]  ;;  %v4756_v32 = vld [vmem:[#allocation9 + $0xc0] sm:$0xf0] }
 0x380   :  { %v1249_v59 = vmul.f32 %v5482_v30, %v1248_v49  ;;  %v1217_v60 = vpop.f32.mrf.mxu2  ;;  %v4739_v49 = vld [vmem:[#allocation9 + $0x38] sm:$0xf0]  ;;  %1555 = vmatpush.bf16.msrb.mxu3 %v3840_v46  ;;  %v3809_v33 = vld [vmem:[#allocation9 + $0x1c] sm:$0xf0]  ;;  %v3875_v38 = vld [vmem:[#allocation9 + $0x88] sm:$0xf] }
 0x381   :  { %v1235_v2 = vadd.f32 %v5476_v24, %v1234_v53  ;;  %v1270_v53 = vand.u32 2147483647, %v5461_v3  ;;  %v1273_v63 = vor.u32 1.1754944e-38, %v1272_v34  ;;  %v3799_v3 = vld [vmem:[#allocation9] sm:$0xf]  ;;  %v3812_v36 = vor.u32 %v4733_v31, %v3809_v33 }
 0x382   :  { %v1250_v39 = vadd.f32 %v5482_v30, %v1249_v59  ;;  %v1269_v59 = vsel %vm5559_vm10, %v5470_v16, %v1265_v44  ;;  %v3800_v25 = vor.u32 %v4734_v6, %v3799_v3  ;;  %v4751_v62 = vld [vmem:[#allocation9 + $0x98] sm:$0xf0]  ;;  %v4746_v34 = vld [vmem:[#allocation9 + $0x70] sm:$0xf0]  ;;  %v3835_v44 = vld [vmem:[#allocation9 + $0x38] sm:$0xf] }
 0x383   :  { %v1239_v21 = vsel %vm5514_vm5, %v5476_v24, %v1235_v2  ;;  %v3884_v24 = vor.u32 %v4752_v12, %v3881_v20  ;;  %1580 = vmatpush.bf16.msra.mxu1 %v3868_v45  ;;  %vm1271_vm11 = vcmp.eq.f32.partialorder %v1270_v53, 8.507059e+37  ;;  %v3955_v2 = vld [vmem:[#allocation9 + $0x128] sm:$0xf]  ;;  %v3827_v12 = vld [vmem:[#allocation9 + $0x30] sm:$0xf]  ;;  %v3876_v15 = vor.u32 %v4751_v62, %v3875_v38 }
 0x384   :  { %v1244_v27 = vsel %vm5494_vm14, %v1243_v5, %v1239_v21  ;;  %v1254_v28 = vsel %vm5523_vm6, %v5482_v30, %v1250_v39  ;;  %v3892_v30 = vor.u32 %v4753_v14, %v3889_v29  ;;  %v1274_v7 = vsel %vm1271_vm11, %v1273_v63, %v1269_v59  ;;  %v3935_v39 = vld [vmem:[#allocation9 + $0x100] sm:$0xf]  ;;  %v4740_v21 = vld [vmem:[#allocation9 + $0x40] sm:$0xf0]  ;;  %v3915_v14 = vld [vmem:[#allocation9 + $0xd8] sm:$0xf] }
 0x385   :  { %v1259_v57 = vsel %vm5529_vm7, %v1258_v1, %v1254_v28  ;;  %v1278_v18 = vmul.f32 %v1276_v22, %v1244_v27  ;;  %1566 = vmatpush.bf16.msra.mxu0 %v3884_v24  ;;  %v3956_v16 = vor.u32 %v4771_v4, %v3955_v2  ;;  %v3936_v17 = vor.u32 %v4766_v11, %v3935_v39  ;;  %v4737_v1 = vld [vmem:[#allocation9 + $0x2c] sm:$0xf]  ;;  %v4738_v22 = vld [vmem:[#allocation9 + $0x34] sm:$0xf]  ;;  %v3801_v24 = vld [vmem:[#allocation9 + $0x14] sm:$0xf0] }
 0x386   :  { %v1277_v37 = vmul.f32 %v1259_v57, %v5439_v42  ;;  %v3819_v42 = vld [vmem:[#allocation9 + $0x28] sm:$0xf]  ;;  %1592 = vmatpush.bf16.msra.mxu2 %v3892_v30  ;;  %v3824_v20 = vor.u32 %v4737_v1, %v3821_v19  ;;  %v3828_v26 = vor.u32 %v4740_v21, %v3827_v12  ;;  %v3832_v9 = vor.u32 %v4738_v22, %v3829_v23  ;;  %v4761_v27 = vld [vmem:[#allocation9 + $0xe8] sm:$0xf0]  ;;  %v3815_v45 = vld [vmem:[#allocation9 + $0x10] sm:$0xf] }
 0x387   :  { %v3820_v60 = vor.u32 %v4739_v49, %v3819_v42  ;;  %1581 = vmatpush.bf16.msra.mxu1 %v3848_v61  ;;  %v3916_v28 = vor.u32 %v4761_v27, %v3915_v14  ;;  %v3807_v29 = vld [vmem:[#allocation9 + $0x8] sm:$0xf]  ;;  %v3804_v57 = vor.u32 %v4732_v13, %v3801_v24  ;;  %v4741_v46 = vld [vmem:[#allocation9 + $0x48] sm:$0xf0]  ;;  %v3816_v48 = vor.u32 %v4736_v47, %v3815_v45  ;;  %v4082_v11 = vld [vmem:[#allocation9 + $0xf0] sm:$0xf] }
 0x388   :  { %v5549_v41 = vadd.f32 %v1278_v18, %v1277_v37  ;;  %v4735_v18 = vld [vmem:[#allocation9 + $0x18] sm:$0xf0]  ;;  %v3895_v37 = vld [vmem:[#allocation9 + $0xb0] sm:$0xf]  ;;  %v3836_v42 = vor.u32 %v4741_v46, %v3835_v44  ;;  %v1291_v49 = vld [vmem:[#allocation3 + $0x6] sm:$0x3] }
 0x389   :  { %1567 = vmatpush.bf16.msra.mxu0 %v3864_v43  ;;  %1556 = vmatpush.bf16.msrb.mxu3 %v3820_v60  ;;  %v3808_v35 = vor.u32 %v4735_v18, %v3807_v29  ;;  %v3896_v30 = vor.u32 %v4756_v32, %v3895_v37  ;;  %v3856_v43 = vor.u32 %v4746_v34, %v3855_v40  ;;  %v4809_v39 = vld [vmem:[#allocation9 + $0x128] sm:$0xf0]  ;;  %v4807_v22 = vld [vmem:[#allocation9 + $0x11c] sm:$0xf]  ;;  %v4104_v23 = vld [vmem:[#allocation9 + $0x12c] sm:$0xf0] }
 0x38a   :  { %4988 = vtanh.f32 %v5549_v41  ;;  %1593 = vmatpush.bf16.msra.mxu2 %v3872_v50  ;;  %v4110_v13 = vld [vmem:[#allocation9 + $0x120] sm:$0xf]  ;;  %v4810_v24 = vld [vmem:[#allocation9 + $0x130] sm:$0xf0]  ;;  %v4808_v29 = vld [vmem:[#allocation9 + $0x124] sm:$0xf] }
 0x38b   :  { %1582 = vmatpush.bf16.msra.mxu1 %v3828_v26  ;;  %v4062_v18 = vld [vmem:[#allocation9 + $0xc8] sm:$0xf]  ;;  %v4799_v31 = vld [vmem:[#allocation9 + $0xd8] sm:$0xf0]  ;;  %v4111_v33 = vor.u32 %v4810_v24, %v4110_v13  ;;  %v4090_v62 = vld [vmem:[#allocation9 + $0xf8] sm:$0xf] }
 0x38c   :  { %v4084_v38 = vld [vmem:[#allocation9 + $0x104] sm:$0xf0]  ;;  %v4805_v44 = vld [vmem:[#allocation9 + $0x108] sm:$0xf0]  ;;  %v4803_v46 = vld [vmem:[#allocation9 + $0xfc] sm:$0xf]  ;;  %v4063_v47 = vor.u32 %v4799_v31, %v4062_v18 }
 0x38d   :  { %1568 = vmatpush.bf16.msra.mxu0 %v3844_v58  ;;  %1557 = vmatpush.bf16.msrb.mxu3 %v3800_v25  ;;  %v4102_v25 = vld [vmem:[#allocation9 + $0x118] sm:$0xf]  ;;  %v4787_v31 = vld [vmem:[#allocation9 + $0x7c] sm:$0xf] }
 0x38e   :  { %1594 = vmatpush.bf16.msra.mxu2 %v3852_v0  ;;  %v4103_v12 = vor.u32 %v4809_v39, %v4102_v25  ;;  %v4010_v45 = vld [vmem:[#allocation9 + $0x58] sm:$0xf] }
 0x38f   :  { %1583 = vmatpush.bf16.msra.mxu1 %v3808_v35  ;;  %v4112_v35 = vld [vmem:[#allocation9 + $0x134] sm:$0xf0] }
 0x390   :  { %v4989_v5 = vpop.eup %4988  ;;  %v4115_v32 = vor.u32 %v4808_v29, %v4112_v35 }
 0x391   :  { %v1281_v8 = vmul.f32 %v4989_v5, %v1274_v7  ;;  %1602 = vmatpush.bf16.msra.mxu3 %v3956_v16  ;;  %1569 = vmatpush.bf16.msra.mxu0 %v3824_v20 }
 0x392   :  { %1595 = vmatpush.bf16.msra.mxu2 %v3832_v9 }
 0x393   :  { %v1284_v10 = vpack.c.bf16 %v1281_v8, %v1281_v8  ;;  %1283 = vst [vmem:[#allocation11 + $0x10] sm:$0xff] %v1281_v8 }
 0x395   :  { %1286 = vrot.lane.b32.xlu1 %v1284_v10, %s5222_s2  ;;  %1603 = vmatpush.bf16.msra.mxu3 %v3936_v17  ;;  %v4804_v17 = vld [vmem:[#allocation9 + $0x100] sm:$0xf0] }
 0x396   :  { %1570 = vmatpush.bf16.msra.mxu0 %v3804_v57  ;;  %1596 = vmatpush.bf16.msra.mxu2 %v3812_v36  ;;  %v4083_v27 = vor.u32 %v4804_v17, %v4082_v11  ;;  %v4792_v17 = vld [vmem:[#allocation9 + $0xa4] sm:$0xf] }
 0x399   :  { %1604 = vmatpush.bf16.msra.mxu3 %v3916_v28  ;;  %v4107_v28 = vor.u32 %v4807_v22, %v4104_v23  ;;  %v4795_v22 = vld [vmem:[#allocation9 + $0xb8] sm:$0xf0]  ;;  %v4793_v23 = vld [vmem:[#allocation9 + $0xac] sm:$0xf] }
 0x39a   :  { %1946 = vmatpush.bf16.msrb.mxu0 %v4103_v12  ;;  %1972 = vmatpush.bf16.msrb.mxu2 %v4111_v33  ;;  %v4024_v33 = vld [vmem:[#allocation9 + $0x8c] sm:$0xf0] }
 0x39b   :  { %1959 = vmatpush.bf16.msrb.mxu1 %v4107_v28 }
 0x39d   :  { %1605 = vmatpush.bf16.msra.mxu3 %v3896_v30  ;;  %v4802_v30 = vld [vmem:[#allocation9 + $0xf4] sm:$0xf] }
 0x39e   :  { %1947 = vmatpush.bf16.msrb.mxu0 %v4083_v27 }
 0x3a1   :  { %1606 = vmatpush.bf16.msra.mxu3 %v3876_v15 }
 0x3a2   :  { %1948 = vmatpush.bf16.msrb.mxu0 %v4063_v47  ;;  %v4785_v47 = vld [vmem:[#allocation9 + $0x68] sm:$0xf0] }
 0x3a5   :  { %1607 = vmatpush.bf16.msra.mxu3 %v3856_v43  ;;  %v4087_v43 = vor.u32 %v4802_v30, %v4084_v38 }
 0x3a7   :  { %1960 = vmatpush.bf16.msrb.mxu1 %v4087_v43  ;;  %v4004_v43 = vld [vmem:[#allocation9 + $0x64] sm:$0xf0] }
 0x3a9   :  { %1608 = vmatpush.bf16.msra.mxu3 %v3836_v42 }
 0x3ad   :  { %1609 = vmatpush.bf16.msra.mxu3 %v3816_v48  ;;  %v4042_v48 = vld [vmem:[#allocation9 + $0xa0] sm:$0xf] }
 0x407   :  { %v1287_v50 = vpop.permute.xlu1 %1286 }
 0x408   :  { %1289 = vst.msk [vmem:[#allocation2] sm:$0xf] %vm496_vm0, %v1287_v50  ;;  %v4092_v50 = vld [vmem:[#allocation9 + $0x10c] sm:$0xf0] }
 0x409   :  { %1292 = vst.msk [vmem:[#allocation2] sm:$0x3] %vm103_vm2, %v1291_v49  ;;  %v4091_v49 = vor.u32 %v4805_v44, %v4090_v62  ;;  %v4027_v62 = vor.u32 %v4787_v31, %v4024_v33  ;;  %v4773_v33 = vld [vmem:[#allocation9 + $0xc] sm:$0xf] }
 0x40b   :  { %1973 = vmatpush.bf16.msrb.mxu2 %v4091_v49  ;;  %v4783_v49 = vld [vmem:[#allocation9 + $0x5c] sm:$0xf] }
 0x410   :  { %v1293_v51 = vld [vmem:[#allocation2] sm:$0xf] }
 0x411   :  { %1558 = vmatmul.bf16.vlgmr.msrb.gmra.mxu3 %v1293_v51  ;;  %1571 = vmatmul.bf16.vlgmr.msra.gmra.mxu0 %v1293_v51 }
 0x412   :  { %1584 = vmatmul.bf16.vlgmr.msra.gmra.mxu1 %v1293_v51  ;;  %1597 = vmatmul.bf16.vlgmr.msra.gmra.mxu2 %v1293_v51 }
 0x413   :  { %1985 = vmatpush.bf16.msrb.mxu3 %v4115_v32  ;;  %v4032_v32 = vld [vmem:[#allocation9 + $0x94] sm:$0xf0] }
 0x421   :  { %1610 = vmatmul.bf16.vlgmr.msra.gmra.mxu3 %v1293_v51  ;;  %v4794_v51 = vld [vmem:[#allocation9 + $0xb0] sm:$0xf0] }
 0x422   :  { %v4043_v39 = vor.u32 %v4794_v51, %v4042_v48  ;;  %v4779_v48 = vld [vmem:[#allocation9 + $0x38] sm:$0xf0] }
 0x424   :  { %1949 = vmatpush.bf16.msrb.mxu0 %v4043_v39  ;;  %v3984_v39 = vld [vmem:[#allocation9 + $0x3c] sm:$0xf0] }
 0x48e   :  { %v1572_v52 = vpop.f32.mrf.mxu0 }
 0x48f   :  { %v3958_v53 = vmul.f32 -1.442695, %v1572_v52  ;;  %v1585_v54 = vpop.f32.mrf.mxu1  ;;  %v4095_v52 = vor.u32 %v4803_v46, %v4092_v50  ;;  %v3982_v46 = vld [vmem:[#allocation9 + $0x28] sm:$0xf]  ;;  %v4012_v50 = vld [vmem:[#allocation9 + $0x6c] sm:$0xf0] }
 0x490   :  { %v3959_v55 = vmul.f32 -1.442695, %v1585_v54  ;;  %v4064_v54 = vld [vmem:[#allocation9 + $0xdc] sm:$0xf0] }
 0x491   :  { %4990 = vpow2.f32 %v3958_v53  ;;  %v4797_v53 = vld [vmem:[#allocation9 + $0xcc] sm:$0xf]  ;;  %1986 = vmatpush.bf16.msrb.mxu3 %v4095_v52 }
 0x492   :  { %4992 = vpow2.f32 %v3959_v55  ;;  %v4067_v25 = vor.u32 %v4797_v53, %v4064_v54  ;;  %v4011_v54 = vor.u32 %v4785_v47, %v4010_v45 }
 0x494   :  { %v1559_v56 = vpop.f32.mrf.mxu3  ;;  %1961 = vmatpush.bf16.msrb.mxu1 %v4067_v25  ;;  %v4098_v25 = vld [vmem:[#allocation9 + $0x100] sm:$0xf] }
 0x495   :  { %v3957_v58 = vmul.f32 -1.442695, %v1559_v56  ;;  %v5569_v59 = vpop.f32.mrf.mxu2 }
 0x496   :  { %v1574_v60 = vpop.f32.mrf.mxu0 }
 0x497   :  { %v4991_v61 = vpop.eup %4990  ;;  %4994 = vpow2.f32 %v3957_v58  ;;  %v1587_v63 = vpop.f32.mrf.mxu1  ;;  %v4022_v58 = vld [vmem:[#allocation9 + $0x78] sm:$0xf]  ;;  %v4070_v60 = vld [vmem:[#allocation9 + $0xd0] sm:$0xf] }
 0x498   :  { %v4993_v3 = vpop.eup %4992  ;;  %v1625_v6 = vadd.f32 1.0, %v4991_v61  ;;  %v4800_v61 = vld [vmem:[#allocation9 + $0xe0] sm:$0xf0]  ;;  %v4798_v63 = vld [vmem:[#allocation9 + $0xd4] sm:$0xf] }
 0x499   :  { %v5571_v0 = vadd.f32 1.0, %v4993_v3  ;;  %v4118_v3 = vld [vmem:[#allocation9 + $0x128] sm:$0xf] }
 0x49a   :  { %4996 = vrcp.f32 %v1625_v6  ;;  %v1651_v10 = vand.u32 2147483647, %v1625_v6  ;;  %v1653_v19 = vand.u32 2147483648, %v1625_v6  ;;  %vm1647_vm14 = vweird.f32 %v1625_v6 }
 0x49b   :  { %4998 = vrcp.f32 %v5571_v0  ;;  %v1666_v38 = vand.u32 2147483647, %v5571_v0  ;;  %vm1662_vm7 = vweird.f32 %v5571_v0 }
 0x49c   :  { %v1561_v2 = vpop.f32.mrf.mxu3  ;;  %vm5586_vm12 = vcmp.eq.f32.partialorder %v1651_v10, 8.507059e+37  ;;  %v1654_v34 = vor.u32 1.1754944e-38, %v1653_v19  ;;  %v4072_v10 = vld [vmem:[#allocation9 + $0xe4] sm:$0xf0] }
 0x49d   :  { %v4995_v4 = vpop.eup %4994  ;;  %v1600_v5 = vpop.f32.mrf.mxu2  ;;  %v4075_v11 = vor.u32 %v4798_v63, %v4072_v10  ;;  %v4050_v19 = vld [vmem:[#allocation9 + $0xa8] sm:$0xf]  ;;  %vm1667_vm9 = vcmp.eq.f32.partialorder %v1666_v38, 8.507059e+37  ;;  %v4786_v38 = vld [vmem:[#allocation9 + $0x70] sm:$0xf0] }
 0x49e   :  { %v5573_v7 = vadd.f32 1.0, %v4995_v4  ;;  %v4789_v5 = vld [vmem:[#allocation9 + $0x88] sm:$0xf0]  ;;  %v4051_v18 = vor.u32 %v4795_v22, %v4050_v19  ;;  %v4778_v19 = vld [vmem:[#allocation9 + $0x34] sm:$0xf] }
 0x49f   :  { %v4023_v14 = vor.u32 %v4789_v5, %v4022_v58  ;;  %1987 = vmatpush.bf16.msrb.mxu3 %v4075_v11  ;;  %v3962_v58 = vld [vmem:[#allocation9] sm:$0xf]  ;;  %v3990_v11 = vld [vmem:[#allocation9 + $0x30] sm:$0xf] }
 0x4a0   :  { %v5576_v8 = vpop.eup %4996  ;;  %5000 = vrcp.f32 %v5573_v7  ;;  %v1636_v21 = vand.u32 2147483647, %v5573_v7  ;;  %v1638_v40 = vand.u32 2147483648, %v5573_v7  ;;  %vm1632_vm3 = vweird.f32 %v5573_v7 }
 0x4a1   :  { %v1643_v16 = vmul.f32 %v5576_v8, %v1625_v6  ;;  %v5583_v26 = vpop.eup %4998  ;;  %vm1648_vm13 = vweird.f32 %v5576_v8  ;;  %1950 = vmatpush.bf16.msrb.mxu0 %v4023_v14  ;;  %v4775_v14 = vld [vmem:[#allocation9 + $0x18] sm:$0xf0] }
 0x4a2   :  { %v1658_v15 = vmul.f32 %v5583_v26, %v5571_v0  ;;  %vm5603_vm1 = vmor %vm1647_vm14, %vm1648_vm13  ;;  %v1639_v6 = vor.u32 1.1754944e-38, %v1638_v40  ;;  %vm1637_vm5 = vcmp.eq.f32.partialorder %v1636_v21, 8.507059e+37  ;;  %v4030_v21 = vld [vmem:[#allocation9 + $0x80] sm:$0xf]  ;;  %vm1663_vm6 = vweird.f32 %v5583_v26 }
 0x4a3   :  { %v1644_v1 = vsub.f32 1.0, %v1643_v16  ;;  %v4071_v16 = vor.u32 %v4800_v61, %v4070_v60  ;;  %vm5640_vm8 = vmor %vm1662_vm7, %vm1663_vm6  ;;  %v4774_v60 = vld [vmem:[#allocation9 + $0x10] sm:$0xf0] }
 0x4a4   :  { %v5580_v20 = vpop.f32.mrf.mxu3  ;;  %v1659_v4 = vsub.f32 1.0, %v1658_v15 }
 0x4a5   :  { %v1645_v9 = vmul.f32 %v5576_v8, %v1644_v1  ;;  %v4044_v1 = vld [vmem:[#allocation9 + $0xb4] sm:$0xf0]  ;;  %v1672_v28 = vmax.f32 %v5569_v59, %v5580_v20  ;;  %1974 = vmatpush.bf16.msrb.mxu2 %v4071_v16  ;;  %v4784_v59 = vld [vmem:[#allocation9 + $0x60] sm:$0xf0]  ;;  %v4806_v16 = vld [vmem:[#allocation9 + $0x110] sm:$0xf0] }
 0x4a6   :  { %v5590_v57 = vpop.eup %5000  ;;  %v4047_v13 = vor.u32 %v4792_v17, %v4044_v1  ;;  %v1660_v29 = vmul.f32 %v5583_v26, %v1659_v4  ;;  %v4788_v20 = vld [vmem:[#allocation9 + $0x84] sm:$0xf]  ;;  %v3963_v4 = vor.u32 %v4774_v60, %v3962_v58  ;;  %v4099_v10 = vor.u32 %v4806_v16, %v4098_v25 }
 0x4a7   :  { %v1628_v36 = vmul.f32 %v5590_v57, %v5573_v7  ;;  %v1646_v37 = vadd.f32 %v5576_v8, %v1645_v9  ;;  %vm1633_vm15 = vweird.f32 %v5590_v57  ;;  %v4052_v9 = vld [vmem:[#allocation9 + $0xbc] sm:$0xf0]  ;;  %v4780_v1 = vld [vmem:[#allocation9 + $0x40] sm:$0xf0] }
 0x4a8   :  { %vm5614_vm4 = vmor %vm1632_vm3, %vm1633_vm15  ;;  %v4055_v7 = vor.u32 %v4793_v23, %v4052_v9  ;;  %1962 = vmatpush.bf16.msrb.mxu1 %v4047_v13  ;;  %v1661_v15 = vadd.f32 %v5583_v26, %v1660_v29  ;;  %v3991_v22 = vor.u32 %v4780_v1, %v3990_v11  ;;  %v4078_v9 = vld [vmem:[#allocation9 + $0xd8] sm:$0xf]  ;;  %v3970_v29 = vld [vmem:[#allocation9 + $0x8] sm:$0xf] }
 0x4a9   :  { %v1629_v42 = vsub.f32 1.0, %v1628_v36  ;;  %v1650_v56 = vsel %vm5603_vm1, %v5576_v8, %v1646_v37  ;;  %v4790_v37 = vld [vmem:[#allocation9 + $0x90] sm:$0xf0]  ;;  %1975 = vmatpush.bf16.msrb.mxu2 %v4051_v18  ;;  %v3971_v31 = vor.u32 %v4775_v14, %v3970_v29  ;;  %v4267_v1 = vld [vmem:[#allocation9 + $0x12c] sm:$0xf0] }
 0x4aa   :  { %v1655_v12 = vsel %vm5586_vm12, %v1654_v34, %v1650_v56  ;;  %v4031_v40 = vor.u32 %v4790_v37, %v4030_v21  ;;  %v4782_v34 = vld [vmem:[#allocation9 + $0x54] sm:$0xf]  ;;  %1988 = vmatpush.bf16.msrb.mxu3 %v4055_v7  ;;  %v1665_v53 = vsel %vm5640_vm8, %v5583_v26, %v1661_v15  ;;  %v4015_v56 = vor.u32 %v4783_v49, %v4012_v50  ;;  %v4796_v7 = vld [vmem:[#allocation9 + $0xc0] sm:$0xf0]  ;;  %v4038_v37 = vld [vmem:[#allocation9 + $0x88] sm:$0xf] }
 0x4ab   :  { %v1630_v55 = vmul.f32 %v5590_v57, %v1629_v42  ;;  %v1673_v35 = vmul.f32 %v1655_v12, %v5549_v41  ;;  %v1668_v41 = vand.u32 2147483648, %v5571_v0  ;;  %v4035_v42 = vor.u32 %v4788_v20, %v4032_v32  ;;  %v3992_v12 = vld [vmem:[#allocation9 + $0x44] sm:$0xf0]  ;;  %v4018_v32 = vld [vmem:[#allocation9 + $0x60] sm:$0xf] }
 0x4ac   :  { %v1613_v2 = vpop.f32.mrf.mxu3  ;;  %1963 = vmatpush.bf16.msrb.mxu1 %v4027_v62  ;;  %v4007_v52 = vor.u32 %v4782_v34, %v4004_v43  ;;  %v3983_v0 = vor.u32 %v4779_v48, %v3982_v46  ;;  %v3995_v23 = vor.u32 %v4778_v19, %v3992_v12  ;;  %v4019_v62 = vor.u32 %v4786_v38, %v4018_v32  ;;  %v3998_v15 = vld [vmem:[#allocation9 + $0x38] sm:$0xf]  ;;  %v3978_v34 = vld [vmem:[#allocation9 + $0x10] sm:$0xf]  ;;  %v4776_v43 = vld [vmem:[#allocation9 + $0x20] sm:$0xf0] }
 0x4ad   :  { %v1631_v8 = vadd.f32 %v5590_v57, %v1630_v55  ;;  %1976 = vmatpush.bf16.msrb.mxu2 %v4031_v40  ;;  %v1669_v55 = vor.u32 1.1754944e-38, %v1668_v41  ;;  %v4781_v41 = vld [vmem:[#allocation9 + $0x48] sm:$0xf0]  ;;  %v1687_v46 = vld [vmem:[#allocation3 + $0x8] sm:$0x3] }
 0x4ae   :  { %1989 = vmatpush.bf16.msrb.mxu3 %v4035_v42  ;;  %v3999_v40 = vor.u32 %v4781_v41, %v3998_v15  ;;  %v4275_v29 = vld [vmem:[#allocation9 + $0x134] sm:$0xf0]  ;;  %v4834_v32 = vld [vmem:[#allocation9 + $0xb0] sm:$0xf0] }
 0x4af   :  { %v1635_v27 = vsel %vm5614_vm4, %v5590_v57, %v1631_v8  ;;  %v4002_v57 = vld [vmem:[#allocation9 + $0x50] sm:$0xf]  ;;  %v1670_v63 = vsel %vm1667_vm9, %v1669_v55, %v1665_v53  ;;  %v4777_v8 = vld [vmem:[#allocation9 + $0x2c] sm:$0xf] }
 0x4b0   :  { %v1640_v24 = vsel %vm1637_vm5, %v1639_v6, %v1635_v27  ;;  %v4003_v44 = vor.u32 %v4784_v59, %v4002_v57  ;;  %v4811_v6 = vld [vmem:[#allocation9 + $0x138] sm:$0xf0]  ;;  %1964 = vmatpush.bf16.msrb.mxu1 %v4007_v52  ;;  %v3987_v17 = vor.u32 %v4777_v8, %v3984_v39  ;;  %v4801_v27 = vld [vmem:[#allocation9 + $0xe8] sm:$0xf0] }
 0x4b1   :  { %v1674_v36 = vmul.f32 %v1672_v28, %v1640_v24  ;;  %1977 = vmatpush.bf16.msrb.mxu2 %v4011_v54  ;;  %v4119_v5 = vor.u32 %v4811_v6, %v4118_v3  ;;  %v4772_v28 = vld [vmem:[#allocation9 + $0x4] sm:$0xf]  ;;  %v4079_v13 = vor.u32 %v4801_v27, %v4078_v9  ;;  %v3964_v24 = vld [vmem:[#allocation9 + $0x14] sm:$0xf0]  ;;  %v4791_v59 = vld [vmem:[#allocation9 + $0x98] sm:$0xf0] }
 0x4b2   :  { %1951 = vmatpush.bf16.msrb.mxu0 %v4003_v44  ;;  %1990 = vmatpush.bf16.msrb.mxu3 %v4015_v56  ;;  %v3967_v18 = vor.u32 %v4772_v28, %v3964_v24  ;;  %v4039_v20 = vor.u32 %v4791_v59, %v4038_v37  ;;  %v3979_v44 = vor.u32 %v4776_v43, %v3978_v34  ;;  %v4245_v3 = vld [vmem:[#allocation9 + $0xf0] sm:$0xf]  ;;  %v4839_v8 = vld [vmem:[#allocation9 + $0xd8] sm:$0xf0]  ;;  %v4848_v9 = vld [vmem:[#allocation9 + $0x124] sm:$0xf] }
 0x4b3   :  { %v5630_v30 = vadd.f32 %v1674_v36, %v1673_v35  ;;  %v3972_v35 = vld [vmem:[#allocation9 + $0x1c] sm:$0xf0]  ;;  %v4058_v36 = vld [vmem:[#allocation9 + $0xb0] sm:$0xf]  ;;  %v4253_v37 = vld [vmem:[#allocation9 + $0xf8] sm:$0xf] }
 0x4b4   :  { %1965 = vmatpush.bf16.msrb.mxu1 %v3987_v17  ;;  %v3975_v57 = vor.u32 %v4773_v33, %v3972_v35  ;;  %v4059_v21 = vor.u32 %v4796_v7, %v4058_v36  ;;  %v4847_v17 = vld [vmem:[#allocation9 + $0x11c] sm:$0xf]  ;;  %v4842_v33 = vld [vmem:[#allocation9 + $0xf4] sm:$0xf]  ;;  %v4278_v7 = vor.u32 %v4848_v9, %v4275_v29  ;;  %v4255_v43 = vld [vmem:[#allocation9 + $0x10c] sm:$0xf0] }
 0x4b5   :  { %5002 = vtanh.f32 %v5630_v30  ;;  %1978 = vmatpush.bf16.msrb.mxu2 %v3991_v22  ;;  %v4270_v12 = vor.u32 %v4847_v17, %v4267_v1  ;;  %v4273_v22 = vld [vmem:[#allocation9 + $0x120] sm:$0xf]  ;;  %v4843_v34 = vld [vmem:[#allocation9 + $0xfc] sm:$0xf]  ;;  %v4213_v1 = vld [vmem:[#allocation9 + $0xa8] sm:$0xf] }
 0x4b6   :  { %1952 = vmatpush.bf16.msrb.mxu0 %v3983_v0  ;;  %1991 = vmatpush.bf16.msrb.mxu3 %v3995_v23  ;;  %v4850_v23 = vld [vmem:[#allocation9 + $0x130] sm:$0xf0]  ;;  %v4165_v9 = vld [vmem:[#allocation9 + $0x50] sm:$0xf] }
 0x4b8   :  { %1966 = vmatpush.bf16.msrb.mxu1 %v3967_v18 }
 0x4b9   :  { %1979 = vmatpush.bf16.msrb.mxu2 %v3971_v31  ;;  %v5675_v31 = vld [vmem:[#allocation9 + $0xa0] sm:$0xf] }
 0x4ba   :  { %1953 = vmatpush.bf16.msrb.mxu0 %v3963_v4  ;;  %1992 = vmatpush.bf16.msrb.mxu3 %v3975_v57  ;;  %v4274_v57 = vor.u32 %v4850_v23, %v4273_v22 }
 0x4bb   :  { %v5003_v61 = vpop.eup %5002 }
 0x4bc   :  { %v1677_v2 = vmul.f32 %v5003_v61, %v1670_v63  ;;  %v4265_v61 = vld [vmem:[#allocation9 + $0x118] sm:$0xf]  ;;  %v4849_v63 = vld [vmem:[#allocation9 + $0x128] sm:$0xf0] }
 0x4bd   :  { %v4266_v4 = vor.u32 %v4849_v63, %v4265_v61  ;;  %2355 = vmatpush.bf16.msra.mxu2 %v4270_v12 }
 0x4be   :  { %v1680_v26 = vpack.c.bf16 %v1677_v2, %v1677_v2  ;;  %1679 = vst [vmem:[#allocation11 + $0x18] sm:$0xff] %v1677_v2  ;;  %1998 = vmatpush.bf16.msra.mxu0 %v4119_v5  ;;  %2368 = vmatpush.bf16.msra.mxu3 %v4274_v57 }
 0x4bf   :  { %2342 = vmatpush.bf16.msra.mxu1 %v4266_v4  ;;  %v4235_v4 = vld [vmem:[#allocation9 + $0xe4] sm:$0xf0] }
 0x4c0   :  { %1682 = vrot.lane.b32.xlu2 %v1680_v26, %s5222_s2  ;;  %v4844_v26 = vld [vmem:[#allocation9 + $0x100] sm:$0xf0] }
 0x4c1   :  { %v4246_v11 = vor.u32 %v4844_v26, %v4245_v3 }
 0x4c2   :  { %1999 = vmatpush.bf16.msra.mxu0 %v4099_v10  ;;  %v4225_v10 = vld [vmem:[#allocation9 + $0xc8] sm:$0xf] }
 0x4c3   :  { %2343 = vmatpush.bf16.msra.mxu1 %v4246_v11  ;;  %v4226_v36 = vor.u32 %v4839_v8, %v4225_v10 }
 0x4c6   :  { %2000 = vmatpush.bf16.msra.mxu0 %v4079_v13 }
 0x4c7   :  { %2344 = vmatpush.bf16.msra.mxu1 %v4226_v36 }
 0x4ca   :  { %2001 = vmatpush.bf16.msra.mxu0 %v4059_v21  ;;  %v4247_v21 = vld [vmem:[#allocation9 + $0x104] sm:$0xf0] }
 0x4cb   :  { %v4250_v38 = vor.u32 %v4842_v33, %v4247_v21  ;;  %v4828_v21 = vld [vmem:[#allocation9 + $0x84] sm:$0xf] }
 0x4cd   :  { %2356 = vmatpush.bf16.msra.mxu2 %v4250_v38 }
 0x4ce   :  { %2002 = vmatpush.bf16.msra.mxu0 %v4039_v20  ;;  %v4822_v20 = vld [vmem:[#allocation9 + $0x54] sm:$0xf] }
 0x4d2   :  { %2003 = vmatpush.bf16.msra.mxu0 %v4019_v62  ;;  %v4845_v62 = vld [vmem:[#allocation9 + $0x108] sm:$0xf0] }
 0x4d6   :  { %2004 = vmatpush.bf16.msra.mxu0 %v3999_v40  ;;  %v4254_v40 = vor.u32 %v4845_v62, %v4253_v37  ;;  %v4195_v37 = vld [vmem:[#allocation9 + $0x94] sm:$0xf0]  ;;  %v4145_v62 = vld [vmem:[#allocation9 + $0x28] sm:$0xf] }
 0x4d8   :  { %2369 = vmatpush.bf16.msra.mxu3 %v4254_v40 }
 0x4da   :  { %2005 = vmatpush.bf16.msra.mxu0 %v3979_v44 }
 0x51a   :  { %v1683_v42 = vpop.permute.xlu2 %1682 }
 0x51b   :  { %1685 = vst.msk [vmem:[#allocation2] sm:$0xf] %vm496_vm0, %v1683_v42  ;;  %v4185_v42 = vld [vmem:[#allocation9 + $0x78] sm:$0xf] }
 0x51c   :  { %1688 = vst.msk [vmem:[#allocation2] sm:$0x3] %vm103_vm2, %v1687_v46 }
 0x523   :  { %v1689_v45 = vld [vmem:[#allocation2] sm:$0xf] }
 0x524   :  { %1954 = vmatmul.bf16.vlgmr.msrb.gmra.mxu0 %v1689_v45  ;;  %1967 = vmatmul.bf16.vlgmr.msrb.gmra.mxu1 %v1689_v45 }
 0x525   :  { %1980 = vmatmul.bf16.vlgmr.msrb.gmra.mxu2 %v1689_v45  ;;  %1993 = vmatmul.bf16.vlgmr.msrb.gmra.mxu3 %v1689_v45 }
 0x526   :  { %2381 = vmatpush.bf16.msrb.mxu0 %v4278_v7  ;;  %v4830_v7 = vld [vmem:[#allocation9 + $0x90] sm:$0xf0] }
 0x534   :  { %2006 = vmatmul.bf16.vlgmr.msra.gmra.mxu0 %v1689_v45  ;;  %v4258_v45 = vor.u32 %v4843_v34, %v4255_v43  ;;  %v4198_v43 = vor.u32 %v4828_v21, %v4195_v37  ;;  %v4181_v21 = vld [vmem:[#allocation9 + $0x60] sm:$0xf]  ;;  %v4826_v37 = vld [vmem:[#allocation9 + $0x70] sm:$0xf0] }
 0x536   :  { %2382 = vmatpush.bf16.msrb.mxu0 %v4258_v45  ;;  %v4823_v45 = vld [vmem:[#allocation9 + $0x5c] sm:$0xf] }
 0x5a1   :  { %v1955_v47 = vpop.f32.mrf.mxu0  ;;  %v1968_v48 = vpop.f32.mrf.mxu1 }
 0x5a2   :  { %v4120_v49 = vmul.f32 -1.442695, %v1955_v47  ;;  %v4121_v50 = vmul.f32 -1.442695, %v1968_v48  ;;  %v4837_v47 = vld [vmem:[#allocation9 + $0xcc] sm:$0xf] }
 0x5a3   :  { %v4227_v48 = vld [vmem:[#allocation9 + $0xdc] sm:$0xf0] }
 0x5a4   :  { %5004 = vpow2.f32 %v4120_v49 }
 0x5a5   :  { %5006 = vpow2.f32 %v4121_v50 }
 0x5a8   :  { %v1981_v51 = vpop.f32.mrf.mxu2  ;;  %v5650_v52 = vpop.f32.mrf.mxu3 }
 0x5a9   :  { %v4122_v53 = vmul.f32 -1.442695, %v1981_v51  ;;  %v1957_v54 = vpop.f32.mrf.mxu0  ;;  %v1970_v55 = vpop.f32.mrf.mxu1  ;;  %v4206_v51 = vor.u32 %v4834_v32, %v5675_v31  ;;  %v4167_v32 = vld [vmem:[#allocation9 + $0x64] sm:$0xf0] }
 0x5aa   :  { %v5005_v0 = vpop.eup %5004  ;;  %v4233_v54 = vld [vmem:[#allocation9 + $0xd0] sm:$0xf]  ;;  %v4840_v55 = vld [vmem:[#allocation9 + $0xe0] sm:$0xf0] }
 0x5ab   :  { %v5007_v56 = vpop.eup %5006  ;;  %v5652_v58 = vadd.f32 1.0, %v5005_v0  ;;  %5008 = vpow2.f32 %v4122_v53  ;;  %v4230_v53 = vor.u32 %v4837_v47, %v4227_v48  ;;  %v4838_v0 = vld [vmem:[#allocation9 + $0xd4] sm:$0xf]  ;;  %2345 = vmatpush.bf16.msra.mxu1 %v4206_v51  ;;  %v4175_v47 = vld [vmem:[#allocation9 + $0x6c] sm:$0xf0] }
 0x5ac   :  { %v5654_v60 = vadd.f32 1.0, %v5007_v56  ;;  %v4238_v10 = vor.u32 %v4838_v0, %v4235_v4  ;;  %v4261_v4 = vld [vmem:[#allocation9 + $0x100] sm:$0xf] }
 0x5ad   :  { %5010 = vrcp.f32 %v5652_v58  ;;  %v2032_v16 = vand.u32 2147483647, %v5652_v58  ;;  %v2034_v13 = vand.u32 2147483648, %v5652_v58  ;;  %vm2028_vm12 = vweird.f32 %v5652_v58  ;;  %2357 = vmatpush.bf16.msra.mxu2 %v4230_v53  ;;  %v4125_v53 = vld [vmem:[#allocation9] sm:$0xf] }
 0x5ae   :  { %5012 = vrcp.f32 %v5654_v60  ;;  %v2047_v24 = vand.u32 2147483647, %v5654_v60  ;;  %v2049_v18 = vand.u32 2147483648, %v5654_v60  ;;  %vm2043_vm14 = vweird.f32 %v5654_v60  ;;  %2383 = vmatpush.bf16.msrb.mxu0 %v4238_v10  ;;  %v4153_v10 = vld [vmem:[#allocation9 + $0x30] sm:$0xf] }
 0x5af   :  { %vm5677_vm10 = vcmp.eq.f32.partialorder %v2032_v16, 8.507059e+37  ;;  %v2035_v41 = vor.u32 1.1754944e-38, %v2034_v13  ;;  %v4234_v16 = vor.u32 %v4840_v55, %v4233_v54  ;;  %v4215_v13 = vld [vmem:[#allocation9 + $0xbc] sm:$0xf0]  ;;  %v4814_v54 = vld [vmem:[#allocation9 + $0x10] sm:$0xf0] }
 0x5b0   :  { %v1983_v6 = vpop.f32.mrf.mxu2  ;;  %v1996_v2 = vpop.f32.mrf.mxu3  ;;  %vm5702_vm1 = vcmp.eq.f32.partialorder %v2047_v24, 8.507059e+37  ;;  %v4851_v55 = vld [vmem:[#allocation9 + $0x138] sm:$0xf0] }
 0x5b1   :  { %v5009_v5 = vpop.eup %5008  ;;  %v5658_v25 = vpop.f32.mrf.mxu0  ;;  %v4829_v2 = vld [vmem:[#allocation9 + $0x88] sm:$0xf0]  ;;  %2370 = vmatpush.bf16.msra.mxu3 %v4234_v16  ;;  %v4147_v16 = vld [vmem:[#allocation9 + $0x3c] sm:$0xf0] }
 0x5b2   :  { %v5661_v39 = vadd.f32 1.0, %v5009_v5  ;;  %v2068_v6 = vmax.f32 %v5650_v52, %v5658_v25  ;;  %v2050_v5 = vor.u32 1.1754944e-38, %v2049_v18  ;;  %v4832_v52 = vld [vmem:[#allocation9 + $0xa4] sm:$0xf]  ;;  %v4207_v25 = vld [vmem:[#allocation9 + $0xb4] sm:$0xf0]  ;;  %v4186_v23 = vor.u32 %v4829_v2, %v4185_v42 }
 0x5b3   :  { %v5663_v19 = vpop.eup %5010  ;;  %v4827_v18 = vld [vmem:[#allocation9 + $0x7c] sm:$0xf]  ;;  %v4825_v42 = vld [vmem:[#allocation9 + $0x68] sm:$0xf0] }
 0x5b4   :  { %v5665_v27 = vpop.eup %5012  ;;  %5014 = vrcp.f32 %v5661_v39  ;;  %v2024_v28 = vmul.f32 %v5663_v19, %v5652_v58  ;;  %vm2029_vm11 = vweird.f32 %v5663_v19  ;;  %2346 = vmatpush.bf16.msra.mxu1 %v4186_v23  ;;  %vm2058_vm5 = vweird.f32 %v5661_v39  ;;  %v4127_v23 = vld [vmem:[#allocation9 + $0x14] sm:$0xf0] }
 0x5b5   :  { %v2039_v14 = vmul.f32 %v5665_v27, %v5654_v60  ;;  %vm2044_vm13 = vweird.f32 %v5665_v27  ;;  %vm5697_vm15 = vmor %vm2028_vm12, %vm2029_vm11  ;;  %v4210_v60 = vor.u32 %v4832_v52, %v4207_v25  ;;  %v2064_v38 = vand.u32 2147483648, %v5661_v39  ;;  %v4820_v25 = vld [vmem:[#allocation9 + $0x40] sm:$0xf0] }
 0x5b6   :  { %v2025_v35 = vsub.f32 1.0, %v2024_v28  ;;  %vm5715_vm3 = vmor %vm2043_vm14, %vm2044_vm13  ;;  %v4833_v28 = vld [vmem:[#allocation9 + $0xac] sm:$0xf]  ;;  %v2062_v40 = vand.u32 2147483647, %v5661_v39 }
 0x5b7   :  { %v2040_v59 = vsub.f32 1.0, %v2039_v14  ;;  %v4824_v14 = vld [vmem:[#allocation9 + $0x60] sm:$0xf0]  ;;  %v4218_v33 = vor.u32 %v4833_v28, %v4215_v13  ;;  %2358 = vmatpush.bf16.msra.mxu2 %v4210_v60  ;;  %v2065_v51 = vor.u32 1.1754944e-38, %v2064_v38  ;;  %v4815_v28 = vld [vmem:[#allocation9 + $0x18] sm:$0xf0] }
 0x5b8   :  { %v2026_v15 = vmul.f32 %v5663_v19, %v2025_v35  ;;  %v4193_v35 = vld [vmem:[#allocation9 + $0x80] sm:$0xf]  ;;  %vm2063_vm7 = vcmp.eq.f32.partialorder %v2062_v40, 8.507059e+37  ;;  %v4141_v38 = vld [vmem:[#allocation9 + $0x10] sm:$0xf] }
 0x5b9   :  { %v2041_v44 = vmul.f32 %v5665_v27, %v2040_v59  ;;  %v2009_v46 = vpop.f32.mrf.mxu0  ;;  %v4166_v59 = vor.u32 %v4824_v14, %v4165_v9  ;;  %2384 = vmatpush.bf16.msrb.mxu0 %v4218_v33  ;;  %v4194_v34 = vor.u32 %v4830_v7, %v4193_v35  ;;  %v4133_v9 = vld [vmem:[#allocation9 + $0x8] sm:$0xf]  ;;  %v4135_v14 = vld [vmem:[#allocation9 + $0x1c] sm:$0xf0] }
 0x5ba   :  { %v5686_v49 = vpop.eup %5014  ;;  %v2027_v50 = vadd.f32 %v5663_v19, %v2026_v15  ;;  %v4819_v15 = vld [vmem:[#allocation9 + $0x38] sm:$0xf0]  ;;  %v4170_v46 = vor.u32 %v4822_v20, %v4167_v32  ;;  %v4201_v35 = vld [vmem:[#allocation9 + $0x88] sm:$0xf]  ;;  %v4821_v20 = vld [vmem:[#allocation9 + $0x48] sm:$0xf0] }
 0x5bb   :  { %v2054_v56 = vmul.f32 %v5686_v49, %v5661_v39  ;;  %v2042_v63 = vadd.f32 %v5665_v27, %v2041_v44  ;;  %vm2059_vm4 = vweird.f32 %v5686_v49  ;;  %v4173_v44 = vld [vmem:[#allocation9 + $0x58] sm:$0xf]  ;;  %2347 = vmatpush.bf16.msra.mxu1 %v4166_v59  ;;  %v4281_v39 = vld [vmem:[#allocation9 + $0x128] sm:$0xf] }
 0x5bc   :  { %v2031_v26 = vsel %vm5697_vm15, %v5663_v19, %v2027_v50  ;;  %v4835_v19 = vld [vmem:[#allocation9 + $0xb8] sm:$0xf0]  ;;  %vm5737_vm6 = vmor %vm2058_vm5, %vm2059_vm4  ;;  %v4146_v50 = vor.u32 %v4819_v15, %v4145_v62  ;;  %v4174_v0 = vor.u32 %v4825_v42, %v4173_v44  ;;  %v4282_v2 = vor.u32 %v4851_v55, %v4281_v39  ;;  %v4161_v59 = vld [vmem:[#allocation9 + $0x38] sm:$0xf] }
 0x5bd   :  { %v2055_v8 = vsub.f32 1.0, %v2054_v56  ;;  %v2036_v11 = vsel %vm5677_vm10, %v2035_v41, %v2031_v26  ;;  %v2046_v17 = vsel %vm5715_vm3, %v5665_v27, %v2042_v63  ;;  %v4187_v27 = vld [vmem:[#allocation9 + $0x8c] sm:$0xf0]  ;;  %v4214_v31 = vor.u32 %v4835_v19, %v4213_v1  ;;  %2385 = vmatpush.bf16.msrb.mxu0 %v4198_v43  ;;  %v4846_v26 = vld [vmem:[#allocation9 + $0x110] sm:$0xf0] }
 0x5be   :  { %v2051_v12 = vsel %vm5702_vm1, %v2050_v5, %v2046_v17  ;;  %v2070_v22 = vmul.f32 %v2068_v6, %v2036_v11  ;;  %v4190_v57 = vor.u32 %v4827_v18, %v4187_v27  ;;  %v4178_v56 = vor.u32 %v4823_v45, %v4175_v47  ;;  %v4817_v5 = vld [vmem:[#allocation9 + $0x2c] sm:$0xf]  ;;  %v4155_v11 = vld [vmem:[#allocation9 + $0x44] sm:$0xf0]  ;;  %v4241_v1 = vld [vmem:[#allocation9 + $0xd8] sm:$0xf] }
 0x5bf   :  { %v2069_v24 = vmul.f32 %v2051_v12, %v5630_v30  ;;  %v2056_v29 = vmul.f32 %v5686_v49, %v2055_v8  ;;  %2371 = vmatpush.bf16.msra.mxu3 %v4214_v31  ;;  %2348 = vmatpush.bf16.msra.mxu1 %v4146_v50  ;;  %v4126_v6 = vor.u32 %v4814_v54, %v4125_v53  ;;  %v4818_v8 = vld [vmem:[#allocation9 + $0x34] sm:$0xf]  ;;  %v4841_v19 = vld [vmem:[#allocation9 + $0xe8] sm:$0xf0]  ;;  %v4812_v12 = vld [vmem:[#allocation9 + $0x4] sm:$0xf] }
 0x5c0   :  { %2359 = vmatpush.bf16.msra.mxu2 %v4190_v57  ;;  %v4262_v58 = vor.u32 %v4846_v26, %v4261_v4  ;;  %v4150_v52 = vor.u32 %v4817_v5, %v4147_v16  ;;  %v4154_v17 = vor.u32 %v4820_v25, %v4153_v10  ;;  %v4158_v60 = vor.u32 %v4818_v8, %v4155_v11  ;;  %v4221_v18 = vld [vmem:[#allocation9 + $0xb0] sm:$0xf]  ;;  %v4836_v31 = vld [vmem:[#allocation9 + $0xc0] sm:$0xf0]  ;;  %v4831_v57 = vld [vmem:[#allocation9 + $0x98] sm:$0xf0] }
 0x5c1   :  { %v5728_v36 = vadd.f32 %v2070_v22, %v2069_v24  ;;  %v2057_v30 = vadd.f32 %v5686_v49, %v2056_v29  ;;  %2386 = vmatpush.bf16.msrb.mxu0 %v4178_v56  ;;  %v4242_v22 = vor.u32 %v4841_v19, %v4241_v1  ;;  %v4130_v13 = vor.u32 %v4812_v12, %v4127_v23  ;;  %v4813_v29 = vld [vmem:[#allocation9 + $0xc] sm:$0xf]  ;;  %v4816_v62 = vld [vmem:[#allocation9 + $0x20] sm:$0xf0]  ;;  %v2083_v41 = vld [vmem:[#allocation3 + $0xa] sm:$0x3] }
 0x5c2   :  { %v4134_v24 = vor.u32 %v4815_v28, %v4133_v9  ;;  %v4138_v27 = vor.u32 %v4813_v29, %v4135_v14  ;;  %v4222_v33 = vor.u32 %v4836_v31, %v4221_v18  ;;  %v4202_v7 = vor.u32 %v4831_v57, %v4201_v35  ;;  %v4889_v4 = vld [vmem:[#allocation9 + $0x128] sm:$0xf0]  ;;  %v4408_v26 = vld [vmem:[#allocation9 + $0xf0] sm:$0xf]  ;;  %v4388_v8 = vld [vmem:[#allocation9 + $0xc8] sm:$0xf] }
 0x5c3   :  { %5016 = vtanh.f32 %v5728_v36  ;;  %v2061_v48 = vsel %vm5737_vm6, %v5686_v49, %v2057_v30  ;;  %2372 = vmatpush.bf16.msra.mxu3 %v4194_v34  ;;  %2349 = vmatpush.bf16.msra.mxu1 %v4126_v6  ;;  %v4182_v30 = vor.u32 %v4826_v37, %v4181_v21  ;;  %v4162_v32 = vor.u32 %v4821_v20, %v4161_v59  ;;  %v4879_v11 = vld [vmem:[#allocation9 + $0xd8] sm:$0xf0]  ;;  %v4430_v19 = vld [vmem:[#allocation9 + $0x12c] sm:$0xf0]  ;;  %v4436_v12 = vld [vmem:[#allocation9 + $0x120] sm:$0xf] }
 0x5c4   :  { %v2066_v63 = vsel %vm2063_vm7, %v2065_v51, %v2061_v48  ;;  %2360 = vmatpush.bf16.msra.mxu2 %v4170_v46  ;;  %v4142_v15 = vor.u32 %v4816_v62, %v4141_v38  ;;  %v4887_v1 = vld [vmem:[#allocation9 + $0x11c] sm:$0xf]  ;;  %v4890_v28 = vld [vmem:[#allocation9 + $0x130] sm:$0xf0]  ;;  %v4410_v37 = vld [vmem:[#allocation9 + $0x104] sm:$0xf0]  ;;  %v4389_v38 = vor.u32 %v4879_v11, %v4388_v8 }
 0x5c5   :  { %2387 = vmatpush.bf16.msrb.mxu0 %v4158_v60  ;;  %v4433_v9 = vor.u32 %v4887_v1, %v4430_v19  ;;  %v4437_v31 = vor.u32 %v4890_v28, %v4436_v12  ;;  %v4875_v11 = vld [vmem:[#allocation9 + $0xb8] sm:$0xf0]  ;;  %v4862_v20 = vld [vmem:[#allocation9 + $0x54] sm:$0xf] }
 0x5c7   :  { %2373 = vmatpush.bf16.msra.mxu3 %v4174_v0  ;;  %2394 = vmatpush.bf16.msrb.mxu1 %v4282_v2  ;;  %v4428_v2 = vld [vmem:[#allocation9 + $0x118] sm:$0xf] }
 0x5c8   :  { %2361 = vmatpush.bf16.msra.mxu2 %v4150_v52  ;;  %v4429_v52 = vor.u32 %v4889_v4, %v4428_v2  ;;  %v4869_v4 = vld [vmem:[#allocation9 + $0x88] sm:$0xf0] }
 0x5c9   :  { %v5017_v61 = vpop.eup %5016  ;;  %2388 = vmatpush.bf16.msrb.mxu0 %v4138_v27  ;;  %v4870_v27 = vld [vmem:[#allocation9 + $0x90] sm:$0xf0] }
 0x5ca   :  { %v2073_v3 = vmul.f32 %v5017_v61, %v2066_v63 }
 0x5cb   :  { %2395 = vmatpush.bf16.msrb.mxu1 %v4262_v58  ;;  %2374 = vmatpush.bf16.msra.mxu3 %v4154_v17  ;;  %v4884_v58 = vld [vmem:[#allocation9 + $0x100] sm:$0xf0] }
 0x5cc   :  { %v2076_v49 = vpack.c.bf16 %v2073_v3, %v2073_v3  ;;  %2075 = vst [vmem:[#allocation11 + $0x20] sm:$0xff] %v2073_v3  ;;  %2362 = vmatpush.bf16.msra.mxu2 %v4130_v13  ;;  %v4409_v60 = vor.u32 %v4884_v58, %v4408_v26  ;;  %v4888_v13 = vld [vmem:[#allocation9 + $0x124] sm:$0xf] }
 0x5cd   :  { %2764 = vmatpush.bf16.msra.mxu0 %v4437_v31 }
 0x5ce   :  { %2078 = vrot.lane.b32.xlu2 %v2076_v49, %s5222_s2 }
 0x5cf   :  { %2396 = vmatpush.bf16.msrb.mxu1 %v4242_v22  ;;  %2375 = vmatpush.bf16.msra.mxu3 %v4134_v24  ;;  %v4438_v24 = vld [vmem:[#allocation9 + $0x134] sm:$0xf0] }
 0x5d0   :  { %2738 = vmatpush.bf16.msrb.mxu2 %v4429_v52  ;;  %v4441_v21 = vor.u32 %v4888_v13, %v4438_v24  ;;  %v4376_v52 = vld [vmem:[#allocation9 + $0xa8] sm:$0xf]  ;;  %v4328_v13 = vld [vmem:[#allocation9 + $0x50] sm:$0xf]  ;;  %v4867_v24 = vld [vmem:[#allocation9 + $0x7c] sm:$0xf] }
 0x5d3   :  { %2397 = vmatpush.bf16.msrb.mxu1 %v4222_v33  ;;  %v4882_v33 = vld [vmem:[#allocation9 + $0xf4] sm:$0xf]  ;;  %2751 = vmatpush.bf16.msrb.mxu3 %v4433_v9 }
 0x5d4   :  { %2739 = vmatpush.bf16.msrb.mxu2 %v4409_v60  ;;  %v4413_v62 = vor.u32 %v4882_v33, %v4410_v37  ;;  %v4378_v60 = vld [vmem:[#allocation9 + $0xbc] sm:$0xf0] }
 0x5d7   :  { %2398 = vmatpush.bf16.msrb.mxu1 %v4202_v7  ;;  %2752 = vmatpush.bf16.msrb.mxu3 %v4413_v62 }
 0x5d8   :  { %2740 = vmatpush.bf16.msrb.mxu2 %v4389_v38  ;;  %v4859_v38 = vld [vmem:[#allocation9 + $0x38] sm:$0xf0] }
 0x5db   :  { %2399 = vmatpush.bf16.msrb.mxu1 %v4182_v30  ;;  %v4416_v30 = vld [vmem:[#allocation9 + $0xf8] sm:$0xf] }
 0x5df   :  { %2400 = vmatpush.bf16.msrb.mxu1 %v4162_v32  ;;  %v4330_v32 = vld [vmem:[#allocation9 + $0x64] sm:$0xf0] }
 0x5e3   :  { %2401 = vmatpush.bf16.msrb.mxu1 %v4142_v15  ;;  %v4885_v15 = vld [vmem:[#allocation9 + $0x108] sm:$0xf0] }
 0x628   :  { %v2079_v40 = vpop.permute.xlu2 %2078 }
 0x629   :  { %2081 = vst.msk [vmem:[#allocation2] sm:$0xf] %vm496_vm0, %v2079_v40  ;;  %v4368_v40 = vld [vmem:[#allocation9 + $0xa0] sm:$0xf] }
 0x62a   :  { %2084 = vst.msk [vmem:[#allocation2] sm:$0x3] %vm103_vm2, %v2083_v41  ;;  %v4883_v41 = vld [vmem:[#allocation9 + $0xfc] sm:$0xf] }
 0x631   :  { %v2085_v34 = vld [vmem:[#allocation2] sm:$0xf] }
 0x632   :  { %2350 = vmatmul.bf16.vlgmr.msra.gmra.mxu1 %v2085_v34  ;;  %2363 = vmatmul.bf16.vlgmr.msra.gmra.mxu2 %v2085_v34 }
 0x633   :  { %2376 = vmatmul.bf16.vlgmr.msra.gmra.mxu3 %v2085_v34  ;;  %2389 = vmatmul.bf16.vlgmr.msrb.gmra.mxu0 %v2085_v34 }
 0x634   :  { %2777 = vmatpush.bf16.msra.mxu1 %v4441_v21 }
 0x642   :  { %2402 = vmatmul.bf16.vlgmr.msrb.gmra.mxu1 %v2085_v34  ;;  %v4874_v34 = vld [vmem:[#allocation9 + $0xb0] sm:$0xf0] }
 0x6af   :  { %v2351_v43 = vpop.f32.mrf.mxu1 }
 0x6b0   :  { %v4283_v44 = vmul.f32 -1.442695, %v2351_v43  ;;  %v5748_v46 = vpop.f32.mrf.mxu0  ;;  %v4417_v43 = vor.u32 %v4885_v15, %v4416_v30  ;;  %v4308_v30 = vld [vmem:[#allocation9 + $0x28] sm:$0xf]  ;;  %v4336_v15 = vld [vmem:[#allocation9 + $0x58] sm:$0xf] }
 0x6b2   :  { %5018 = vpow2.f32 %v4283_v44  ;;  %v4418_v44 = vld [vmem:[#allocation9 + $0x10c] sm:$0xf0]  ;;  %2765 = vmatpush.bf16.msra.mxu0 %v4417_v43 }
 0x6b3   :  { %v4338_v43 = vld [vmem:[#allocation9 + $0x6c] sm:$0xf0] }
 0x6b5   :  { %v2364_v42 = vpop.f32.mrf.mxu2 }
 0x6b6   :  { %v4284_v45 = vmul.f32 -1.442695, %v2364_v42  ;;  %v2377_v47 = vpop.f32.mrf.mxu3 }
 0x6b7   :  { %v4285_v48 = vmul.f32 -1.442695, %v2377_v47  ;;  %v2353_v50 = vpop.f32.mrf.mxu1 }
 0x6b8   :  { %v5019_v51 = vpop.eup %5018  ;;  %5020 = vpow2.f32 %v4284_v45  ;;  %v2392_v53 = vpop.f32.mrf.mxu0  ;;  %v4421_v50 = vor.u32 %v4883_v41, %v4418_v44  ;;  %v4865_v41 = vld [vmem:[#allocation9 + $0x68] sm:$0xf0] }
 0x6b9   :  { %v2416_v54 = vadd.f32 1.0, %v5019_v51  ;;  %5022 = vpow2.f32 %v4285_v48  ;;  %v4348_v48 = vld [vmem:[#allocation9 + $0x78] sm:$0xf]  ;;  %v4877_v51 = vld [vmem:[#allocation9 + $0xcc] sm:$0xf] }
 0x6ba   :  { %v4390_v53 = vld [vmem:[#allocation9 + $0xdc] sm:$0xf0]  ;;  %2778 = vmatpush.bf16.msra.mxu1 %v4421_v50  ;;  %v4349_v12 = vor.u32 %v4869_v4, %v4348_v48  ;;  %v4854_v50 = vld [vmem:[#allocation9 + $0x10] sm:$0xf0] }
 0x6bb   :  { %5024 = vrcp.f32 %v2416_v54  ;;  %v2428_v16 = vand.u32 2147483647, %v2416_v54  ;;  %v2430_v10 = vand.u32 2147483648, %v2416_v54  ;;  %vm2424_vm8 = vweird.f32 %v2416_v54  ;;  %v4288_v48 = vld [vmem:[#allocation9] sm:$0xf] }
 0x6bd   :  { %v2366_v39 = vpop.f32.mrf.mxu2  ;;  %vm5771_vm10 = vcmp.eq.f32.partialorder %v2428_v16, 8.507059e+37  ;;  %v2431_v57 = vor.u32 1.1754944e-38, %v2430_v10  ;;  %v4872_v16 = vld [vmem:[#allocation9 + $0xa4] sm:$0xf]  ;;  %v4370_v10 = vld [vmem:[#allocation9 + $0xb4] sm:$0xf0] }
 0x6be   :  { %v5021_v55 = vpop.eup %5020  ;;  %v2379_v0 = vpop.f32.mrf.mxu3  ;;  %v4396_v39 = vld [vmem:[#allocation9 + $0xd0] sm:$0xf] }
 0x6bf   :  { %v5023_v56 = vpop.eup %5022  ;;  %v5750_v61 = vadd.f32 1.0, %v5021_v55  ;;  %v5752_v63 = vpop.f32.mrf.mxu1  ;;  %v4880_v55 = vld [vmem:[#allocation9 + $0xe0] sm:$0xf0]  ;;  %v4878_v0 = vld [vmem:[#allocation9 + $0xd4] sm:$0xf] }
 0x6c0   :  { %v5754_v3 = vadd.f32 1.0, %v5023_v56  ;;  %v4397_v26 = vor.u32 %v4880_v55, %v4396_v39  ;;  %v2464_v8 = vmax.f32 %v5748_v46, %v5752_v63  ;;  %v4350_v46 = vld [vmem:[#allocation9 + $0x8c] sm:$0xf0]  ;;  %v4864_v63 = vld [vmem:[#allocation9 + $0x60] sm:$0xf0] }
 0x6c1   :  { %v5756_v6 = vpop.eup %5024  ;;  %5026 = vrcp.f32 %v5750_v61  ;;  %v2443_v25 = vand.u32 2147483647, %v5750_v61  ;;  %v2445_v7 = vand.u32 2147483648, %v5750_v61  ;;  %vm2439_vm14 = vweird.f32 %v5750_v61  ;;  %v4444_v39 = vld [vmem:[#allocation9 + $0x128] sm:$0xf] }
 0x6c2   :  { %5028 = vrcp.f32 %v5754_v3  ;;  %v2420_v49 = vmul.f32 %v5756_v6, %v2416_v54  ;;  %vm2425_vm9 = vweird.f32 %v5756_v6  ;;  %v4393_v54 = vor.u32 %v4877_v51, %v4390_v53  ;;  %2766 = vmatpush.bf16.msra.mxu0 %v4397_v26  ;;  %v4891_v55 = vld [vmem:[#allocation9 + $0x138] sm:$0xf0]  ;;  %v4857_v26 = vld [vmem:[#allocation9 + $0x2c] sm:$0xf] }
 0x6c3   :  { %vm5781_vm11 = vmor %vm2424_vm8, %vm2425_vm9  ;;  %vm5785_vm12 = vcmp.eq.f32.partialorder %v2443_v25, 8.507059e+37  ;;  %v2458_v33 = vand.u32 2147483647, %v5754_v3  ;;  %v4353_v21 = vor.u32 %v4867_v24, %v4350_v46  ;;  %v4329_v37 = vor.u32 %v4864_v63, %v4328_v13  ;;  %v4853_v13 = vld [vmem:[#allocation9 + $0xc] sm:$0xf] }
 0x6c4   :  { %v2421_v5 = vsub.f32 1.0, %v2420_v49  ;;  %v4369_v49 = vor.u32 %v4874_v34, %v4368_v40  ;;  %2753 = vmatpush.bf16.msrb.mxu3 %v4393_v54  ;;  %vm2454_vm3 = vweird.f32 %v5754_v3  ;;  %v4863_v34 = vld [vmem:[#allocation9 + $0x5c] sm:$0xf]  ;;  %v4445_v2 = vor.u32 %v4891_v55, %v4444_v39  ;;  %v4384_v24 = vld [vmem:[#allocation9 + $0xb0] sm:$0xf] }
 0x6c5   :  { %vm2459_vm5 = vcmp.eq.f32.partialorder %v2458_v33, 8.507059e+37  ;;  %v4341_v51 = vor.u32 %v4863_v34, %v4338_v43  ;;  %v4876_v63 = vld [vmem:[#allocation9 + $0xc0] sm:$0xf0] }
 0x6c6   :  { %v2422_v17 = vmul.f32 %v5756_v6, %v2421_v5  ;;  %2741 = vmatpush.bf16.msrb.mxu2 %v4369_v49  ;;  %v4886_v49 = vld [vmem:[#allocation9 + $0x110] sm:$0xf0] }
 0x6c7   :  { %v5763_v22 = vpop.eup %5026  ;;  %v2405_v23 = vpop.f32.mrf.mxu1 }
 0x6c8   :  { %v5766_v29 = vpop.eup %5028  ;;  %v2435_v14 = vmul.f32 %v5763_v22, %v5750_v61  ;;  %v2423_v18 = vadd.f32 %v5756_v6, %v2422_v17  ;;  %vm2440_vm13 = vweird.f32 %v5763_v22  ;;  %v4398_v61 = vld [vmem:[#allocation9 + $0xe4] sm:$0xf0]  ;;  %v4873_v17 = vld [vmem:[#allocation9 + $0xac] sm:$0xf]  ;;  %v4373_v23 = vor.u32 %v4872_v16, %v4370_v10  ;;  %v4860_v16 = vld [vmem:[#allocation9 + $0x40] sm:$0xf0] }
 0x6c9   :  { %v2450_v35 = vmul.f32 %v5766_v29, %v5754_v3  ;;  %vm5798_vm15 = vmor %vm2439_vm14, %vm2440_vm13  ;;  %v4401_v5 = vor.u32 %v4878_v0, %v4398_v61  ;;  %vm2455_vm1 = vweird.f32 %v5766_v29  ;;  %v4310_v61 = vld [vmem:[#allocation9 + $0x3c] sm:$0xf0]  ;;  %v4858_v10 = vld [vmem:[#allocation9 + $0x34] sm:$0xf] }
 0x6ca   :  { %v2436_v59 = vsub.f32 1.0, %v2435_v14  ;;  %v2427_v45 = vsel %vm5781_vm11, %v5756_v6, %v2423_v18  ;;  %v2446_v6 = vor.u32 1.1754944e-38, %v2445_v7  ;;  %v4381_v14 = vor.u32 %v4873_v17, %v4378_v60  ;;  %v4356_v18 = vld [vmem:[#allocation9 + $0x80] sm:$0xf]  ;;  %2754 = vmatpush.bf16.msrb.mxu3 %v4373_v23  ;;  %2742 = vmatpush.bf16.msrb.mxu2 %v4349_v12  ;;  %vm5823_vm4 = vmor %vm2454_vm3, %vm2455_vm1  ;;  %v4881_v17 = vld [vmem:[#allocation9 + $0xe8] sm:$0xf0] }
 0x6cb   :  { %v2451_v42 = vsub.f32 1.0, %v2450_v35  ;;  %v2432_v58 = vsel %vm5771_vm10, %v2431_v57, %v2427_v45  ;;  %2779 = vmatpush.bf16.msra.mxu1 %v4401_v5  ;;  %v4868_v35 = vld [vmem:[#allocation9 + $0x84] sm:$0xf]  ;;  %v4358_v57 = vld [vmem:[#allocation9 + $0x94] sm:$0xf0]  ;;  %v2460_v7 = vand.u32 2147483648, %v5754_v3  ;;  %v4309_v45 = vor.u32 %v4859_v38, %v4308_v30 }
 0x6cc   :  { %v2437_v47 = vmul.f32 %v5763_v22, %v2436_v59  ;;  %v2466_v28 = vmul.f32 %v2464_v8, %v2432_v58  ;;  %v4357_v59 = vor.u32 %v4870_v27, %v4356_v18  ;;  %v4361_v62 = vor.u32 %v4868_v35, %v4358_v57  ;;  %v4316_v58 = vld [vmem:[#allocation9 + $0x30] sm:$0xf]  ;;  %v4852_v60 = vld [vmem:[#allocation9 + $0x4] sm:$0xf]  ;;  %v4296_v12 = vld [vmem:[#allocation9 + $0x8] sm:$0xf] }
 0x6cd   :  { %v2452_v19 = vmul.f32 %v5766_v29, %v2451_v42  ;;  %v4333_v42 = vor.u32 %v4862_v20, %v4330_v32  ;;  %v2461_v3 = vor.u32 1.1754944e-38, %v2460_v7  ;;  %v4313_v5 = vor.u32 %v4857_v26, %v4310_v61  ;;  %v4855_v23 = vld [vmem:[#allocation9 + $0x18] sm:$0xf0]  ;;  %v4364_v18 = vld [vmem:[#allocation9 + $0x88] sm:$0xf] }
 0x6ce   :  { %v2438_v56 = vadd.f32 %v5763_v22, %v2437_v47  ;;  %2755 = vmatpush.bf16.msrb.mxu3 %v4353_v21  ;;  %2743 = vmatpush.bf16.msrb.mxu2 %v4329_v37  ;;  %v4337_v47 = vor.u32 %v4865_v41, %v4336_v15  ;;  %v4871_v27 = vld [vmem:[#allocation9 + $0x98] sm:$0xf0]  ;;  %v4344_v35 = vld [vmem:[#allocation9 + $0x60] sm:$0xf]  ;;  %v4866_v57 = vld [vmem:[#allocation9 + $0x70] sm:$0xf0] }
 0x6cf   :  { %2780 = vmatpush.bf16.msra.mxu1 %v4381_v14  ;;  %v4385_v14 = vor.u32 %v4876_v63, %v4384_v24  ;;  %v4365_v33 = vor.u32 %v4871_v27, %v4364_v18  ;;  %v4324_v7 = vld [vmem:[#allocation9 + $0x38] sm:$0xf]  ;;  %v4861_v21 = vld [vmem:[#allocation9 + $0x48] sm:$0xf0]  ;;  %v4304_v30 = vld [vmem:[#allocation9 + $0x10] sm:$0xf] }
 0x6d0   :  { %v2442_v25 = vsel %vm5798_vm15, %v5763_v22, %v2438_v56  ;;  %v4377_v22 = vor.u32 %v4875_v11, %v4376_v52  ;;  %v4318_v52 = vld [vmem:[#allocation9 + $0x44] sm:$0xf0]  ;;  %v4404_v11 = vld [vmem:[#allocation9 + $0xd8] sm:$0xf]  ;;  %v4325_v37 = vor.u32 %v4861_v21, %v4324_v7  ;;  %v2479_v32 = vld [vmem:[#allocation3 + $0xc] sm:$0x3] }
 0x6d1   :  { %v2447_v1 = vsel %vm5785_vm12, %v2446_v6, %v2442_v25  ;;  %v4424_v6 = vld [vmem:[#allocation9 + $0x100] sm:$0xf]  ;;  %v4317_v25 = vor.u32 %v4860_v16, %v4316_v58  ;;  %v4321_v8 = vor.u32 %v4858_v10, %v4318_v52  ;;  %v4551_v58 = vld [vmem:[#allocation9 + $0xc8] sm:$0xf]  ;;  %v4919_v16 = vld [vmem:[#allocation9 + $0xd8] sm:$0xf0] }
 0x6d2   :  { %v2465_v9 = vmul.f32 %v2447_v1, %v5728_v36  ;;  %v2453_v36 = vadd.f32 %v5766_v29, %v2452_v19  ;;  %2767 = vmatpush.bf16.msra.mxu0 %v4377_v22  ;;  %2756 = vmatpush.bf16.msrb.mxu3 %v4333_v42  ;;  %v4425_v4 = vor.u32 %v4886_v49, %v4424_v6  ;;  %v4290_v19 = vld [vmem:[#allocation9 + $0x14] sm:$0xf0]  ;;  %v4298_v22 = vld [vmem:[#allocation9 + $0x1c] sm:$0xf0]  ;;  %v4924_v49 = vld [vmem:[#allocation9 + $0x100] sm:$0xf0] }
 0x6d3   :  { %2781 = vmatpush.bf16.msra.mxu1 %v4361_v62  ;;  %2744 = vmatpush.bf16.msrb.mxu2 %v4309_v45  ;;  %v4405_v1 = vor.u32 %v4881_v17, %v4404_v11  ;;  %v4301_v46 = vor.u32 %v4853_v13, %v4298_v22  ;;  %v4927_v10 = vld [vmem:[#allocation9 + $0x11c] sm:$0xf]  ;;  %v4593_v52 = vld [vmem:[#allocation9 + $0x12c] sm:$0xf0]  ;;  %v4599_v17 = vld [vmem:[#allocation9 + $0x120] sm:$0xf] }
 0x6d4   :  { %v5813_v31 = vadd.f32 %v2466_v28, %v2465_v9  ;;  %v2457_v44 = vsel %vm5823_vm4, %v5766_v29, %v2453_v36  ;;  %v4289_v29 = vor.u32 %v4854_v50, %v4288_v48  ;;  %v4293_v9 = vor.u32 %v4852_v60, %v4290_v19  ;;  %v4930_v60 = vld [vmem:[#allocation9 + $0x130] sm:$0xf0]  ;;  %v4601_v22 = vld [vmem:[#allocation9 + $0x134] sm:$0xf0]  ;;  %v4573_v18 = vld [vmem:[#allocation9 + $0x104] sm:$0xf0] }
 0x6d5   :  { %v2462_v54 = vsel %vm2459_vm5, %v2461_v3, %v2457_v44  ;;  %v4297_v28 = vor.u32 %v4855_v23, %v4296_v12  ;;  %v4345_v36 = vor.u32 %v4866_v57, %v4344_v35  ;;  %v4596_v11 = vor.u32 %v4927_v10, %v4593_v52  ;;  %v4925_v7 = vld [vmem:[#allocation9 + $0x108] sm:$0xf0] }
 0x6d6   :  { %5030 = vtanh.f32 %v5813_v31  ;;  %2768 = vmatpush.bf16.msra.mxu0 %v4357_v59  ;;  %2757 = vmatpush.bf16.msrb.mxu3 %v4313_v5  ;;  %v4856_v59 = vld [vmem:[#allocation9 + $0x20] sm:$0xf0]  ;;  %v4600_v13 = vor.u32 %v4930_v60, %v4599_v17  ;;  %v4552_v35 = vor.u32 %v4919_v16, %v4551_v58 }
 0x6d7   :  { %2782 = vmatpush.bf16.msra.mxu1 %v4341_v51  ;;  %2745 = vmatpush.bf16.msrb.mxu2 %v4289_v29  ;;  %v4305_v20 = vor.u32 %v4856_v59, %v4304_v30  ;;  %v4929_v29 = vld [vmem:[#allocation9 + $0x128] sm:$0xf0]  ;;  %v4923_v59 = vld [vmem:[#allocation9 + $0xfc] sm:$0xf]  ;;  %v4912_v58 = vld [vmem:[#allocation9 + $0xa4] sm:$0xf] }
 0x6da   :  { %2769 = vmatpush.bf16.msra.mxu0 %v4337_v47  ;;  %2758 = vmatpush.bf16.msrb.mxu3 %v4293_v9 }
 0x6db   :  { %2790 = vmatpush.bf16.msra.mxu2 %v4445_v2  ;;  %2783 = vmatpush.bf16.msra.mxu1 %v4321_v8 }
 0x6dc   :  { %v5031_v53 = vpop.eup %5030 }
 0x6dd   :  { %v2469_v0 = vmul.f32 %v5031_v53, %v2462_v54 }
 0x6de   :  { %2770 = vmatpush.bf16.msra.mxu0 %v4317_v25 }
 0x6df   :  { %v2472_v56 = vpack.c.bf16 %v2469_v0, %v2469_v0  ;;  %2471 = vst [vmem:[#allocation11 + $0x28] sm:$0xff] %v2469_v0  ;;  %2791 = vmatpush.bf16.msra.mxu2 %v4425_v4  ;;  %2784 = vmatpush.bf16.msra.mxu1 %v4301_v46  ;;  %v4591_v0 = vld [vmem:[#allocation9 + $0x118] sm:$0xf]  ;;  %v5866_v46 = vld [vmem:[#allocation9 + $0xb0] sm:$0xf0] }
 0x6e0   :  { %v4592_v6 = vor.u32 %v4929_v29, %v4591_v0  ;;  %v4561_v0 = vld [vmem:[#allocation9 + $0xe4] sm:$0xf0] }
 0x6e1   :  { %2474 = vrot.lane.b32.xlu0 %v2472_v56, %s5222_s2  ;;  %v4571_v56 = vld [vmem:[#allocation9 + $0xf0] sm:$0xf] }
 0x6e2   :  { %2771 = vmatpush.bf16.msra.mxu0 %v4297_v28  ;;  %3134 = vmatpush.bf16.msra.mxu3 %v4592_v6  ;;  %v4572_v5 = vor.u32 %v4924_v49, %v4571_v56  ;;  %v5862_v28 = vld [vmem:[#allocation9 + $0xa0] sm:$0xf]  ;;  %v4926_v56 = vld [vmem:[#allocation9 + $0x110] sm:$0xf0] }
 0x6e3   :  { %2792 = vmatpush.bf16.msra.mxu2 %v4405_v1  ;;  %v4928_v1 = vld [vmem:[#allocation9 + $0x124] sm:$0xf]  ;;  %3160 = vmatpush.bf16.msrb.mxu1 %v4600_v13 }
 0x6e4   :  { %v4604_v63 = vor.u32 %v4928_v1, %v4601_v22  ;;  %v4541_v1 = vld [vmem:[#allocation9 + $0xbc] sm:$0xf0]  ;;  %v4904_v22 = vld [vmem:[#allocation9 + $0x60] sm:$0xf0] }
 0x6e6   :  { %3147 = vmatpush.bf16.msrb.mxu0 %v4596_v11  ;;  %3135 = vmatpush.bf16.msra.mxu3 %v4572_v5  ;;  %v4533_v5 = vld [vmem:[#allocation9 + $0xb4] sm:$0xf0] }
 0x6e7   :  { %2793 = vmatpush.bf16.msra.mxu2 %v4385_v14  ;;  %v4922_v14 = vld [vmem:[#allocation9 + $0xf4] sm:$0xf] }
 0x6e8   :  { %v4576_v57 = vor.u32 %v4922_v14, %v4573_v18  ;;  %v4521_v14 = vld [vmem:[#allocation9 + $0x94] sm:$0xf0] }
 0x6ea   :  { %3148 = vmatpush.bf16.msrb.mxu0 %v4576_v57  ;;  %3136 = vmatpush.bf16.msra.mxu3 %v4552_v35 }
 0x6eb   :  { %2794 = vmatpush.bf16.msra.mxu2 %v4365_v33 }
 0x6ef   :  { %2795 = vmatpush.bf16.msra.mxu2 %v4345_v36  ;;  %v4579_v36 = vld [vmem:[#allocation9 + $0xf8] sm:$0xf] }
 0x6f0   :  { %v4580_v30 = vor.u32 %v4925_v7, %v4579_v36  ;;  %v4902_v7 = vld [vmem:[#allocation9 + $0x54] sm:$0xf] }
 0x6f2   :  { %3161 = vmatpush.bf16.msrb.mxu1 %v4580_v30 }
 0x6f3   :  { %2796 = vmatpush.bf16.msra.mxu2 %v4325_v37 }
 0x6f7   :  { %2797 = vmatpush.bf16.msra.mxu2 %v4305_v20  ;;  %v4581_v20 = vld [vmem:[#allocation9 + $0x10c] sm:$0xf0] }
 0x753   :  { %v2475_v38 = vpop.permute.xlu0 %2474 }
 0x754   :  { %2477 = vst.msk [vmem:[#allocation2] sm:$0xf] %vm496_vm0, %v2475_v38  ;;  %v5876_v38 = vld [vmem:[#allocation9 + $0x78] sm:$0xf] }
 0x755   :  { %2480 = vst.msk [vmem:[#allocation2] sm:$0x3] %vm103_vm2, %v2479_v32 }
 0x75c   :  { %v2481_v62 = vld [vmem:[#allocation2] sm:$0xf] }
 0x75d   :  { %2746 = vmatmul.bf16.vlgmr.msrb.gmra.mxu2 %v2481_v62  ;;  %2759 = vmatmul.bf16.vlgmr.msrb.gmra.mxu3 %v2481_v62 }
 0x75e   :  { %2772 = vmatmul.bf16.vlgmr.msra.gmra.mxu0 %v2481_v62  ;;  %2785 = vmatmul.bf16.vlgmr.msra.gmra.mxu1 %v2481_v62 }
 0x75f   :  { %3173 = vmatpush.bf16.msrb.mxu2 %v4604_v63  ;;  %v4908_v63 = vld [vmem:[#allocation9 + $0x84] sm:$0xf] }
 0x760   :  { %v4524_v30 = vor.u32 %v4908_v63, %v4521_v14  ;;  %v4507_v14 = vld [vmem:[#allocation9 + $0x60] sm:$0xf] }
 0x76d   :  { %2798 = vmatmul.bf16.vlgmr.msra.gmra.mxu2 %v2481_v62  ;;  %v5878_v62 = vld [vmem:[#allocation9 + $0x88] sm:$0xf0] }
 0x76e   :  { %v4512_v60 = vor.u32 %v5878_v62, %v5876_v38  ;;  %v4903_v38 = vld [vmem:[#allocation9 + $0x5c] sm:$0xf]  ;;  %v4501_v62 = vld [vmem:[#allocation9 + $0x6c] sm:$0xf0] }
 0x7db   :  { %v2773_v15 = vpop.f32.mrf.mxu0  ;;  %v5833_v41 = vpop.f32.mrf.mxu1 }
 0x7dc   :  { %v4448_v40 = vmul.f32 -1.442695, %v2773_v15  ;;  %v4584_v15 = vor.u32 %v4923_v59, %v4581_v20  ;;  %v4499_v59 = vld [vmem:[#allocation9 + $0x58] sm:$0xf]  ;;  %v4905_v20 = vld [vmem:[#allocation9 + $0x68] sm:$0xf0] }
 0x7de   :  { %5032 = vpow2.f32 %v4448_v40  ;;  %v4917_v40 = vld [vmem:[#allocation9 + $0xcc] sm:$0xf]  ;;  %3174 = vmatpush.bf16.msrb.mxu2 %v4584_v15 }
 0x7e0   :  { %v2747_v34 = vpop.f32.mrf.mxu2  ;;  %v2760_v43 = vpop.f32.mrf.mxu3 }
 0x7e1   :  { %v4446_v44 = vmul.f32 -1.442695, %v2747_v34  ;;  %v4447_v42 = vmul.f32 -1.442695, %v2760_v43 }
 0x7e3   :  { %5034 = vpow2.f32 %v4446_v44  ;;  %v2775_v3 = vpop.f32.mrf.mxu0  ;;  %v2788_v45 = vpop.f32.mrf.mxu1  ;;  %v4532_v44 = vor.u32 %v5866_v46, %v5862_v28  ;;  %v4513_v28 = vld [vmem:[#allocation9 + $0x8c] sm:$0xf0]  ;;  %v4910_v46 = vld [vmem:[#allocation9 + $0x90] sm:$0xf0] }
 0x7e4   :  { %v5033_v47 = vpop.eup %5032  ;;  %5036 = vpow2.f32 %v4447_v42  ;;  %v4553_v42 = vld [vmem:[#allocation9 + $0xdc] sm:$0xf0]  ;;  %v4559_v3 = vld [vmem:[#allocation9 + $0xd0] sm:$0xf]  ;;  %v4920_v45 = vld [vmem:[#allocation9 + $0xe0] sm:$0xf0] }
 0x7e5   :  { %v5835_v48 = vadd.f32 1.0, %v5033_v47  ;;  %3137 = vmatpush.bf16.msra.mxu3 %v4532_v44  ;;  %v4500_v44 = vor.u32 %v4905_v20, %v4499_v59 }
 0x7e7   :  { %5038 = vrcp.f32 %v5835_v48  ;;  %vm2850_vm15 = vweird.f32 %v5835_v48 }
 0x7e8   :  { %v2749_v50 = vpop.f32.mrf.mxu2  ;;  %v2762_v51 = vpop.f32.mrf.mxu3 }
 0x7e9   :  { %v5035_v53 = vpop.eup %5034  ;;  %3138 = vmatpush.bf16.msra.mxu3 %v4512_v60  ;;  %v4931_v50 = vld [vmem:[#allocation9 + $0x138] sm:$0xf0] }
 0x7ea   :  { %v5037_v54 = vpop.eup %5036  ;;  %v5838_v39 = vadd.f32 1.0, %v5035_v53  ;;  %v4556_v53 = vor.u32 %v4917_v40, %v4553_v42 }
 0x7eb   :  { %v5840_v55 = vadd.f32 1.0, %v5037_v54  ;;  %v4560_v54 = vor.u32 %v4920_v45, %v4559_v3  ;;  %v4894_v3 = vld [vmem:[#allocation9 + $0x10] sm:$0xf0]  ;;  %v4504_v45 = vor.u32 %v4903_v38, %v4501_v62 }
 0x7ec   :  { %5040 = vrcp.f32 %v5838_v39  ;;  %v2824_v26 = vand.u32 2147483647, %v5838_v39  ;;  %v2826_v23 = vand.u32 2147483648, %v5838_v39  ;;  %vm2820_vm9 = vweird.f32 %v5838_v39  ;;  %3149 = vmatpush.bf16.msrb.mxu0 %v4556_v53 }
 0x7ed   :  { %5042 = vrcp.f32 %v5840_v55  ;;  %v5844_v2 = vpop.eup %5038  ;;  %v2839_v61 = vand.u32 2147483647, %v5840_v55  ;;  %v2841_v9 = vand.u32 2147483648, %v5840_v55  ;;  %vm2835_vm10 = vweird.f32 %v5840_v55  ;;  %3162 = vmatpush.bf16.msrb.mxu1 %v4560_v54 }
 0x7ee   :  { %v5854_v8 = vmul.f32 %v5844_v2, %v5835_v48  ;;  %vm5868_vm6 = vcmp.eq.f32.partialorder %v2824_v26, 8.507059e+37  ;;  %v2827_v51 = vor.u32 1.1754944e-38, %v2826_v23  ;;  %vm2851_vm14 = vweird.f32 %v5844_v2 }
 0x7ef   :  { %vm5903_vm13 = vcmp.eq.f32.partialorder %v2839_v61, 8.507059e+37  ;;  %v2842_v49 = vor.u32 1.1754944e-38, %v2841_v9  ;;  %v4913_v61 = vld [vmem:[#allocation9 + $0xac] sm:$0xf]  ;;  %v4907_v9 = vld [vmem:[#allocation9 + $0x7c] sm:$0xf]  ;;  %vm5933_vm1 = vmor %vm2850_vm15, %vm2851_vm14 }
 0x7f0   :  { %v5846_v4 = vpop.f32.mrf.mxu2  ;;  %v2847_v21 = vsub.f32 1.0, %v5854_v8  ;;  %v4539_v8 = vld [vmem:[#allocation9 + $0xa8] sm:$0xf]  ;;  %v4516_v33 = vor.u32 %v4907_v9, %v4513_v28  ;;  %v4461_v9 = vld [vmem:[#allocation9 + $0x1c] sm:$0xf0] }
 0x7f1   :  { %v2860_v10 = vmax.f32 %v5833_v41, %v5846_v4  ;;  %v4547_v28 = vld [vmem:[#allocation9 + $0xb0] sm:$0xf] }
 0x7f2   :  { %v5850_v25 = vpop.eup %5040  ;;  %v2848_v52 = vmul.f32 %v5844_v2, %v2847_v21  ;;  %v4493_v21 = vld [vmem:[#allocation9 + $0x64] sm:$0xf0] }
 0x7f3   :  { %v5856_v19 = vpop.eup %5042  ;;  %v2816_v12 = vmul.f32 %v5850_v25, %v5838_v39  ;;  %vm2821_vm7 = vweird.f32 %v5850_v25  ;;  %v4918_v39 = vld [vmem:[#allocation9 + $0xd4] sm:$0xf]  ;;  %v4496_v40 = vor.u32 %v4902_v7, %v4493_v21  ;;  %v4896_v7 = vld [vmem:[#allocation9 + $0x20] sm:$0xf0] }
 0x7f4   :  { %v2831_v24 = vmul.f32 %v5856_v19, %v5840_v55  ;;  %vm2836_vm8 = vweird.f32 %v5856_v19  ;;  %vm5888_vm11 = vmor %vm2820_vm9, %vm2821_vm7  ;;  %v4564_v26 = vor.u32 %v4918_v39, %v4561_v0  ;;  %v4915_v55 = vld [vmem:[#allocation9 + $0xb8] sm:$0xf0]  ;;  %v2849_v35 = vadd.f32 %v5844_v2, %v2848_v52  ;;  %v4481_v52 = vld [vmem:[#allocation9 + $0x44] sm:$0xf0] }
 0x7f5   :  { %v2817_v27 = vsub.f32 1.0, %v2816_v12  ;;  %vm5897_vm12 = vmor %vm2835_vm10, %vm2836_vm8  ;;  %v4491_v12 = vld [vmem:[#allocation9 + $0x50] sm:$0xf]  ;;  %v4540_v23 = vor.u32 %v4915_v55, %v4539_v8 }
 0x7f6   :  { %v2832_v37 = vsub.f32 1.0, %v2831_v24  ;;  %3175 = vmatpush.bf16.msrb.mxu2 %v4564_v26  ;;  %v4519_v24 = vld [vmem:[#allocation9 + $0x80] sm:$0xf]  ;;  %v4492_v57 = vor.u32 %v4904_v22, %v4491_v12  ;;  %v4916_v22 = vld [vmem:[#allocation9 + $0xc0] sm:$0xf0] }
 0x7f7   :  { %v2818_v32 = vmul.f32 %v5850_v25, %v2817_v27  ;;  %v2856_v27 = vand.u32 2147483648, %v5835_v48  ;;  %3163 = vmatpush.bf16.msrb.mxu1 %v4540_v23  ;;  %v4520_v36 = vor.u32 %v4910_v46, %v4519_v24  ;;  %v4473_v26 = vld [vmem:[#allocation9 + $0x3c] sm:$0xf0]  ;;  %v4893_v23 = vld [vmem:[#allocation9 + $0xc] sm:$0xf] }
 0x7f8   :  { %v2833_v34 = vmul.f32 %v5856_v19, %v2832_v37  ;;  %v2801_v43 = vpop.f32.mrf.mxu2  ;;  %v4899_v37 = vld [vmem:[#allocation9 + $0x38] sm:$0xf0]  ;;  %3139 = vmatpush.bf16.msra.mxu3 %v4492_v57  ;;  %v4527_v24 = vld [vmem:[#allocation9 + $0x88] sm:$0xf]  ;;  %v4901_v57 = vld [vmem:[#allocation9 + $0x48] sm:$0xf0] }
 0x7f9   :  { %v2819_v47 = vadd.f32 %v5850_v25, %v2818_v32  ;;  %v2854_v32 = vand.u32 2147483647, %v5835_v48  ;;  %v2857_v42 = vor.u32 1.1754944e-38, %v2856_v27  ;;  %v4451_v48 = vld [vmem:[#allocation9] sm:$0xf] }
 0x7fa   :  { %v2834_v29 = vadd.f32 %v5856_v19, %v2833_v34  ;;  %v2853_v34 = vsel %vm5933_vm1, %v5844_v2, %v2849_v35  ;;  %v4452_v39 = vor.u32 %v4894_v3, %v4451_v48  ;;  %v4911_v46 = vld [vmem:[#allocation9 + $0x98] sm:$0xf0]  ;;  %v4906_v27 = vld [vmem:[#allocation9 + $0x70] sm:$0xf0]  ;;  %v4487_v35 = vld [vmem:[#allocation9 + $0x38] sm:$0xf] }
 0x7fb   :  { %v2823_v16 = vsel %vm5888_vm11, %v5850_v25, %v2819_v47  ;;  %v4536_v25 = vor.u32 %v4912_v58, %v4533_v5  ;;  %3164 = vmatpush.bf16.msrb.mxu1 %v4520_v36  ;;  %vm2855_vm3 = vcmp.eq.f32.partialorder %v2854_v32, 8.507059e+37  ;;  %v4607_v47 = vld [vmem:[#allocation9 + $0x128] sm:$0xf]  ;;  %v4479_v58 = vld [vmem:[#allocation9 + $0x30] sm:$0xf]  ;;  %v4528_v63 = vor.u32 %v4911_v46, %v4527_v24 }
 0x7fc   :  { %v2828_v11 = vsel %vm5868_vm6, %v2827_v51, %v2823_v16  ;;  %v2838_v17 = vsel %vm5897_vm12, %v5856_v19, %v2834_v29  ;;  %v4544_v19 = vor.u32 %v4913_v61, %v4541_v1  ;;  %v2858_v53 = vsel %vm2855_vm3, %v2857_v42, %v2853_v34  ;;  %v4587_v29 = vld [vmem:[#allocation9 + $0x100] sm:$0xf]  ;;  %v4900_v16 = vld [vmem:[#allocation9 + $0x40] sm:$0xf0]  ;;  %v4567_v61 = vld [vmem:[#allocation9 + $0xd8] sm:$0xf] }
 0x7fd   :  { %v2843_v41 = vsel %vm5903_vm13, %v2842_v49, %v2838_v17  ;;  %v2862_v4 = vmul.f32 %v2860_v10, %v2828_v11  ;;  %3150 = vmatpush.bf16.msrb.mxu0 %v4536_v25  ;;  %v4608_v2 = vor.u32 %v4931_v50, %v4607_v47  ;;  %v4588_v6 = vor.u32 %v4926_v56, %v4587_v29  ;;  %v4897_v49 = vld [vmem:[#allocation9 + $0x2c] sm:$0xf]  ;;  %v4898_v10 = vld [vmem:[#allocation9 + $0x34] sm:$0xf]  ;;  %v4892_v17 = vld [vmem:[#allocation9 + $0x4] sm:$0xf] }
 0x7fe   :  { %v2861_v13 = vmul.f32 %v2843_v41, %v5813_v31  ;;  %v4471_v31 = vld [vmem:[#allocation9 + $0x28] sm:$0xf]  ;;  %3176 = vmatpush.bf16.msrb.mxu2 %v4544_v19  ;;  %v4476_v5 = vor.u32 %v4897_v49, %v4473_v26  ;;  %v4480_v8 = vor.u32 %v4900_v16, %v4479_v58  ;;  %v4484_v55 = vor.u32 %v4898_v10, %v4481_v52  ;;  %v4921_v11 = vld [vmem:[#allocation9 + $0xe8] sm:$0xf0]  ;;  %v4453_v25 = vld [vmem:[#allocation9 + $0x14] sm:$0xf0] }
 0x7ff   :  { %v4472_v43 = vor.u32 %v4899_v37, %v4471_v31  ;;  %3165 = vmatpush.bf16.msrb.mxu1 %v4500_v44  ;;  %v4568_v60 = vor.u32 %v4921_v11, %v4567_v61  ;;  %v4459_v1 = vld [vmem:[#allocation9 + $0x8] sm:$0xf]  ;;  %v4895_v41 = vld [vmem:[#allocation9 + $0x18] sm:$0xf0]  ;;  %v4548_v19 = vor.u32 %v4916_v22, %v4547_v28  ;;  %v4488_v31 = vor.u32 %v4901_v57, %v4487_v35  ;;  %v4467_v36 = vld [vmem:[#allocation9 + $0x10] sm:$0xf] }
 0x800   :  { %v5923_v18 = vadd.f32 %v2862_v4, %v2861_v13  ;;  %v4456_v4 = vor.u32 %v4892_v17, %v4453_v25  ;;  %v4460_v12 = vor.u32 %v4895_v41, %v4459_v1  ;;  %v4464_v13 = vor.u32 %v4893_v23, %v4461_v9  ;;  %v2875_v37 = vld [vmem:[#allocation3 + $0xe] sm:$0x3] }
 0x801   :  { %3151 = vmatpush.bf16.msrb.mxu0 %v4516_v33  ;;  %3140 = vmatpush.bf16.msra.mxu3 %v4472_v43  ;;  %v4508_v33 = vor.u32 %v4906_v27, %v4507_v14  ;;  %v4468_v21 = vor.u32 %v4896_v7, %v4467_v36 }
 0x802   :  { %5044 = vtanh.f32 %v5923_v18  ;;  %3177 = vmatpush.bf16.msrb.mxu2 %v4524_v30 }
 0x803   :  { %3166 = vmatpush.bf16.msrb.mxu1 %v4480_v8 }
 0x805   :  { %3152 = vmatpush.bf16.msrb.mxu0 %v4496_v40  ;;  %3141 = vmatpush.bf16.msra.mxu3 %v4452_v39 }
 0x806   :  { %3178 = vmatpush.bf16.msrb.mxu2 %v4504_v45 }
 0x807   :  { %3167 = vmatpush.bf16.msrb.mxu1 %v4460_v12 }
 0x808   :  { %v5045_v51 = vpop.eup %5044 }
 0x809   :  { %v2865_v54 = vmul.f32 %v5045_v51, %v2858_v53  ;;  %3186 = vmatpush.bf16.msrb.mxu3 %v4608_v2  ;;  %3153 = vmatpush.bf16.msrb.mxu0 %v4476_v5 }
 0x80a   :  { %3179 = vmatpush.bf16.msrb.mxu2 %v4484_v55 }
 0x80b   :  { %v2868_v0 = vpack.c.bf16 %v2865_v54, %v2865_v54  ;;  %2867 = vst [vmem:[#allocation11 + $0x30] sm:$0xff] %v2865_v54 }
 0x80d   :  { %2870 = vrot.lane.b32.xlu1 %v2868_v0, %s5222_s2  ;;  %3187 = vmatpush.bf16.msrb.mxu3 %v4588_v6 }
 0x80e   :  { %3154 = vmatpush.bf16.msrb.mxu0 %v4456_v4  ;;  %3180 = vmatpush.bf16.msrb.mxu2 %v4464_v13 }
 0x811   :  { %3188 = vmatpush.bf16.msrb.mxu3 %v4568_v60 }
 0x815   :  { %3189 = vmatpush.bf16.msrb.mxu3 %v4548_v19 }
 0x819   :  { %3190 = vmatpush.bf16.msrb.mxu3 %v4528_v63 }
 0x81d   :  { %3191 = vmatpush.bf16.msrb.mxu3 %v4508_v33 }
 0x821   :  { %3192 = vmatpush.bf16.msrb.mxu3 %v4488_v31 }
 0x825   :  { %3193 = vmatpush.bf16.msrb.mxu3 %v4468_v21 }
 0x87f   :  { %v2871_v30 = vpop.permute.xlu1 %2870 }
 0x880   :  { %2873 = vst.msk [vmem:[#allocation2] sm:$0xf] %vm496_vm0, %v2871_v30 }
 0x881   :  { %2876 = vst.msk [vmem:[#allocation2] sm:$0x3] %vm103_vm2, %v2875_v37 }
 0x888   :  { %v2877_v59 = vld [vmem:[#allocation2] sm:$0xf] }
 0x889   :  { %3142 = vmatmul.bf16.vlgmr.msra.gmra.mxu3 %v2877_v59  ;;  %3155 = vmatmul.bf16.vlgmr.msrb.gmra.mxu0 %v2877_v59 }
 0x88a   :  { %3168 = vmatmul.bf16.vlgmr.msrb.gmra.mxu1 %v2877_v59  ;;  %3181 = vmatmul.bf16.vlgmr.msrb.gmra.mxu2 %v2877_v59 }
 0x899   :  { %3194 = vmatmul.bf16.vlgmr.msrb.gmra.mxu3 %v2877_v59 }
 0x906   :  { %v3156_v20 = vpop.f32.mrf.mxu0 }
 0x907   :  { %v4610_v32 = vmul.f32 -1.442695, %v3156_v20  ;;  %v3169_v38 = vpop.f32.mrf.mxu1 }
 0x908   :  { %v4611_v62 = vmul.f32 -1.442695, %v3169_v38 }
 0x909   :  { %5046 = vpow2.f32 %v4610_v32 }
 0x90a   :  { %5048 = vpow2.f32 %v4611_v62 }
 0x90c   :  { %v3143_v15 = vpop.f32.mrf.mxu3 }
 0x90d   :  { %v4609_v40 = vmul.f32 -1.442695, %v3143_v15  ;;  %v3182_v34 = vpop.f32.mrf.mxu2 }
 0x90e   :  { %v3158_v43 = vpop.f32.mrf.mxu0 }
 0x90f   :  { %v5047_v44 = vpop.eup %5046  ;;  %5050 = vpow2.f32 %v4609_v40  ;;  %v3171_v42 = vpop.f32.mrf.mxu1 }
 0x910   :  { %v5049_v48 = vpop.eup %5048  ;;  %v3209_v3 = vadd.f32 1.0, %v5047_v44 }
 0x911   :  { %v5943_v45 = vadd.f32 1.0, %v5049_v48 }
 0x912   :  { %5052 = vrcp.f32 %v3209_v3  ;;  %v3237_v5 = vand.u32 2147483648, %v3209_v3  ;;  %vm3231_vm4 = vweird.f32 %v3209_v3  ;;  %v3235_v10 = vand.u32 2147483647, %v3209_v3 }
 0x913   :  { %5054 = vrcp.f32 %v5943_v45  ;;  %v3252_v24 = vand.u32 2147483648, %v5943_v45  ;;  %vm3246_vm12 = vweird.f32 %v5943_v45  ;;  %v3250_v46 = vand.u32 2147483647, %v5943_v45 }
 0x914   :  { %v3145_v47 = vpop.f32.mrf.mxu3  ;;  %v3238_v17 = vor.u32 1.1754944e-38, %v3237_v5  ;;  %vm3236_vm8 = vcmp.eq.f32.partialorder %v3235_v10, 8.507059e+37 }
 0x915   :  { %v5051_v50 = vpop.eup %5050  ;;  %v3184_v51 = vpop.f32.mrf.mxu2  ;;  %vm3251_vm14 = vcmp.eq.f32.partialorder %v3250_v46, 8.507059e+37 }
 0x916   :  { %v3208_v53 = vadd.f32 1.0, %v5051_v50 }
 0x918   :  { %v5053_v54 = vpop.eup %5052  ;;  %5056 = vrcp.f32 %v3208_v53  ;;  %v3222_v52 = vand.u32 2147483648, %v3208_v53  ;;  %v3220_v55 = vand.u32 2147483647, %v3208_v53  ;;  %vm3216_vm7 = vweird.f32 %v3208_v53 }
 0x919   :  { %v3227_v39 = vmul.f32 %v5053_v54, %v3209_v3  ;;  %v5055_v29 = vpop.eup %5054  ;;  %vm3232_vm2 = vweird.f32 %v5053_v54 }
 0x91a   :  { %v3242_v58 = vmul.f32 %v5055_v29, %v5943_v45  ;;  %vm3233_vm5 = vmor %vm3231_vm4, %vm3232_vm2  ;;  %v3223_v1 = vor.u32 1.1754944e-38, %v3222_v52  ;;  %vm3221_vm10 = vcmp.eq.f32.partialorder %v3220_v55, 8.507059e+37  ;;  %vm3247_vm11 = vweird.f32 %v5055_v29 }
 0x91b   :  { %v3228_v2 = vsub.f32 1.0, %v3227_v39  ;;  %vm3248_vm13 = vmor %vm3246_vm12, %vm3247_vm11 }
 0x91c   :  { %v3195_v0 = vpop.f32.mrf.mxu3  ;;  %v3243_v11 = vsub.f32 1.0, %v3242_v58 }
 0x91d   :  { %v3229_v56 = vmul.f32 %v5053_v54, %v3228_v2  ;;  %v3256_v12 = vmax.f32 %v3182_v34, %v3195_v0 }
 0x91e   :  { %v5057_v6 = vpop.eup %5056  ;;  %v3244_v9 = vmul.f32 %v5055_v29, %v3243_v11 }
 0x91f   :  { %v3212_v49 = vmul.f32 %v5057_v6, %v3208_v53  ;;  %v3230_v26 = vadd.f32 %v5053_v54, %v3229_v56  ;;  %vm3217_vm6 = vweird.f32 %v5057_v6 }
 0x920   :  { %vm3218_vm9 = vmor %vm3216_vm7, %vm3217_vm6  ;;  %v3245_v19 = vadd.f32 %v5055_v29, %v3244_v9 }
 0x921   :  { %v3213_v16 = vsub.f32 1.0, %v3212_v49  ;;  %v3234_v61 = vsel %vm3233_vm5, %v5053_v54, %v3230_v26 }
 0x922   :  { %v3239_v41 = vsel %vm3236_vm8, %v3238_v17, %v3234_v61  ;;  %v3249_v63 = vsel %vm3248_vm13, %v5055_v29, %v3245_v19 }
 0x923   :  { %v3214_v8 = vmul.f32 %v5057_v6, %v3213_v16  ;;  %v3257_v28 = vmul.f32 %v3239_v41, %v5923_v18  ;;  %v3253_v18 = vor.u32 1.1754944e-38, %v3252_v24 }
 0x924   :  { %v3197_v60 = vpop.f32.mrf.mxu3 }
 0x925   :  { %v3215_v25 = vadd.f32 %v5057_v6, %v3214_v8  ;;  %v3254_v27 = vsel %vm3251_vm14, %v3253_v18, %v3249_v63 }
 0x927   :  { %v3219_v4 = vsel %vm3218_vm9, %v5057_v6, %v3215_v25 }
 0x928   :  { %v3224_v23 = vsel %vm3221_vm10, %v3223_v1, %v3219_v4 }
 0x929   :  { %v3258_v13 = vmul.f32 %v3256_v12, %v3224_v23 }
 0x92b   :  { %v3259_v22 = vadd.f32 %v3258_v13, %v3257_v28 }
 0x92d   :  { %5058 = vtanh.f32 %v3259_v22  ;;  %3270 = vst [vmem:[#allocation12] sm:$0xff] %v3259_v22 }
 0x92e   :  { %3294 = dma.vmem_to_hbm [thread:$0]  %s3290_s15, 128, %s3292_s18, [#allocation13]  }
 0x933   :  { %v5059_v14 = vpop.eup %5058 }
 0x934   :  { %v3261_v33 = vmul.f32 %v5059_v14, %v3254_v27 }
 0x936   :  { %v3264_v35 = vpack.c.bf16 %v3261_v33, %v3261_v33  ;;  %3263 = vst [vmem:[#allocation11 + $0x38] sm:$0xff] %v3261_v33 }
 0x937   :  { %3283 = dma.vmem_to_hbm [thread:$0]  %s3276_s19, 1024, %s3278_s22, [#allocation5], %s5228_s23, %s5228_s23, %s5229_s24  }
 0x938   :  { %3266 = vrot.lane.b32.xlu2 %v3264_v35, %s5222_s2 }
 0x992   :  { %v3267_v57 = vpop.permute.xlu2 %3266 }
 0x993   :  { %3269 = vst.msk [vmem:[#allocation2] sm:$0xf] %vm496_vm0, %v3267_v57 }
 0x994   :  { %5210 = dma.done.wait [#allocation5], 1024  }
 0x995   :  { %5211 = vsyncadd [#allocation5], 4294966272 }
 0x996   :  { %5212 = dma.done.wait [#allocation13], 128  }
 0x997   :  { %5213 = vsyncadd [#allocation13], 4294967168 }
 0x998   :  { %3303 = vsyncpa [#allocation4], 1 }
 0x999   :  { %3304 = vsyncpa [#allocation7], 1 }
 0x99a   :  { %3305 = vsyncpa [#allocation10], 1 }
 0x99b   :  { %3306 = vsyncpa [#allocation5], 1 }
 0x99c   :  { %3307 = vsyncpa [#allocation13], 1 }

</bundles_post_ra>
